<compile_context>
chip_gen: v7x
topology: tpu7x:2x2x1
jax: 0.10.0
libtpu: 0.0.40
codegen_flags: <defaults>
</compile_context>

<pallas_src>
import jax
import jax.numpy as jnp
from jax.experimental import pallas as pl
from jax.experimental.pallas import tpu as pltpu


# --------------------------------------------------------------------------
# Kernel A: fused conv stage  y = PReLU(P @ W + b);  out = maxpool2x2(y)
# Patch rows are ordered [pool-parity(4), pooled-spatial(S)], so the 2x2 max
# pool is an elementwise max over four S-row blocks.
# --------------------------------------------------------------------------
def _conv_stage_kernel(p_ref, w_ref, b_ref, a_ref, o_ref):
    p = p_ref[0]                                                   # (4*S, K)
    y = jnp.dot(p, w_ref[...], preferred_element_type=jnp.float32) + b_ref[...]
    a = a_ref[0, 0]
    y = jnp.where(y > 0, y, a * y)                                 # PReLU
    s = o_ref.shape[1]                                             # pooled spatial S
    z = jnp.maximum(jnp.maximum(y[0 * s:1 * s], y[1 * s:2 * s]),
                    jnp.maximum(y[2 * s:3 * s], y[3 * s:4 * s]))   # 2x2 maxpool
    o_ref[0] = z


def conv_stage(patches, w, b, alpha):
    """patches: (N, 4*S, K) f32. Returns pooled activations (N, S, Cout)."""
    N, M, K = patches.shape
    S = M // 4
    Cout = w.shape[1]
    return pl.pallas_call(
        _conv_stage_kernel,
        out_shape=jax.ShapeDtypeStruct((N, S, Cout), jnp.float32),
        grid=(N,),
        in_specs=[
            pl.BlockSpec((1, M, K), lambda n: (n, 0, 0)),
            pl.BlockSpec((K, Cout), lambda n: (0, 0)),
            pl.BlockSpec((1, Cout), lambda n: (0, 0)),
            pl.BlockSpec((1, 1), lambda n: (0, 0)),
        ],
        out_specs=pl.BlockSpec((1, S, Cout), lambda n: (n, 0, 0)),
        compiler_params=pltpu.CompilerParams(dimension_semantics=("parallel",)),
    )(patches, w, b.reshape(1, Cout), jnp.asarray(alpha, jnp.float32).reshape(1, 1))


# --------------------------------------------------------------------------
# Kernel B: entire FC stack + classification head in one kernel.
# --------------------------------------------------------------------------
def _fc_head_kernel(x_ref, w1_ref, b1_ref, a1_ref, w2_ref, b2_ref, a2_ref,
                    w3_ref, b3_ref, ac_ref, wc_ref, bc_ref, o_ref):
    h = jnp.dot(x_ref[...], w1_ref[...], preferred_element_type=jnp.float32) + b1_ref[...]
    h = jnp.where(h > 0, h, a1_ref[0, 0] * h)
    h = jnp.dot(h, w2_ref[...], preferred_element_type=jnp.float32) + b2_ref[...]
    h = jnp.where(h > 0, h, a2_ref[0, 0] * h)
    e = jnp.dot(h, w3_ref[...], preferred_element_type=jnp.float32) + b3_ref[...]
    e = jnp.where(e > 0, e, ac_ref[0, 0] * e)            # ClassificationNet.nonlinear
    logits = jnp.dot(e, wc_ref[...], preferred_element_type=jnp.float32) + bc_ref[...]
    m = jnp.max(logits, axis=-1, keepdims=True)
    s = logits - m
    lse = jnp.log(jnp.sum(jnp.exp(s), axis=-1, keepdims=True))
    o_ref[...] = s - lse                                  # log_softmax


def fc_head(feat, w1, b1, a1, w2, b2, a2, w3, b3, ac, wc, bc, tm=128):
    N, D = feat.shape
    H1, H2, E, C = w1.shape[1], w2.shape[1], w3.shape[1], wc.shape[1]
    bm = N if N < tm else tm
    one = lambda v: jnp.asarray(v, jnp.float32).reshape(1, 1)
    row = lambda v: v.reshape(1, -1)
    full = lambda shp: pl.BlockSpec(shp, lambda i: (0, 0))
    return pl.pallas_call(
        _fc_head_kernel,
        out_shape=jax.ShapeDtypeStruct((N, C), jnp.float32),
        grid=(pl.cdiv(N, bm),),
        in_specs=[
            pl.BlockSpec((bm, D), lambda i: (i, 0)),
            full((D, H1)), full((1, H1)), full((1, 1)),
            full((H1, H2)), full((1, H2)), full((1, 1)),
            full((H2, E)), full((1, E)), full((1, 1)),
            full((E, C)), full((1, C)),
        ],
        out_specs=pl.BlockSpec((bm, C), lambda i: (i, 0)),
        compiler_params=pltpu.CompilerParams(dimension_semantics=("parallel",)),
    )(feat, w1, row(b1), one(a1), w2, row(b2), one(a2),
      w3, row(b3), one(ac), wc, row(bc))


# --------------------------------------------------------------------------
# XLA glue: im2col with rows grouped by 2x2-pool parity (feature order kh,kw,cin)
# --------------------------------------------------------------------------
def im2col_pool_grouped(x_nhwc, k):
    N, H, W, Cin = x_nhwc.shape
    Ho, Wo = H - k + 1, W - k + 1          # conv output spatial (even)
    Hp, Wp = Ho // 2, Wo // 2              # pooled spatial
    cols = [x_nhwc[:, di:di + Ho, dj:dj + Wo, :] for di in range(k) for dj in range(k)]
    pat = jnp.stack(cols, axis=3).reshape(N, Ho, Wo, k * k * Cin)
    pat = pat.reshape(N, Hp, 2, Wp, 2, k * k * Cin).transpose(0, 2, 4, 1, 3, 5)
    return pat.reshape(N, 4 * Hp * Wp, k * k * Cin)


def im2col_ref(x_nhwc, k):
    N, H, W, Cin = x_nhwc.shape
    Ho, Wo = H - k + 1, W - k + 1
    cols = [x_nhwc[:, di:di + Ho, dj:dj + Wo, :] for di in range(k) for dj in range(k)]
    return jnp.stack(cols, axis=3).reshape(N, Ho, Wo, k * k * Cin)


# --------------------------------------------------------------------------
# Parameters (conv weights as (kh*kw*cin, cout); linear weights as (in, out))
# --------------------------------------------------------------------------
def init_params(key, n_classes=10):
    ks = jax.random.split(key, 6)

    def w(k, shape, scale):
        return scale * jax.random.normal(k, shape, jnp.float32)

    p = {
        "w_conv1": w(ks[0], (5 * 5 * 1, 32), 0.10), "b_conv1": jnp.zeros((32,), jnp.float32),
        "w_conv2": w(ks[1], (5 * 5 * 32, 64), 0.05), "b_conv2": jnp.zeros((64,), jnp.float32),
        # torch flatten order (c*16 + h*4 + w) on the input side of fc1
        "w_fc1": w(ks[2], (64 * 4 * 4, 256), 0.03), "b_fc1": jnp.zeros((256,), jnp.float32),
        "w_fc2": w(ks[3], (256, 256), 0.06),        "b_fc2": jnp.zeros((256,), jnp.float32),
        "w_fc3": w(ks[4], (256, 2), 0.06),          "b_fc3": jnp.zeros((2,), jnp.float32),
        "w_cls": w(ks[5], (2, n_classes), 0.50),    "b_cls": jnp.zeros((n_classes,), jnp.float32),
    }
    for name in ("a_conv1", "a_conv2", "a_fc1", "a_fc2", "a_cls"):
        p[name] = jnp.float32(0.25)                 # nn.PReLU() default init
    return p


# --------------------------------------------------------------------------
# Forward (Pallas) and pure-JAX reference
# --------------------------------------------------------------------------
def classification_net_forward(x_nchw, p):
    x = jnp.transpose(x_nchw, (0, 2, 3, 1)).astype(jnp.float32)      # NCHW -> NHWC
    N = x.shape[0]

    # conv1 (5x5, 1->32) + PReLU + maxpool2 — one fused kernel
    p1 = im2col_pool_grouped(x, 5)                                   # (N, 576, 25)
    z1 = conv_stage(p1, p["w_conv1"], p["b_conv1"], p["a_conv1"])    # (N, 144, 32) == (N,12,12,32)

    # conv2 (5x5, 32->64) + PReLU + maxpool2 — one fused kernel
    p2 = im2col_pool_grouped(z1.reshape(N, 12, 12, 32), 5)           # (N, 64, 800)
    z2 = conv_stage(p2, p["w_conv2"], p["b_conv2"], p["a_conv2"])    # (N, 16, 64) == (N,4,4,64) NHWC

    # Features in (h*4+w, c) order; permute fc1 rows once so this matches torch's
    # channel-major .view(batch, -1).  (In deployment this is done at param-load time.)
    feat = z2.reshape(N, 16 * 64)
    w1p = p["w_fc1"].reshape(64, 4, 4, 256).transpose(1, 2, 0, 3).reshape(1024, 256)

    # Entire FC stack + PReLU + Linear(2,C) + log_softmax — one fused kernel
    return fc_head(feat, w1p, p["b_fc1"], p["a_fc1"],
                   p["w_fc2"], p["b_fc2"], p["a_fc2"],
                   p["w_fc3"], p["b_fc3"], p["a_cls"],
                   p["w_cls"], p["b_cls"])


def _prelu(x, a):
    return jnp.where(x > 0, x, a * x)


def _pool_ref(y):
    N, H, W, C = y.shape
    return jnp.max(y.reshape(N, H // 2, 2, W // 2, 2, C), axis=(2, 4))


def reference_forward(x_nchw, p):
    x = jnp.transpose(x_nchw, (0, 2, 3, 1)).astype(jnp.float32)
    y = _prelu(im2col_ref(x, 5) @ p["w_conv1"] + p["b_conv1"], p["a_conv1"])
    y = _pool_ref(y)                                                 # (N,12,12,32)
    y = _prelu(im2col_ref(y, 5) @ p["w_conv2"] + p["b_conv2"], p["a_conv2"])
    y = _pool_ref(y)                                                 # (N,4,4,64)
    feat = jnp.transpose(y, (0, 3, 1, 2)).reshape(y.shape[0], -1)    # torch .view order
    h = _prelu(feat @ p["w_fc1"] + p["b_fc1"], p["a_fc1"])
    h = _prelu(h @ p["w_fc2"] + p["b_fc2"], p["a_fc2"])
    emb = h @ p["w_fc3"] + p["b_fc3"]
    logits = _prelu(emb, p["a_cls"]) @ p["w_cls"] + p["b_cls"]
    return jax.nn.log_softmax(logits, axis=-1)


if __name__ == "__main__":
    key = jax.random.PRNGKey(0)
    kx, kp = jax.random.split(key)
    n_classes = 10
    x = jax.random.normal(kx, (2, 1, 28, 28), jnp.float32)   # NCHW, MNIST-like (geometry fixed by fc1 = 1024)
    params = init_params(kp, n_classes=n_classes)

    out = jax.jit(classification_net_forward)(x, params)
    out = jax.block_until_ready(out)

    ref = reference_forward(x, params)
    assert out.shape == (2, n_classes)
    assert jnp.allclose(out, ref, rtol=1e-4, atol=1e-4), float(jnp.max(jnp.abs(out - ref)))
    assert jnp.allclose(jnp.sum(jnp.exp(out), axis=-1), 1.0, atol=1e-4)

    print("KERNEL_OK")
</pallas_src>

<mosaic_0001>
module attributes {stable_mosaic.version = 11 : i64} {
  func.func @_conv_stage_kernel(%arg0: i32, %arg1: memref<1x576x25xf32, #tpu.memory_space<vmem>>, %arg2: memref<25x32xf32, #tpu.memory_space<vmem>>, %arg3: memref<1x32xf32, #tpu.memory_space<vmem>>, %arg4: memref<1x1xf32, #tpu.memory_space<vmem>>, %arg5: memref<1x144x32xf32, #tpu.memory_space<vmem>>) attributes {dimension_semantics = [#tpu.dimension_semantics<parallel>], iteration_bounds = array<i64: 2>, scalar_prefetch = 0 : i64, scratch_operands = 0 : i64, tpu.core_type = #tpu.core_type<tc>, window_params = [{transform_indices = @transform_0, window_bounds = array<i64: 1, 576, 25>}, {pipeline_mode = #tpu.pipeline_mode<synchronous>, transform_indices = @transform_1, window_bounds = array<i64: 25, 32>}, {pipeline_mode = #tpu.pipeline_mode<synchronous>, transform_indices = @transform_2, window_bounds = array<i64: 1, 32>}, {pipeline_mode = #tpu.pipeline_mode<synchronous>, transform_indices = @transform_3, window_bounds = array<i64: 1, 1>}, {transform_indices = @transform_4, window_bounds = array<i64: 1, 144, 32>}]} {
    %c0 = arith.constant 0 : index
    %c0_0 = arith.constant 0 : index
    %c0_1 = arith.constant 0 : index
    %0 = vector.load %arg1[%c0, %c0_0, %c0_1] : memref<1x576x25xf32, #tpu.memory_space<vmem>>, vector<1x576x25xf32>
    %1 = vector.shape_cast %0 : vector<1x576x25xf32> to vector<576x25xf32>
    %c0_2 = arith.constant 0 : index
    %c0_3 = arith.constant 0 : index
    %2 = vector.load %arg2[%c0_2, %c0_3] : memref<25x32xf32, #tpu.memory_space<vmem>>, vector<25x32xf32>
    %cst = arith.constant dense<0.000000e+00> : vector<576x32xf32>
    %3 = tpu.matmul %1, %2, %cst {dimension_numbers = #tpu.dot_dimension_numbers<[1], [0], [0], [1], [0, 0, 1, 1], [], []>} : vector<576x25xf32>, vector<25x32xf32>, vector<576x32xf32> -> vector<576x32xf32>
    %c0_4 = arith.constant 0 : index
    %c0_5 = arith.constant 0 : index
    %4 = vector.load %arg3[%c0_4, %c0_5] : memref<1x32xf32, #tpu.memory_space<vmem>>, vector<1x32xf32>
    %5 = vector.broadcast %4 : vector<1x32xf32> to vector<576x32xf32>
    %6 = arith.addf %3, %5 : vector<576x32xf32>
    %c0_6 = arith.constant 0 : index
    %c0_7 = arith.constant 0 : index
    %7 = vector.load %arg4[%c0_6, %c0_7] : memref<1x1xf32, #tpu.memory_space<vmem>>, vector<1x1xf32>
    %8 = vector.extract %7[0, 0] : f32 from vector<1x1xf32>
    %cst_8 = arith.constant 0.000000e+00 : f32
    %9 = vector.broadcast %cst_8 : f32 to vector<576x32xf32>
    %10 = arith.cmpf ogt, %6, %9 : vector<576x32xf32>
    %11 = vector.broadcast %8 : f32 to vector<576x32xf32>
    %12 = arith.mulf %11, %6 : vector<576x32xf32>
    %13 = arith.select %10, %6, %12 : vector<576x32xi1>, vector<576x32xf32>
    %14 = vector.extract_strided_slice %13 {offsets = [0, 0], sizes = [144, 32], strides = [1, 1]} : vector<576x32xf32> to vector<144x32xf32>
    %15 = vector.extract_strided_slice %13 {offsets = [144, 0], sizes = [144, 32], strides = [1, 1]} : vector<576x32xf32> to vector<144x32xf32>
    %16 = arith.maximumf %14, %15 : vector<144x32xf32>
    %17 = vector.extract_strided_slice %13 {offsets = [288, 0], sizes = [144, 32], strides = [1, 1]} : vector<576x32xf32> to vector<144x32xf32>
    %18 = vector.extract_strided_slice %13 {offsets = [432, 0], sizes = [144, 32], strides = [1, 1]} : vector<576x32xf32> to vector<144x32xf32>
    %19 = arith.maximumf %17, %18 : vector<144x32xf32>
    %20 = arith.maximumf %16, %19 : vector<144x32xf32>
    %c0_9 = arith.constant 0 : index
    %c0_10 = arith.constant 0 : index
    %c0_11 = arith.constant 0 : index
    %21 = vector.load %arg5[%c0_9, %c0_10, %c0_11] : memref<1x144x32xf32, #tpu.memory_space<vmem>>, vector<1x144x32xf32>
    %22 = vector.shape_cast %21 : vector<1x144x32xf32> to vector<144x32xf32>
    %23 = vector.shape_cast %20 : vector<144x32xf32> to vector<1x144x32xf32>
    tpu.vector_store %arg5[%c0_9, %c0_10, %c0_11], %23 {strides = array<i32>} : memref<1x144x32xf32, #tpu.memory_space<vmem>>, vector<1x144x32xf32>,
    return
  }
  func.func @transform_0(%arg0: i32) -> (i32, i32, i32) {
    %c0_i32 = arith.constant 0 : i32
    %c0_i32_0 = arith.constant 0 : i32
    %c0_i32_1 = arith.constant 0 : i32
    return %arg0, %c0_i32, %c0_i32_0 : i32, i32, i32
  }
  func.func @transform_1(%arg0: i32) -> (i32, i32) {
    %c0_i32 = arith.constant 0 : i32
    %c0_i32_0 = arith.constant 0 : i32
    %c0_i32_1 = arith.constant 0 : i32
    return %c0_i32, %c0_i32_0 : i32, i32
  }
  func.func @transform_2(%arg0: i32) -> (i32, i32) {
    %c0_i32 = arith.constant 0 : i32
    %c0_i32_0 = arith.constant 0 : i32
    %c0_i32_1 = arith.constant 0 : i32
    return %c0_i32, %c0_i32_0 : i32, i32
  }
  func.func @transform_3(%arg0: i32) -> (i32, i32) {
    %c0_i32 = arith.constant 0 : i32
    %c0_i32_0 = arith.constant 0 : i32
    %c0_i32_1 = arith.constant 0 : i32
    return %c0_i32, %c0_i32_0 : i32, i32
  }
  func.func @transform_4(%arg0: i32) -> (i32, i32, i32) {
    %c0_i32 = arith.constant 0 : i32
    %c0_i32_0 = arith.constant 0 : i32
    %c0_i32_1 = arith.constant 0 : i32
    return %arg0, %c0_i32, %c0_i32_0 : i32, i32, i32
  }
}

module attributes {stable_mosaic.version = 11 : i64} {
  func.func @_conv_stage_kernel(%arg0: i32, %arg1: memref<1x64x800xf32, #tpu.memory_space<vmem>>, %arg2: memref<800x64xf32, #tpu.memory_space<vmem>>, %arg3: memref<1x64xf32, #tpu.memory_space<vmem>>, %arg4: memref<1x1xf32, #tpu.memory_space<vmem>>, %arg5: memref<1x16x64xf32, #tpu.memory_space<vmem>>) attributes {dimension_semantics = [#tpu.dimension_semantics<parallel>], iteration_bounds = array<i64: 2>, scalar_prefetch = 0 : i64, scratch_operands = 0 : i64, tpu.core_type = #tpu.core_type<tc>, window_params = [{transform_indices = @transform_0, window_bounds = array<i64: 1, 64, 800>}, {pipeline_mode = #tpu.pipeline_mode<synchronous>, transform_indices = @transform_1, window_bounds = array<i64: 800, 64>}, {pipeline_mode = #tpu.pipeline_mode<synchronous>, transform_indices = @transform_2, window_bounds = array<i64: 1, 64>}, {pipeline_mode = #tpu.pipeline_mode<synchronous>, transform_indices = @transform_3, window_bounds = array<i64: 1, 1>}, {transform_indices = @transform_4, window_bounds = array<i64: 1, 16, 64>}]} {
    %c0 = arith.constant 0 : index
    %c0_0 = arith.constant 0 : index
    %c0_1 = arith.constant 0 : index
    %0 = vector.load %arg1[%c0, %c0_0, %c0_1] : memref<1x64x800xf32, #tpu.memory_space<vmem>>, vector<1x64x800xf32>
    %1 = vector.shape_cast %0 : vector<1x64x800xf32> to vector<64x800xf32>
    %c0_2 = arith.constant 0 : index
    %c0_3 = arith.constant 0 : index
    %2 = vector.load %arg2[%c0_2, %c0_3] : memref<800x64xf32, #tpu.memory_space<vmem>>, vector<800x64xf32>
    %cst = arith.constant dense<0.000000e+00> : vector<64x64xf32>
    %3 = tpu.matmul %1, %2, %cst {dimension_numbers = #tpu.dot_dimension_numbers<[1], [0], [0], [1], [0, 0, 1, 1], [], []>} : vector<64x800xf32>, vector<800x64xf32>, vector<64x64xf32> -> vector<64x64xf32>
    %c0_4 = arith.constant 0 : index
    %c0_5 = arith.constant 0 : index
    %4 = vector.load %arg3[%c0_4, %c0_5] : memref<1x64xf32, #tpu.memory_space<vmem>>, vector<1x64xf32>
    %5 = vector.broadcast %4 : vector<1x64xf32> to vector<64x64xf32>
    %6 = arith.addf %3, %5 : vector<64x64xf32>
    %c0_6 = arith.constant 0 : index
    %c0_7 = arith.constant 0 : index
    %7 = vector.load %arg4[%c0_6, %c0_7] : memref<1x1xf32, #tpu.memory_space<vmem>>, vector<1x1xf32>
    %8 = vector.extract %7[0, 0] : f32 from vector<1x1xf32>
    %cst_8 = arith.constant 0.000000e+00 : f32
    %9 = vector.broadcast %cst_8 : f32 to vector<64x64xf32>
    %10 = arith.cmpf ogt, %6, %9 : vector<64x64xf32>
    %11 = vector.broadcast %8 : f32 to vector<64x64xf32>
    %12 = arith.mulf %11, %6 : vector<64x64xf32>
    %13 = arith.select %10, %6, %12 : vector<64x64xi1>, vector<64x64xf32>
    %14 = vector.extract_strided_slice %13 {offsets = [0, 0], sizes = [16, 64], strides = [1, 1]} : vector<64x64xf32> to vector<16x64xf32>
    %15 = vector.extract_strided_slice %13 {offsets = [16, 0], sizes = [16, 64], strides = [1, 1]} : vector<64x64xf32> to vector<16x64xf32>
    %16 = arith.maximumf %14, %15 : vector<16x64xf32>
    %17 = vector.extract_strided_slice %13 {offsets = [32, 0], sizes = [16, 64], strides = [1, 1]} : vector<64x64xf32> to vector<16x64xf32>
    %18 = vector.extract_strided_slice %13 {offsets = [48, 0], sizes = [16, 64], strides = [1, 1]} : vector<64x64xf32> to vector<16x64xf32>
    %19 = arith.maximumf %17, %18 : vector<16x64xf32>
    %20 = arith.maximumf %16, %19 : vector<16x64xf32>
    %c0_9 = arith.constant 0 : index
    %c0_10 = arith.constant 0 : index
    %c0_11 = arith.constant 0 : index
    %21 = vector.load %arg5[%c0_9, %c0_10, %c0_11] : memref<1x16x64xf32, #tpu.memory_space<vmem>>, vector<1x16x64xf32>
    %22 = vector.shape_cast %21 : vector<1x16x64xf32> to vector<16x64xf32>
    %23 = vector.shape_cast %20 : vector<16x64xf32> to vector<1x16x64xf32>
    tpu.vector_store %arg5[%c0_9, %c0_10, %c0_11], %23 {strides = array<i32>} : memref<1x16x64xf32, #tpu.memory_space<vmem>>, vector<1x16x64xf32>,
    return
  }
  func.func @transform_0(%arg0: i32) -> (i32, i32, i32) {
    %c0_i32 = arith.constant 0 : i32
    %c0_i32_0 = arith.constant 0 : i32
    %c0_i32_1 = arith.constant 0 : i32
    return %arg0, %c0_i32, %c0_i32_0 : i32, i32, i32
  }
  func.func @transform_1(%arg0: i32) -> (i32, i32) {
    %c0_i32 = arith.constant 0 : i32
    %c0_i32_0 = arith.constant 0 : i32
    %c0_i32_1 = arith.constant 0 : i32
    return %c0_i32, %c0_i32_0 : i32, i32
  }
  func.func @transform_2(%arg0: i32) -> (i32, i32) {
    %c0_i32 = arith.constant 0 : i32
    %c0_i32_0 = arith.constant 0 : i32
    %c0_i32_1 = arith.constant 0 : i32
    return %c0_i32, %c0_i32_0 : i32, i32
  }
  func.func @transform_3(%arg0: i32) -> (i32, i32) {
    %c0_i32 = arith.constant 0 : i32
    %c0_i32_0 = arith.constant 0 : i32
    %c0_i32_1 = arith.constant 0 : i32
    return %c0_i32, %c0_i32_0 : i32, i32
  }
  func.func @transform_4(%arg0: i32) -> (i32, i32, i32) {
    %c0_i32 = arith.constant 0 : i32
    %c0_i32_0 = arith.constant 0 : i32
    %c0_i32_1 = arith.constant 0 : i32
    return %arg0, %c0_i32, %c0_i32_0 : i32, i32, i32
  }
}

module attributes {stable_mosaic.version = 11 : i64} {
  func.func @_fc_head_kernel(%arg0: i32, %arg1: memref<2x1024xf32, #tpu.memory_space<vmem>>, %arg2: memref<1024x256xf32, #tpu.memory_space<vmem>>, %arg3: memref<1x256xf32, #tpu.memory_space<vmem>>, %arg4: memref<1x1xf32, #tpu.memory_space<vmem>>, %arg5: memref<256x256xf32, #tpu.memory_space<vmem>>, %arg6: memref<1x256xf32, #tpu.memory_space<vmem>>, %arg7: memref<1x1xf32, #tpu.memory_space<vmem>>, %arg8: memref<256x2xf32, #tpu.memory_space<vmem>>, %arg9: memref<1x2xf32, #tpu.memory_space<vmem>>, %arg10: memref<1x1xf32, #tpu.memory_space<vmem>>, %arg11: memref<2x10xf32, #tpu.memory_space<vmem>>, %arg12: memref<1x10xf32, #tpu.memory_space<vmem>>, %arg13: memref<2x10xf32, #tpu.memory_space<vmem>>) attributes {dimension_semantics = [#tpu.dimension_semantics<parallel>], iteration_bounds = array<i64: 1>, scalar_prefetch = 0 : i64, scratch_operands = 0 : i64, tpu.core_type = #tpu.core_type<tc>, window_params = [{transform_indices = @transform_0, window_bounds = array<i64: 2, 1024>}, {pipeline_mode = #tpu.pipeline_mode<synchronous>, transform_indices = @transform_1, window_bounds = array<i64: 1024, 256>}, {pipeline_mode = #tpu.pipeline_mode<synchronous>, transform_indices = @transform_2, window_bounds = array<i64: 1, 256>}, {pipeline_mode = #tpu.pipeline_mode<synchronous>, transform_indices = @transform_3, window_bounds = array<i64: 1, 1>}, {pipeline_mode = #tpu.pipeline_mode<synchronous>, transform_indices = @transform_4, window_bounds = array<i64: 256, 256>}, {pipeline_mode = #tpu.pipeline_mode<synchronous>, transform_indices = @transform_5, window_bounds = array<i64: 1, 256>}, {pipeline_mode = #tpu.pipeline_mode<synchronous>, transform_indices = @transform_6, window_bounds = array<i64: 1, 1>}, {pipeline_mode = #tpu.pipeline_mode<synchronous>, transform_indices = @transform_7, window_bounds = array<i64: 256, 2>}, {pipeline_mode = #tpu.pipeline_mode<synchronous>, transform_indices = @transform_8, window_bounds = array<i64: 1, 2>}, {pipeline_mode = #tpu.pipeline_mode<synchronous>, transform_indices = @transform_9, window_bounds = array<i64: 1, 1>}, {pipeline_mode = #tpu.pipeline_mode<synchronous>, transform_indices = @transform_10, window_bounds = array<i64: 2, 10>}, {pipeline_mode = #tpu.pipeline_mode<synchronous>, transform_indices = @transform_11, window_bounds = array<i64: 1, 10>}, {transform_indices = @transform_12, window_bounds = array<i64: 2, 10>}]} {
    %c0 = arith.constant 0 : index
    %c0_0 = arith.constant 0 : index
    %0 = vector.load %arg1[%c0, %c0_0] : memref<2x1024xf32, #tpu.memory_space<vmem>>, vector<2x1024xf32>
    %c0_1 = arith.constant 0 : index
    %c0_2 = arith.constant 0 : index
    %1 = vector.load %arg2[%c0_1, %c0_2] : memref<1024x256xf32, #tpu.memory_space<vmem>>, vector<1024x256xf32>
    %cst = arith.constant dense<0.000000e+00> : vector<2x256xf32>
    %2 = tpu.matmul %0, %1, %cst {dimension_numbers = #tpu.dot_dimension_numbers<[1], [0], [0], [1], [0, 0, 1, 1], [], []>} : vector<2x1024xf32>, vector<1024x256xf32>, vector<2x256xf32> -> vector<2x256xf32>
    %c0_3 = arith.constant 0 : index
    %c0_4 = arith.constant 0 : index
    %3 = vector.load %arg3[%c0_3, %c0_4] : memref<1x256xf32, #tpu.memory_space<vmem>>, vector<1x256xf32>
    %4 = vector.broadcast %3 : vector<1x256xf32> to vector<2x256xf32>
    %5 = arith.addf %2, %4 : vector<2x256xf32>
    %cst_5 = arith.constant 0.000000e+00 : f32
    %6 = vector.broadcast %cst_5 : f32 to vector<2x256xf32>
    %7 = arith.cmpf ogt, %5, %6 : vector<2x256xf32>
    %c0_6 = arith.constant 0 : index
    %c0_7 = arith.constant 0 : index
    %8 = vector.load %arg4[%c0_6, %c0_7] : memref<1x1xf32, #tpu.memory_space<vmem>>, vector<1x1xf32>
    %9 = vector.extract %8[0, 0] : f32 from vector<1x1xf32>
    %10 = vector.broadcast %9 : f32 to vector<2x256xf32>
    %11 = arith.mulf %10, %5 : vector<2x256xf32>
    %12 = arith.select %7, %5, %11 : vector<2x256xi1>, vector<2x256xf32>
    %c0_8 = arith.constant 0 : index
    %c0_9 = arith.constant 0 : index
    %13 = vector.load %arg5[%c0_8, %c0_9] : memref<256x256xf32, #tpu.memory_space<vmem>>, vector<256x256xf32>
    %cst_10 = arith.constant dense<0.000000e+00> : vector<2x256xf32>
    %14 = tpu.matmul %12, %13, %cst_10 {dimension_numbers = #tpu.dot_dimension_numbers<[1], [0], [0], [1], [0, 0, 1, 1], [], []>} : vector<2x256xf32>, vector<256x256xf32>, vector<2x256xf32> -> vector<2x256xf32>
    %c0_11 = arith.constant 0 : index
    %c0_12 = arith.constant 0 : index
    %15 = vector.load %arg6[%c0_11, %c0_12] : memref<1x256xf32, #tpu.memory_space<vmem>>, vector<1x256xf32>
    %16 = vector.broadcast %15 : vector<1x256xf32> to vector<2x256xf32>
    %17 = arith.addf %14, %16 : vector<2x256xf32>
    %cst_13 = arith.constant 0.000000e+00 : f32
    %18 = vector.broadcast %cst_13 : f32 to vector<2x256xf32>
    %19 = arith.cmpf ogt, %17, %18 : vector<2x256xf32>
    %c0_14 = arith.constant 0 : index
    %c0_15 = arith.constant 0 : index
    %20 = vector.load %arg7[%c0_14, %c0_15] : memref<1x1xf32, #tpu.memory_space<vmem>>, vector<1x1xf32>
    %21 = vector.extract %20[0, 0] : f32 from vector<1x1xf32>
    %22 = vector.broadcast %21 : f32 to vector<2x256xf32>
    %23 = arith.mulf %22, %17 : vector<2x256xf32>
    %24 = arith.select %19, %17, %23 : vector<2x256xi1>, vector<2x256xf32>
    %c0_16 = arith.constant 0 : index
    %c0_17 = arith.constant 0 : index
    %25 = vector.load %arg8[%c0_16, %c0_17] : memref<256x2xf32, #tpu.memory_space<vmem>>, vector<256x2xf32>
    %cst_18 = arith.constant dense<0.000000e+00> : vector<2x2xf32>
    %26 = tpu.matmul %24, %25, %cst_18 {dimension_numbers = #tpu.dot_dimension_numbers<[1], [0], [0], [1], [0, 0, 1, 1], [], []>} : vector<2x256xf32>, vector<256x2xf32>, vector<2x2xf32> -> vector<2x2xf32>
    %c0_19 = arith.constant 0 : index
    %c0_20 = arith.constant 0 : index
    %27 = vector.load %arg9[%c0_19, %c0_20] : memref<1x2xf32, #tpu.memory_space<vmem>>, vector<1x2xf32>
    %28 = vector.broadcast %27 : vector<1x2xf32> to vector<2x2xf32>
    %29 = arith.addf %26, %28 : vector<2x2xf32>
    %cst_21 = arith.constant 0.000000e+00 : f32
    %30 = vector.broadcast %cst_21 : f32 to vector<2x2xf32>
    %31 = arith.cmpf ogt, %29, %30 : vector<2x2xf32>
    %c0_22 = arith.constant 0 : index
    %c0_23 = arith.constant 0 : index
    %32 = vector.load %arg10[%c0_22, %c0_23] : memref<1x1xf32, #tpu.memory_space<vmem>>, vector<1x1xf32>
    %33 = vector.extract %32[0, 0] : f32 from vector<1x1xf32>
    %34 = vector.broadcast %33 : f32 to vector<2x2xf32>
    %35 = arith.mulf %34, %29 : vector<2x2xf32>
    %36 = arith.select %31, %29, %35 : vector<2x2xi1>, vector<2x2xf32>
    %c0_24 = arith.constant 0 : index
    %c0_25 = arith.constant 0 : index
    %37 = vector.load %arg11[%c0_24, %c0_25] : memref<2x10xf32, #tpu.memory_space<vmem>>, vector<2x10xf32>
    %cst_26 = arith.constant dense<0.000000e+00> : vector<2x10xf32>
    %38 = tpu.matmul %36, %37, %cst_26 {dimension_numbers = #tpu.dot_dimension_numbers<[1], [0], [0], [1], [0, 0, 1, 1], [], []>} : vector<2x2xf32>, vector<2x10xf32>, vector<2x10xf32> -> vector<2x10xf32>
    %c0_27 = arith.constant 0 : index
    %c0_28 = arith.constant 0 : index
    %39 = vector.load %arg12[%c0_27, %c0_28] : memref<1x10xf32, #tpu.memory_space<vmem>>, vector<1x10xf32>
    %40 = vector.broadcast %39 : vector<1x10xf32> to vector<2x10xf32>
    %41 = arith.addf %38, %40 : vector<2x10xf32>
    %cst_29 = arith.constant dense<0xFF800000> : vector<2xf32>
    %42 = vector.multi_reduction <maximumf>, %41, %cst_29 [1] : vector<2x10xf32> to vector<2xf32>
    %43 = vector.shape_cast %42 : vector<2xf32> to vector<2x1xf32>
    %44 = vector.broadcast %43 : vector<2x1xf32> to vector<2x10xf32>
    %45 = arith.subf %41, %44 : vector<2x10xf32>
    %46 = math.exp %45 : vector<2x10xf32>
    %cst_30 = arith.constant dense<0.000000e+00> : vector<2xf32>
    %47 = vector.multi_reduction <add>, %46, %cst_30 [1] : vector<2x10xf32> to vector<2xf32>
    %48 = vector.shape_cast %47 : vector<2xf32> to vector<2x1xf32>
    %49 = math.log %48 : vector<2x1xf32>
    %50 = vector.broadcast %49 : vector<2x1xf32> to vector<2x10xf32>
    %51 = arith.subf %45, %50 : vector<2x10xf32>
    %c0_31 = arith.constant 0 : index
    %c0_32 = arith.constant 0 : index
    %52 = vector.load %arg13[%c0_31, %c0_32] : memref<2x10xf32, #tpu.memory_space<vmem>>, vector<2x10xf32>
    tpu.vector_store %arg13[%c0_31, %c0_32], %51 {strides = array<i32>} : memref<2x10xf32, #tpu.memory_space<vmem>>, vector<2x10xf32>,
    return
  }
  func.func @transform_0(%arg0: i32) -> (i32, i32) {
    %c0_i32 = arith.constant 0 : i32
    %c0_i32_0 = arith.constant 0 : i32
    return %arg0, %c0_i32 : i32, i32
  }
  func.func @transform_1(%arg0: i32) -> (i32, i32) {
    %c0_i32 = arith.constant 0 : i32
    %c0_i32_0 = arith.constant 0 : i32
    %c0_i32_1 = arith.constant 0 : i32
    return %c0_i32, %c0_i32_0 : i32, i32
  }
  func.func @transform_2(%arg0: i32) -> (i32, i32) {
    %c0_i32 = arith.constant 0 : i32
    %c0_i32_0 = arith.constant 0 : i32
    %c0_i32_1 = arith.constant 0 : i32
    return %c0_i32, %c0_i32_0 : i32, i32
  }
  func.func @transform_3(%arg0: i32) -> (i32, i32) {
    %c0_i32 = arith.constant 0 : i32
    %c0_i32_0 = arith.constant 0 : i32
    %c0_i32_1 = arith.constant 0 : i32
    return %c0_i32, %c0_i32_0 : i32, i32
  }
  func.func @transform_4(%arg0: i32) -> (i32, i32) {
    %c0_i32 = arith.constant 0 : i32
    %c0_i32_0 = arith.constant 0 : i32
    %c0_i32_1 = arith.constant 0 : i32
    return %c0_i32, %c0_i32_0 : i32, i32
  }
  func.func @transform_5(%arg0: i32) -> (i32, i32) {
    %c0_i32 = arith.constant 0 : i32
    %c0_i32_0 = arith.constant 0 : i32
    %c0_i32_1 = arith.constant 0 : i32
    return %c0_i32, %c0_i32_0 : i32, i32
  }
  func.func @transform_6(%arg0: i32) -> (i32, i32) {
    %c0_i32 = arith.constant 0 : i32
    %c0_i32_0 = arith.constant 0 : i32
    %c0_i32_1 = arith.constant 0 : i32
    return %c0_i32, %c0_i32_0 : i32, i32
  }
  func.func @transform_7(%arg0: i32) -> (i32, i32) {
    %c0_i32 = arith.constant 0 : i32
    %c0_i32_0 = arith.constant 0 : i32
    %c0_i32_1 = arith.constant 0 : i32
    return %c0_i32, %c0_i32_0 : i32, i32
  }
  func.func @transform_8(%arg0: i32) -> (i32, i32) {
    %c0_i32 = arith.constant 0 : i32
    %c0_i32_0 = arith.constant 0 : i32
    %c0_i32_1 = arith.constant 0 : i32
    return %c0_i32, %c0_i32_0 : i32, i32
  }
  func.func @transform_9(%arg0: i32) -> (i32, i32) {
    %c0_i32 = arith.constant 0 : i32
    %c0_i32_0 = arith.constant 0 : i32
    %c0_i32_1 = arith.constant 0 : i32
    return %c0_i32, %c0_i32_0 : i32, i32
  }
  func.func @transform_10(%arg0: i32) -> (i32, i32) {
    %c0_i32 = arith.constant 0 : i32
    %c0_i32_0 = arith.constant 0 : i32
    %c0_i32_1 = arith.constant 0 : i32
    return %c0_i32, %c0_i32_0 : i32, i32
  }
  func.func @transform_11(%arg0: i32) -> (i32, i32) {
    %c0_i32 = arith.constant 0 : i32
    %c0_i32_0 = arith.constant 0 : i32
    %c0_i32_1 = arith.constant 0 : i32
    return %c0_i32, %c0_i32_0 : i32, i32
  }
  func.func @transform_12(%arg0: i32) -> (i32, i32) {
    %c0_i32 = arith.constant 0 : i32
    %c0_i32_0 = arith.constant 0 : i32
    return %arg0, %c0_i32 : i32, i32
  }
}

</mosaic_0001>

<bundles_post_ra>
// kernel: classification_net_forward.3
= control target key start
LH: loop header
LB: loop body
LE: loop exit
PB: predicated region body
PF: predicated region fallthrough
CT: control target
= control target key end

     0   :  { %s1615_s17 = smov 0   ;;  %s2141_s0 = inlined_call_operand.vmem [shape: f32[2,576,25], index: 0, kind: input, shape index: {}]   ;;  %s2142_s1 = inlined_call_operand.vmem [shape: f32[25,32], index: 1, kind: input, shape index: {}]   ;;  %s2143_s2 = inlined_call_operand.vmem [shape: f32[1,32], index: 2, kind: input, shape index: {}]   ;;  %s2144_s3 = inlined_call_operand.<no memory space> [shape: f32[1,1], index: 3, kind: input, shape index: {}]   ;;  %s2145_s4 = inlined_call_operand.vmem [shape: f32[2,144,32], index: 4, kind: output, shape index: {}]  }
   0x1   :  { %v9_v0 = vstv %s2144_s3 }
   0x2   :  { %10 = vst [vmem:[#allocation2] sm:$0x1] %v9_v0 }
   0x3 LB: > { %s1276_s18 = sadd.s32 4294967295, %s1584_s17   ;;  %p1280_p0 = scmp.ge.s32.totalorder %s1584_s17, 1  ;;  %s1584_s17 = sphi %s1615_s17, %s16_s17  }
   0x4   : > { %p164_p1 = scmp.lt.s32.totalorder %s1584_s17, 3 }
   0x6   : > { %p165_p2 = pnand %p1280_p0, %p164_p1 }
   0x7   : > { %v272_v1 = vld [vmem:[%s2142_s1] sm:$0xff] (!%p165_p2)  ;;  %v273_v2 = vld [vmem:[%s2142_s1 + $0x8] sm:$0xff] (!%p165_p2)  ;;  %v274_v3 = vld [vmem:[%s2142_s1 + $0x10] sm:$0xff] (!%p165_p2)  ;;  %vm500_vm0 = vcmask (!%p165_p2), 1040384   ;;  %p190_p3 = scmp.lt.s32.totalorder (!%p165_p2), %s1276_s18, 1  ;;  %vm1586_vm1 = vmmov (!%p165_p2), 1  }
   0x8   : > { %168 = sbr.rel (%p165_p2) target bundleno = 326 (0x146), region = 36  ;;  %v1551_v4 = vpack.c.bf16 (!%p165_p2), %v273_v2, %v272_v1  ;;  %v275_v5 = vld [vmem:[%s2142_s1 + $0x18] sm:$0x1] (!%p165_p2)  ;;  %vm1556_vm2 = vmpackc.low (!%p165_p2), %vm500_vm0, %vm1586_vm1  ;;  %vm283_vm3 = vcmask (!%p165_p2), 203776  }
   0x9   : > { %v929_v6 = vld [vmem:[#allocation2] sm:$0x1] (!%p165_p2)  ;;  %v1555_v7 = vpack.c.bf16 (!%p165_p2), %v275_v5, %v274_v3 }
   0xa   : > { %1567 = vpush (!%p165_p2), %v929_v6  ;;  %1552 = vmatprep.subr.bf16.mxu0 (!%p165_p2), %v1551_v4  ;;  %1561 = vmatprep.subr.bf16.mxu1 (!%p165_p2), %v1551_v4 }
   0xb   : > { %1554 = vmatpush3.bf16.msra.mxu0 (!%p165_p2), %v1551_v4  ;;  %1563 = vmatpush3.bf16.msra.mxu1 (!%p165_p2), %v1551_v4 }
   0xc   : > { %1557 = vmatprep.subr.msk.bf16.mxu0 (!%p165_p2), %vm1556_vm2, %v1555_v7  ;;  %1562 = vmatprep.subr.msk.bf16.mxu1 (!%p165_p2), %vm1556_vm2, %v1555_v7 }
   0xf   : > { %s2147_s18 = smov (!%p190_p3, %s1276_s18), 1  ;;  %1560 = vmatpush3.bf16.msk.msra.mxu0 %vm1556_vm2, %v1555_v7  ;;  %1564 = vmatpush3.bf16.msk.msra.mxu1 %vm1556_vm2, %v1555_v7 }
  0x10   : > { %s1565_s26 = smul.u32 576, %s2147_s18 }
  0x11   : > { %s1566_s7 = smul.u32 144, %s2147_s18 }
  0x12   : > { %s1641_s29 = scalar_lea.vmem %s2141_s0, %s1565_s26 }
  0x13   : > { %v200_v8 = vld [vmem:[%s1641_s29] sm:$0xff]  ;;  %v201_v10 = vld [vmem:[%s1641_s29 + $0x8] sm:$0xff]  ;;  %v202_v12 = vld [vmem:[%s1641_s29 + $0x10] sm:$0xff]  ;;  %s1989_s10 = scalar_lea.vmem %s2145_s4, %s1566_s7 }
  0x14   : > { %v236_v9 = vld [vmem:[%s1641_s29 + $0x120] sm:$0xff]  ;;  %v237_v11 = vld [vmem:[%s1641_s29 + $0x128] sm:$0xff]  ;;  %1443 = vmatprep.mubr.msk.f32.mxu0 %vm283_vm3, %v200_v8  ;;  %v238_v13 = vld [vmem:[%s1641_s29 + $0x130] sm:$0xff] }
  0x15   : > { %1497 = vmatprep.mubr.msk.f32.mxu1 %vm283_vm3, %v236_v9  ;;  %1444 = vmatmul.mubr.msk.f32.vlgmr.msra.gmra.mrb[0].mxu0 %vm283_vm3, %v201_v10  ;;  %v203_v14 = vld [vmem:[%s1641_s29 + $0x18] sm:$0xff]  ;;  %v204_v16 = vld [vmem:[%s1641_s29 + $0x20] sm:$0xff]  ;;  %v205_v18 = vld [vmem:[%s1641_s29 + $0x28] sm:$0xff] }
  0x16   : > { %1498 = vmatmul.mubr.msk.f32.vlgmr.msra.gmra.mrb[0].mxu1 %vm283_vm3, %v237_v11  ;;  %1446 = vmatprep.mubr.msk.f32.mxu0 %vm283_vm3, %v202_v12  ;;  %v239_v15 = vld [vmem:[%s1641_s29 + $0x138] sm:$0xff]  ;;  %v240_v17 = vld [vmem:[%s1641_s29 + $0x140] sm:$0xff]  ;;  %v241_v19 = vld [vmem:[%s1641_s29 + $0x148] sm:$0xff] }
  0x17   : > { %1500 = vmatprep.mubr.msk.f32.mxu1 %vm283_vm3, %v238_v13  ;;  %v206_v20 = vld [vmem:[%s1641_s29 + $0x30] sm:$0xff]  ;;  %v207_v22 = vld [vmem:[%s1641_s29 + $0x38] sm:$0xff]  ;;  %v208_v24 = vld [vmem:[%s1641_s29 + $0x40] sm:$0xff] }
  0x18   : > { %v242_v21 = vld [vmem:[%s1641_s29 + $0x150] sm:$0xff]  ;;  %v243_v23 = vld [vmem:[%s1641_s29 + $0x158] sm:$0xff]  ;;  %v244_v25 = vld [vmem:[%s1641_s29 + $0x160] sm:$0xff] }
  0x19   : > { %1447 = vmatmul.mubr.msk.f32.gmra.mrb[2].mxu0 %vm283_vm3, %v203_v14  ;;  %v209_v26 = vld [vmem:[%s1641_s29 + $0x48] sm:$0xff]  ;;  %v210_v28 = vld [vmem:[%s1641_s29 + $0x50] sm:$0xff]  ;;  %v211_v30 = vld [vmem:[%s1641_s29 + $0x58] sm:$0xff] }
  0x1a   : > { %1501 = vmatmul.mubr.msk.f32.gmra.mrb[2].mxu1 %vm283_vm3, %v239_v15  ;;  %1449 = vmatprep.mubr.msk.f32.mxu0 %vm283_vm3, %v204_v16  ;;  %v245_v27 = vld [vmem:[%s1641_s29 + $0x168] sm:$0xff]  ;;  %v246_v29 = vld [vmem:[%s1641_s29 + $0x170] sm:$0xff]  ;;  %v247_v31 = vld [vmem:[%s1641_s29 + $0x178] sm:$0xff] }
  0x1b   : > { %1503 = vmatprep.mubr.msk.f32.mxu1 %vm283_vm3, %v240_v17  ;;  %v212_v32 = vld [vmem:[%s1641_s29 + $0x60] sm:$0xff]  ;;  %v213_v34 = vld [vmem:[%s1641_s29 + $0x68] sm:$0xff]  ;;  %v214_v36 = vld [vmem:[%s1641_s29 + $0x70] sm:$0xff] }
  0x1c   : > { %v248_v33 = vld [vmem:[%s1641_s29 + $0x180] sm:$0xff]  ;;  %v249_v35 = vld [vmem:[%s1641_s29 + $0x188] sm:$0xff]  ;;  %v250_v37 = vld [vmem:[%s1641_s29 + $0x190] sm:$0xff] }
  0x1d   : > { %1450 = vmatmul.mubr.msk.f32.gmra.mrb[4].mxu0 %vm283_vm3, %v205_v18  ;;  %v215_v38 = vld [vmem:[%s1641_s29 + $0x78] sm:$0xff]  ;;  %v216_v40 = vld [vmem:[%s1641_s29 + $0x80] sm:$0xff]  ;;  %v217_v42 = vld [vmem:[%s1641_s29 + $0x88] sm:$0xff] }
  0x1e   : > { %1504 = vmatmul.mubr.msk.f32.gmra.mrb[4].mxu1 %vm283_vm3, %v241_v19  ;;  %1452 = vmatprep.mubr.msk.f32.mxu0 %vm283_vm3, %v206_v20  ;;  %v251_v39 = vld [vmem:[%s1641_s29 + $0x198] sm:$0xff]  ;;  %v252_v41 = vld [vmem:[%s1641_s29 + $0x1a0] sm:$0xff]  ;;  %v253_v43 = vld [vmem:[%s1641_s29 + $0x1a8] sm:$0xff] }
  0x1f   : > { %1506 = vmatprep.mubr.msk.f32.mxu1 %vm283_vm3, %v242_v21  ;;  %v218_v44 = vld [vmem:[%s1641_s29 + $0x90] sm:$0xff]  ;;  %v219_v46 = vld [vmem:[%s1641_s29 + $0x98] sm:$0xff]  ;;  %v220_v48 = vld [vmem:[%s1641_s29 + $0xa0] sm:$0xff] }
  0x20   : > { %v254_v45 = vld [vmem:[%s1641_s29 + $0x1b0] sm:$0xff]  ;;  %v255_v47 = vld [vmem:[%s1641_s29 + $0x1b8] sm:$0xff]  ;;  %v256_v49 = vld [vmem:[%s1641_s29 + $0x1c0] sm:$0xff] }
  0x21   : > { %1453 = vmatmul.mubr.msk.f32.gmra.mrb[6].mxu0 %vm283_vm3, %v207_v22  ;;  %v221_v50 = vld [vmem:[%s1641_s29 + $0xa8] sm:$0xff]  ;;  %v222_v52 = vld [vmem:[%s1641_s29 + $0xb0] sm:$0xff]  ;;  %v223_v54 = vld [vmem:[%s1641_s29 + $0xb8] sm:$0xff] }
  0x22   : > { %1507 = vmatmul.mubr.msk.f32.gmra.mrb[6].mxu1 %vm283_vm3, %v243_v23  ;;  %1455 = vmatprep.mubr.msk.f32.mxu0 %vm283_vm3, %v208_v24  ;;  %v257_v51 = vld [vmem:[%s1641_s29 + $0x1c8] sm:$0xff]  ;;  %v258_v53 = vld [vmem:[%s1641_s29 + $0x1d0] sm:$0xff]  ;;  %v259_v55 = vld [vmem:[%s1641_s29 + $0x1d8] sm:$0xff] }
  0x23   : > { %1509 = vmatprep.mubr.msk.f32.mxu1 %vm283_vm3, %v244_v25  ;;  %v224_v56 = vld [vmem:[%s1641_s29 + $0xc0] sm:$0xff]  ;;  %v225_v58 = vld [vmem:[%s1641_s29 + $0xc8] sm:$0xff]  ;;  %v226_v60 = vld [vmem:[%s1641_s29 + $0xd0] sm:$0xff] }
  0x24   : > { %v260_v57 = vld [vmem:[%s1641_s29 + $0x1e0] sm:$0xff]  ;;  %v261_v59 = vld [vmem:[%s1641_s29 + $0x1e8] sm:$0xff]  ;;  %v262_v61 = vld [vmem:[%s1641_s29 + $0x1f0] sm:$0xff] }
  0x25   : > { %1456 = vmatmul.mubr.msk.f32.gmra.mrb[8].mxu0 %vm283_vm3, %v209_v26  ;;  %v227_v62 = vld [vmem:[%s1641_s29 + $0xd8] sm:$0xff]  ;;  %v228_v0 = vld [vmem:[%s1641_s29 + $0xe0] sm:$0xff]  ;;  %v229_v2 = vld [vmem:[%s1641_s29 + $0xe8] sm:$0xff] }
  0x26   : > { %1510 = vmatmul.mubr.msk.f32.gmra.mrb[8].mxu1 %vm283_vm3, %v245_v27  ;;  %1458 = vmatprep.mubr.msk.f32.mxu0 %vm283_vm3, %v210_v28  ;;  %v263_v63 = vld [vmem:[%s1641_s29 + $0x1f8] sm:$0xff]  ;;  %v264_v1 = vld [vmem:[%s1641_s29 + $0x200] sm:$0xff]  ;;  %v265_v3 = vld [vmem:[%s1641_s29 + $0x208] sm:$0xff] }
  0x27   : > { %1512 = vmatprep.mubr.msk.f32.mxu1 %vm283_vm3, %v246_v29  ;;  %v230_v4 = vld [vmem:[%s1641_s29 + $0xf0] sm:$0xff]  ;;  %v231_v6 = vld [vmem:[%s1641_s29 + $0xf8] sm:$0xff]  ;;  %v232_v8 = vld [vmem:[%s1641_s29 + $0x100] sm:$0xff] }
  0x28   : > { %v266_v5 = vld [vmem:[%s1641_s29 + $0x210] sm:$0xff]  ;;  %v267_v7 = vld [vmem:[%s1641_s29 + $0x218] sm:$0xff]  ;;  %v268_v9 = vld [vmem:[%s1641_s29 + $0x220] sm:$0xff] }
  0x29   : > { %1459 = vmatmul.mubr.msk.f32.gmra.mrb[10].mxu0 %vm283_vm3, %v211_v30  ;;  %v233_v10 = vld [vmem:[%s1641_s29 + $0x108] sm:$0xff]  ;;  %v234_v12 = vld [vmem:[%s1641_s29 + $0x110] sm:$0xff]  ;;  %v235_v14 = vld [vmem:[%s1641_s29 + $0x118] sm:$0xff] }
  0x2a   : > { %1513 = vmatmul.mubr.msk.f32.gmra.mrb[10].mxu1 %vm283_vm3, %v247_v31  ;;  %1461 = vmatprep.mubr.msk.f32.mxu0 %vm283_vm3, %v212_v32  ;;  %v269_v11 = vld [vmem:[%s1641_s29 + $0x228] sm:$0xff]  ;;  %v270_v13 = vld [vmem:[%s1641_s29 + $0x230] sm:$0xff]  ;;  %v271_v15 = vld [vmem:[%s1641_s29 + $0x238] sm:$0xff] }
  0x2b   : > { %1515 = vmatprep.mubr.msk.f32.mxu1 %vm283_vm3, %v248_v33  ;;  %v1790_v16 = vld [vmem:[%s2143_s2] ss:$0 sm:$0xff] }
  0x2d   : > { %1462 = vmatmul.mubr.msk.f32.gmra.mrb[12].mxu0 %vm283_vm3, %v213_v34 }
  0x2e   : > { %1516 = vmatmul.mubr.msk.f32.gmra.mrb[12].mxu1 %vm283_vm3, %v249_v35  ;;  %1464 = vmatprep.mubr.msk.f32.mxu0 %vm283_vm3, %v214_v36 }
  0x2f   : > { %1518 = vmatprep.mubr.msk.f32.mxu1 %vm283_vm3, %v250_v37 }
  0x31   : > { %1465 = vmatmul.mubr.msk.f32.gmra.mrb[14].mxu0 %vm283_vm3, %v215_v38 }
  0x32   : > { %1519 = vmatmul.mubr.msk.f32.gmra.mrb[14].mxu1 %vm283_vm3, %v251_v39  ;;  %1467 = vmatprep.mubr.msk.f32.mxu0 %vm283_vm3, %v216_v40 }
  0x33   : > { %1521 = vmatprep.mubr.msk.f32.mxu1 %vm283_vm3, %v252_v41 }
  0x35   : > { %1468 = vmatmul.mubr.msk.f32.gmra.mrb[16].mxu0 %vm283_vm3, %v217_v42 }
  0x36   : > { %1522 = vmatmul.mubr.msk.f32.gmra.mrb[16].mxu1 %vm283_vm3, %v253_v43  ;;  %1470 = vmatprep.mubr.msk.f32.mxu0 %vm283_vm3, %v218_v44 }
  0x37   : > { %1524 = vmatprep.mubr.msk.f32.mxu1 %vm283_vm3, %v254_v45 }
  0x39   : > { %1471 = vmatmul.mubr.msk.f32.gmra.mrb[18].mxu0 %vm283_vm3, %v219_v46 }
  0x3a   : > { %1525 = vmatmul.mubr.msk.f32.gmra.mrb[18].mxu1 %vm283_vm3, %v255_v47  ;;  %1473 = vmatprep.mubr.msk.f32.mxu0 %vm283_vm3, %v220_v48 }
  0x3b   : > { %1527 = vmatprep.mubr.msk.f32.mxu1 %vm283_vm3, %v256_v49  ;;  %s1568_s6 = spop %1567 }
  0x3c   : > { %v1795_v24 = vstv %s1568_s6 }
  0x3d   : > { %1474 = vmatmul.mubr.msk.f32.gmra.mrb[20].mxu0 %vm283_vm3, %v221_v50 }
  0x3e   : > { %1528 = vmatmul.mubr.msk.f32.gmra.mrb[20].mxu1 %vm283_vm3, %v257_v51  ;;  %1476 = vmatprep.mubr.msk.f32.mxu0 %vm283_vm3, %v222_v52 }
  0x3f   : > { %1530 = vmatprep.mubr.msk.f32.mxu1 %vm283_vm3, %v258_v53 }
  0x41   : > { %1477 = vmatmul.mubr.msk.f32.gmra.mrb[22].mxu0 %vm283_vm3, %v223_v54 }
  0x42   : > { %1531 = vmatmul.mubr.msk.f32.gmra.mrb[22].mxu1 %vm283_vm3, %v259_v55  ;;  %1479 = vmatprep.mubr.msk.f32.mxu0 %vm283_vm3, %v224_v56 }
  0x43   : > { %1533 = vmatprep.mubr.msk.f32.mxu1 %vm283_vm3, %v260_v57 }
  0x45   : > { %1480 = vmatmul.mubr.msk.f32.gmra.mrb[24].mxu0 %vm283_vm3, %v225_v58 }
  0x46   : > { %1534 = vmatmul.mubr.msk.f32.gmra.mrb[24].mxu1 %vm283_vm3, %v261_v59  ;;  %1482 = vmatprep.mubr.msk.f32.mxu0 %vm283_vm3, %v226_v60 }
  0x47   : > { %1536 = vmatprep.mubr.msk.f32.mxu1 %vm283_vm3, %v262_v61 }
  0x49   : > { %1483 = vmatmul.mubr.msk.f32.gmra.mrb[26].mxu0 %vm283_vm3, %v227_v62 }
  0x4a   : > { %1537 = vmatmul.mubr.msk.f32.gmra.mrb[26].mxu1 %vm283_vm3, %v263_v63  ;;  %1485 = vmatprep.mubr.msk.f32.mxu0 %vm283_vm3, %v228_v0 }
  0x4b   : > { %1539 = vmatprep.mubr.msk.f32.mxu1 %vm283_vm3, %v264_v1 }
  0x4d   : > { %1486 = vmatmul.mubr.msk.f32.gmra.mrb[28].mxu0 %vm283_vm3, %v229_v2 }
  0x4e   : > { %1540 = vmatmul.mubr.msk.f32.gmra.mrb[28].mxu1 %vm283_vm3, %v265_v3  ;;  %1488 = vmatprep.mubr.msk.f32.mxu0 %vm283_vm3, %v230_v4 }
  0x4f   : > { %1542 = vmatprep.mubr.msk.f32.mxu1 %vm283_vm3, %v266_v5 }
  0x51   : > { %1489 = vmatmul.mubr.msk.f32.gmra.mrb[30].mxu0 %vm283_vm3, %v231_v6 }
  0x52   : > { %1543 = vmatmul.mubr.msk.f32.gmra.mrb[30].mxu1 %vm283_vm3, %v267_v7  ;;  %1491 = vmatprep.mubr.msk.f32.mxu0 %vm283_vm3, %v232_v8 }
  0x53   : > { %1545 = vmatprep.mubr.msk.f32.mxu1 %vm283_vm3, %v268_v9 }
  0x55   : > { %1492 = vmatmul.mubr.msk.f32.gmra.mrb[32].mxu0 %vm283_vm3, %v233_v10 }
  0x56   : > { %1546 = vmatmul.mubr.msk.f32.gmra.mrb[32].mxu1 %vm283_vm3, %v269_v11  ;;  %1494 = vmatprep.mubr.msk.f32.mxu0 %vm283_vm3, %v234_v12 }
  0x57   : > { %1548 = vmatprep.mubr.msk.f32.mxu1 %vm283_vm3, %v270_v13 }
  0x59   : > { %1495 = vmatmul.mubr.msk.f32.gmra.mrb[34].mxu0 %vm283_vm3, %v235_v14 }
  0x5a   : > { %1549 = vmatmul.mubr.msk.f32.gmra.mrb[34].mxu1 %vm283_vm3, %v271_v15 }
  0xe8   : > { %v1445_v17 = vpop.f32.mrb[0].mxu0 }
  0xe9   : > { %v1499_v18 = vpop.f32.mrb[0].mxu1  ;;  %v576_v19 = vadd.f32 %v1445_v17, %v1790_v16  ;;  %v570_v21 = vpop.f32.mrb[1].mxu0 }
  0xea   : > { %v756_v20 = vadd.f32 %v1499_v18, %v1790_v16  ;;  %v750_v22 = vpop.f32.mrb[1].mxu1  ;;  %v571_v23 = vadd.f32 %v1790_v16, %v570_v21 }
  0xeb   : > { %v751_v25 = vadd.f32 %v1790_v16, %v750_v22  ;;  %vm932_vm4 = vcmp.gt.f32.partialorder %v576_v19, 0.0  ;;  %v1005_v32 = vmul.f32 %v1795_v24, %v576_v19 }
  0xec   : > { %vm968_vm5 = vcmp.gt.f32.partialorder %v756_v20, 0.0  ;;  %v1448_v26 = vpop.f32.mrb[2].mxu0  ;;  %v1041_v33 = vmul.f32 %v1795_v24, %v756_v20  ;;  %vm931_vm6 = vcmp.gt.f32.partialorder %v571_v23, 0.0  ;;  %v1004_v36 = vmul.f32 %v1795_v24, %v571_v23 }
  0xed   : > { %v1502_v27 = vpop.f32.mrb[2].mxu1  ;;  %v586_v28 = vadd.f32 %v1448_v26, %v1790_v16  ;;  %v580_v30 = vpop.f32.mrb[3].mxu0  ;;  %vm967_vm7 = vcmp.gt.f32.partialorder %v751_v25, 0.0  ;;  %v1040_v39 = vmul.f32 %v1795_v24, %v751_v25  ;;  %v1814_v49 = vsel %vm932_vm4, %v576_v19, %v1005_v32 }
  0xee   : > { %v766_v29 = vadd.f32 %v1502_v27, %v1790_v16  ;;  %v760_v31 = vpop.f32.mrb[3].mxu1  ;;  %v581_v34 = vadd.f32 %v1790_v16, %v580_v30  ;;  %v1817_v50 = vsel %vm968_vm5, %v756_v20, %v1041_v33  ;;  %v1820_v51 = vsel %vm931_vm6, %v571_v23, %v1004_v36 }
  0xef   : > { %v761_v35 = vadd.f32 %v1790_v16, %v760_v31  ;;  %v1007_v37 = vmul.f32 %v1795_v24, %v586_v28  ;;  %vm934_vm8 = vcmp.gt.f32.partialorder %v586_v28, 0.0  ;;  %v1830_v55 = vsel %vm967_vm7, %v751_v25, %v1040_v39 }
  0xf0   : > { %v1043_v38 = vmul.f32 %v1795_v24, %v766_v29  ;;  %vm970_vm9 = vcmp.gt.f32.partialorder %v766_v29, 0.0  ;;  %v1006_v40 = vmul.f32 %v1795_v24, %v581_v34  ;;  %v1451_v42 = vpop.f32.mrb[4].mxu0  ;;  %vm933_vm10 = vcmp.gt.f32.partialorder %v581_v34, 0.0 }
  0xf1   : > { %v1042_v41 = vmul.f32 %v1795_v24, %v761_v35  ;;  %v1505_v43 = vpop.f32.mrb[4].mxu1  ;;  %vm969_vm11 = vcmp.gt.f32.partialorder %v761_v35, 0.0  ;;  %v596_v44 = vadd.f32 %v1451_v42, %v1790_v16  ;;  %v590_v46 = vpop.f32.mrb[5].mxu0  ;;  %v1823_v52 = vsel %vm934_vm8, %v586_v28, %v1007_v37 }
  0xf2   : > { %v776_v45 = vadd.f32 %v1505_v43, %v1790_v16  ;;  %v770_v47 = vpop.f32.mrb[5].mxu1  ;;  %v591_v48 = vadd.f32 %v1790_v16, %v590_v46  ;;  %v1826_v53 = vsel %vm970_vm9, %v766_v29, %v1043_v38  ;;  %v1832_v56 = vsel %vm933_vm10, %v581_v34, %v1006_v40 }
  0xf3   : > { %v771_v54 = vadd.f32 %v1790_v16, %v770_v47  ;;  %v1834_v57 = vsel %vm969_vm11, %v761_v35, %v1042_v41  ;;  %vm936_vm12 = vcmp.gt.f32.partialorder %v596_v44, 0.0  ;;  %v1009_v58 = vmul.f32 %v1795_v24, %v596_v44 }
  0xf4   : > { %v1454_v59 = vpop.f32.mrb[6].mxu0  ;;  %vm972_vm13 = vcmp.gt.f32.partialorder %v776_v45, 0.0  ;;  %v1045_v61 = vmul.f32 %v1795_v24, %v776_v45  ;;  %vm935_vm14 = vcmp.gt.f32.partialorder %v591_v48, 0.0  ;;  %v1008_v2 = vmul.f32 %v1795_v24, %v591_v48 }
  0xf5   : > { %v1508_v60 = vpop.f32.mrb[6].mxu1  ;;  %v606_v62 = vadd.f32 %v1454_v59, %v1790_v16  ;;  %v600_v0 = vpop.f32.mrb[7].mxu0  ;;  %vm971_vm15 = vcmp.gt.f32.partialorder %v771_v54, 0.0  ;;  %v1044_v5 = vmul.f32 %v1795_v24, %v771_v54  ;;  %v1851_v17 = vsel %vm936_vm12, %v596_v44, %v1009_v58 }
  0xf6   : > { %v786_v63 = vadd.f32 %v1508_v60, %v1790_v16  ;;  %v780_v1 = vpop.f32.mrb[7].mxu1  ;;  %v601_v3 = vadd.f32 %v1790_v16, %v600_v0  ;;  %v1854_v18 = vsel %vm972_vm13, %v776_v45, %v1045_v61  ;;  %v1857_v19 = vsel %vm935_vm14, %v591_v48, %v1008_v2 }
  0xf7   : > { %v781_v4 = vadd.f32 %v1790_v16, %v780_v1  ;;  %v1011_v6 = vmul.f32 %v1795_v24, %v606_v62  ;;  %vm938_vm0 = vcmp.gt.f32.partialorder %v606_v62, 0.0  ;;  %v1861_v21 = vsel %vm971_vm15, %v771_v54, %v1044_v5 }
  0xf8   : > { %v1047_v7 = vmul.f32 %v1795_v24, %v786_v63  ;;  %vm974_vm1 = vcmp.gt.f32.partialorder %v786_v63, 0.0  ;;  %v1010_v8 = vmul.f32 %v1795_v24, %v601_v3  ;;  %v1457_v10 = vpop.f32.mrb[8].mxu0  ;;  %vm937_vm2 = vcmp.gt.f32.partialorder %v601_v3, 0.0 }
  0xf9   : > { %v1046_v9 = vmul.f32 %v1795_v24, %v781_v4  ;;  %v1511_v11 = vpop.f32.mrb[8].mxu1  ;;  %vm973_vm3 = vcmp.gt.f32.partialorder %v781_v4, 0.0  ;;  %v616_v12 = vadd.f32 %v1457_v10, %v1790_v16  ;;  %v610_v14 = vpop.f32.mrb[9].mxu0  ;;  %v1864_v22 = vsel %vm938_vm0, %v606_v62, %v1011_v6 }
  0xfa   : > { %v796_v13 = vadd.f32 %v1511_v11, %v1790_v16  ;;  %v790_v15 = vpop.f32.mrb[9].mxu1  ;;  %v611_v20 = vadd.f32 %v1790_v16, %v610_v14  ;;  %v1867_v23 = vsel %vm974_vm1, %v786_v63, %v1047_v7  ;;  %v1870_v26 = vsel %vm937_vm2, %v601_v3, %v1010_v8 }
  0xfb   : > { %v791_v25 = vadd.f32 %v1790_v16, %v790_v15  ;;  %v1872_v27 = vsel %vm973_vm3, %v781_v4, %v1046_v9  ;;  %vm940_vm4 = vcmp.gt.f32.partialorder %v616_v12, 0.0  ;;  %v1013_v28 = vmul.f32 %v1795_v24, %v616_v12 }
  0xfc   : > { %v1460_v29 = vpop.f32.mrb[10].mxu0  ;;  %vm976_vm5 = vcmp.gt.f32.partialorder %v796_v13, 0.0  ;;  %v1049_v31 = vmul.f32 %v1795_v24, %v796_v13  ;;  %vm939_vm6 = vcmp.gt.f32.partialorder %v611_v20, 0.0  ;;  %v1012_v36 = vmul.f32 %v1795_v24, %v611_v20 }
  0xfd   : > { %v1514_v30 = vpop.f32.mrb[10].mxu1  ;;  %v626_v32 = vadd.f32 %v1460_v29, %v1790_v16  ;;  %v620_v34 = vpop.f32.mrb[11].mxu0  ;;  %vm975_vm7 = vcmp.gt.f32.partialorder %v791_v25, 0.0  ;;  %v1048_v39 = vmul.f32 %v1795_v24, %v791_v25  ;;  %v1889_v58 = vsel %vm940_vm4, %v616_v12, %v1013_v28 }
  0xfe   : > { %v806_v33 = vadd.f32 %v1514_v30, %v1790_v16  ;;  %v800_v35 = vpop.f32.mrb[11].mxu1  ;;  %v621_v37 = vadd.f32 %v1790_v16, %v620_v34  ;;  %v1892_v59 = vsel %vm976_vm5, %v796_v13, %v1049_v31  ;;  %v1895_v60 = vsel %vm939_vm6, %v611_v20, %v1012_v36 }
  0xff   : > { %v801_v38 = vadd.f32 %v1790_v16, %v800_v35  ;;  %v1015_v40 = vmul.f32 %v1795_v24, %v626_v32  ;;  %vm942_vm8 = vcmp.gt.f32.partialorder %v626_v32, 0.0  ;;  %v1899_v62 = vsel %vm975_vm7, %v791_v25, %v1048_v39 }
 0x100   : > { %v1051_v41 = vmul.f32 %v1795_v24, %v806_v33  ;;  %vm978_vm9 = vcmp.gt.f32.partialorder %v806_v33, 0.0  ;;  %v1014_v42 = vmul.f32 %v1795_v24, %v621_v37  ;;  %v1463_v44 = vpop.f32.mrb[12].mxu0  ;;  %vm941_vm10 = vcmp.gt.f32.partialorder %v621_v37, 0.0 }
 0x101   : > { %v1050_v43 = vmul.f32 %v1795_v24, %v801_v38  ;;  %v1517_v45 = vpop.f32.mrb[12].mxu1  ;;  %vm977_vm11 = vcmp.gt.f32.partialorder %v801_v38, 0.0  ;;  %v636_v46 = vadd.f32 %v1463_v44, %v1790_v16  ;;  %v630_v48 = vpop.f32.mrb[13].mxu0  ;;  %v1902_v63 = vsel %vm942_vm8, %v626_v32, %v1015_v40 }
 0x102   : > { %v816_v47 = vadd.f32 %v1517_v45, %v1790_v16  ;;  %v810_v54 = vpop.f32.mrb[13].mxu1  ;;  %v631_v61 = vadd.f32 %v1790_v16, %v630_v48  ;;  %v1905_v0 = vsel %vm978_vm9, %v806_v33, %v1051_v41  ;;  %v1908_v2 = vsel %vm941_vm10, %v621_v37, %v1014_v42 }
 0x103   : > { %v811_v1 = vadd.f32 %v1790_v16, %v810_v54  ;;  %v1910_v3 = vsel %vm977_vm11, %v801_v38, %v1050_v43  ;;  %vm944_vm12 = vcmp.gt.f32.partialorder %v636_v46, 0.0  ;;  %v1017_v4 = vmul.f32 %v1795_v24, %v636_v46 }
 0x104   : > { %v1466_v5 = vpop.f32.mrb[14].mxu0  ;;  %vm980_vm13 = vcmp.gt.f32.partialorder %v816_v47, 0.0  ;;  %v1053_v7 = vmul.f32 %v1795_v24, %v816_v47  ;;  %vm943_vm14 = vcmp.gt.f32.partialorder %v631_v61, 0.0  ;;  %v1016_v12 = vmul.f32 %v1795_v24, %v631_v61 }
 0x105   : > { %v1520_v6 = vpop.f32.mrb[14].mxu1  ;;  %v646_v8 = vadd.f32 %v1466_v5, %v1790_v16  ;;  %v640_v10 = vpop.f32.mrb[15].mxu0  ;;  %vm979_vm15 = vcmp.gt.f32.partialorder %v811_v1, 0.0  ;;  %v1052_v15 = vmul.f32 %v1795_v24, %v811_v1  ;;  %v1929_v36 = vsel %vm944_vm12, %v636_v46, %v1017_v4 }
 0x106   : > { %v826_v9 = vadd.f32 %v1520_v6, %v1790_v16  ;;  %v820_v11 = vpop.f32.mrb[15].mxu1  ;;  %v641_v13 = vadd.f32 %v1790_v16, %v640_v10  ;;  %v1932_v37 = vsel %vm980_vm13, %v816_v47, %v1053_v7  ;;  %v1941_v40 = vsel %vm943_vm14, %v631_v61, %v1016_v12 }
 0x107   : > { %v821_v14 = vadd.f32 %v1790_v16, %v820_v11  ;;  %vm946_vm0 = vcmp.gt.f32.partialorder %v646_v8, 0.0  ;;  %v1019_v20 = vmul.f32 %v1795_v24, %v646_v8  ;;  %v1944_v41 = vsel %vm979_vm15, %v811_v1, %v1052_v15 }
 0x108   : > { %vm982_vm1 = vcmp.gt.f32.partialorder %v826_v9, 0.0  ;;  %v1055_v25 = vmul.f32 %v1795_v24, %v826_v9  ;;  %v1018_v28 = vmul.f32 %v1795_v24, %v641_v13  ;;  %v1469_v30 = vpop.f32.mrb[16].mxu0  ;;  %vm945_vm2 = vcmp.gt.f32.partialorder %v641_v13, 0.0 }
 0x109   : > { %v1054_v29 = vmul.f32 %v1795_v24, %v821_v14  ;;  %v1523_v31 = vpop.f32.mrb[16].mxu1  ;;  %vm981_vm3 = vcmp.gt.f32.partialorder %v821_v14, 0.0  ;;  %v656_v32 = vadd.f32 %v1469_v30, %v1790_v16  ;;  %v650_v34 = vpop.f32.mrb[17].mxu0  ;;  %vm1202_vm5 = vcmask 261120  }
 0x10a   : > { %v1926_v33 = vadd.f32 %v1523_v31, %v1790_v16  ;;  %v830_v35 = vpop.f32.mrb[17].mxu1  ;;  %v1935_v38 = vadd.f32 %v1790_v16, %v650_v34  ;;  %v1948_v43 = vsel %vm946_vm0, %v646_v8, %v1019_v20  ;;  %v1951_v44 = vsel %vm982_vm1, %v826_v9, %v1055_v25 }
 0x10b   : > { %v1938_v39 = vadd.f32 %v1790_v16, %v830_v35  ;;  %vm948_vm4 = vcmp.gt.f32.partialorder %v656_v32, 0.0  ;;  %v1021_v42 = vmul.f32 %v1795_v24, %v656_v32  ;;  %v1954_v45 = vsel %vm945_vm2, %v641_v13, %v1018_v28 }
 0x10c   : > { %v1957_v46 = vsel %vm981_vm3, %v821_v14, %v1054_v29  ;;  %v1472_v47 = vpop.f32.mrb[18].mxu0  ;;  %v1961_v54 = vmul.f32 %v1795_v24, %v1926_v33  ;;  %v1965_v61 = vmul.f32 %v1795_v24, %v1935_v38 }
 0x10d   : > { %v1526_v48 = vpop.f32.mrb[18].mxu1  ;;  %v666_v1 = vadd.f32 %v1472_v47, %v1790_v16  ;;  %v660_v5 = vpop.f32.mrb[19].mxu0  ;;  %v1969_v7 = vsel %vm948_vm4, %v656_v32, %v1021_v42  ;;  %v1973_v8 = vmul.f32 %v1795_v24, %v1938_v39 }
 0x10e   : > { %v846_v4 = vadd.f32 %v1526_v48, %v1790_v16  ;;  %v840_v6 = vpop.f32.mrb[19].mxu1  ;;  %v661_v9 = vadd.f32 %v1790_v16, %v660_v5 }
 0x10f   : > { %v841_v10 = vadd.f32 %v1790_v16, %v840_v6  ;;  %vm950_vm6 = vcmp.gt.f32.partialorder %v666_v1, 0.0  ;;  %v1023_v11 = vmul.f32 %v1795_v24, %v666_v1 }
 0x110   : > { %vm986_vm7 = vcmp.gt.f32.partialorder %v846_v4, 0.0  ;;  %v1059_v12 = vmul.f32 %v1795_v24, %v846_v4  ;;  %vm949_vm8 = vcmp.gt.f32.partialorder %v661_v9, 0.0  ;;  %v1022_v13 = vmul.f32 %v1795_v24, %v661_v9  ;;  %v1475_v15 = vpop.f32.mrb[20].mxu0 }
 0x111   : > { %vm985_vm9 = vcmp.gt.f32.partialorder %v841_v10, 0.0  ;;  %v1058_v14 = vmul.f32 %v1795_v24, %v841_v10  ;;  %v1529_v20 = vpop.f32.mrb[20].mxu1  ;;  %v1095_v25 = vsel %vm950_vm6, %v666_v1, %v1023_v11  ;;  %v676_v29 = vadd.f32 %v1475_v15, %v1790_v16  ;;  %v670_v31 = vpop.f32.mrb[21].mxu0 }
 0x112   : > { %v1131_v28 = vsel %vm986_vm7, %v846_v4, %v1059_v12  ;;  %v856_v30 = vadd.f32 %v1529_v20, %v1790_v16  ;;  %v850_v32 = vpop.f32.mrb[21].mxu1  ;;  %v1149_v34 = vmax.f32 %v1814_v49, %v1095_v25  ;;  %v1094_v42 = vsel %vm949_vm8, %v661_v9, %v1022_v13 }
 0x113   : > { %v1167_v35 = vmax.f32 %v1817_v50, %v1131_v28  ;;  %v1130_v47 = vsel %vm985_vm9, %v841_v10, %v1058_v14  ;;  %v1148_v48 = vmax.f32 %v1820_v51, %v1094_v42  ;;  %vm952_vm10 = vcmp.gt.f32.partialorder %v676_v29, 0.0 }
 0x114   : > { %v1166_v1 = vmax.f32 %v1830_v55, %v1130_v47  ;;  %v1025_v4 = vmul.f32 %v1795_v24, %v676_v29  ;;  %vm988_vm11 = vcmp.gt.f32.partialorder %v856_v30, 0.0  ;;  %v1061_v49 = vmul.f32 %v1795_v24, %v856_v30  ;;  %v1478_v6 = vpop.f32.mrb[22].mxu0 }
 0x115   : > { %v1185_v5 = vmax.f32 %v1149_v34, %v1167_v35  ;;  %v671_v50 = vadd.f32 %v1790_v16, %v670_v31  ;;  %v1532_v9 = vpop.f32.mrb[22].mxu1  ;;  %v851_v12 = vadd.f32 %v1790_v16, %v850_v32  ;;  %v686_v51 = vadd.f32 %v1478_v6, %v1790_v16  ;;  %v680_v13 = vpop.f32.mrb[23].mxu0 }
 0x116   : > { %v1184_v10 = vmax.f32 %v1148_v48, %v1166_v1  ;;  %v1097_v11 = vsel %vm952_vm10, %v676_v29, %v1025_v4  ;;  %v860_v55 = vpop.f32.mrb[23].mxu1  ;;  %v1133_v15 = vsel %vm988_vm11, %v856_v30, %v1061_v49  ;;  %v866_v32 = vadd.f32 %v1532_v9, %v1790_v16 }
 0x117   : > { %1204 = vst.msk [vmem:[%s1989_s10 + $0x8] sm:$0xff] %vm1202_vm5, %v1185_v5  ;;  %v1151_v14 = vmax.f32 %v1823_v52, %v1097_v11  ;;  %vm951_vm12 = vcmp.gt.f32.partialorder %v671_v50, 0.0  ;;  %v1024_v20 = vmul.f32 %v1795_v24, %v671_v50  ;;  %v1169_v25 = vmax.f32 %v1826_v53, %v1133_v15 }
 0x118   : > { %1203 = vst.msk [vmem:[%s1989_s10] sm:$0xff] %vm1202_vm5, %v1184_v10  ;;  %vm987_vm13 = vcmp.gt.f32.partialorder %v851_v12, 0.0  ;;  %v1060_v28 = vmul.f32 %v1795_v24, %v851_v12  ;;  %vm954_vm14 = vcmp.gt.f32.partialorder %v686_v51, 0.0  ;;  %v1027_v31 = vmul.f32 %v1795_v24, %v686_v51  ;;  %v1481_v30 = vpop.f32.mrb[24].mxu0 }
 0x119   : > { %v1096_v29 = vsel %vm951_vm12, %v671_v50, %v1024_v20  ;;  %v681_v52 = vadd.f32 %v1790_v16, %v680_v13  ;;  %v1535_v34 = vpop.f32.mrb[24].mxu1  ;;  %v1187_v35 = vmax.f32 %v1151_v14, %v1169_v25  ;;  %v861_v53 = vadd.f32 %v1790_v16, %v860_v55  ;;  %v690_v48 = vpop.f32.mrb[25].mxu0 }
 0x11a   : > { %v1150_v42 = vmax.f32 %v1832_v56, %v1096_v29  ;;  %v1132_v47 = vsel %vm987_vm13, %v851_v12, %v1060_v28  ;;  %v870_v1 = vpop.f32.mrb[25].mxu1  ;;  %v1099_v5 = vsel %vm954_vm14, %v686_v51, %v1027_v31  ;;  %vm990_vm15 = vcmp.gt.f32.partialorder %v866_v32, 0.0 }
 0x11b   : > { %v1168_v4 = vmax.f32 %v1834_v57, %v1132_v47  ;;  %v1063_v49 = vmul.f32 %v1795_v24, %v866_v32  ;;  %1206 = vst.msk [vmem:[%s1989_s10 + $0x18] sm:$0xff] %vm1202_vm5, %v1187_v35  ;;  %v1153_v50 = vmax.f32 %v1851_v17, %v1099_v5  ;;  %vm953_vm0 = vcmp.gt.f32.partialorder %v681_v52, 0.0 }
 0x11c   : > { %v1026_v6 = vmul.f32 %v1795_v24, %v681_v52  ;;  %vm989_vm1 = vcmp.gt.f32.partialorder %v861_v53, 0.0  ;;  %v1062_v10 = vmul.f32 %v1795_v24, %v861_v53  ;;  %v696_v11 = vadd.f32 %v1481_v30, %v1790_v16  ;;  %v1484_v57 = vpop.f32.mrb[26].mxu0 }
 0x11d   : > { %v1186_v56 = vmax.f32 %v1150_v42, %v1168_v4  ;;  %v1135_v9 = vsel %vm990_vm15, %v866_v32, %v1063_v49  ;;  %v1538_v12 = vpop.f32.mrb[26].mxu1  ;;  %v876_v55 = vadd.f32 %v1535_v34, %v1790_v16  ;;  %v691_v17 = vadd.f32 %v1790_v16, %v690_v48  ;;  %v700_v14 = vpop.f32.mrb[27].mxu0 }
 0x11e   : > { %v1171_v51 = vmax.f32 %v1854_v18, %v1135_v9  ;;  %v1098_v13 = vsel %vm953_vm0, %v681_v52, %v1026_v6  ;;  %v880_v15 = vpop.f32.mrb[27].mxu1  ;;  %v1134_v25 = vsel %vm989_vm1, %v861_v53, %v1062_v10  ;;  %vm956_vm2 = vcmp.gt.f32.partialorder %v696_v11, 0.0 }
 0x11f   : > { %1205 = vst.msk [vmem:[%s1989_s10 + $0x10] sm:$0xff] %vm1202_vm5, %v1186_v56  ;;  %v1152_v20 = vmax.f32 %v1857_v19, %v1098_v13  ;;  %v1029_v28 = vmul.f32 %v1795_v24, %v696_v11  ;;  %v1170_v31 = vmax.f32 %v1861_v21, %v1134_v25  ;;  %vm992_vm3 = vcmp.gt.f32.partialorder %v876_v55, 0.0 }
 0x120   : > { %v1189_v29 = vmax.f32 %v1153_v50, %v1171_v51  ;;  %v1065_v18 = vmul.f32 %v1795_v24, %v876_v55  ;;  %vm955_vm4 = vcmp.gt.f32.partialorder %v691_v17, 0.0  ;;  %v1028_v52 = vmul.f32 %v1795_v24, %v691_v17  ;;  %v1487_v34 = vpop.f32.mrb[28].mxu0 }
 0x121   : > { %v1101_v32 = vsel %vm956_vm2, %v696_v11, %v1029_v28  ;;  %v871_v30 = vadd.f32 %v1790_v16, %v870_v1  ;;  %v1541_v35 = vpop.f32.mrb[28].mxu1  ;;  %v1188_v19 = vmax.f32 %v1152_v20, %v1170_v31  ;;  %v706_v21 = vadd.f32 %v1484_v57, %v1790_v16  ;;  %v710_v53 = vpop.f32.mrb[29].mxu0 }
 0x122   : > { %1208 = vst.msk [vmem:[%s1989_s10 + $0x28] sm:$0xff] %vm1202_vm5, %v1189_v29  ;;  %v1155_v42 = vmax.f32 %v1864_v22, %v1101_v32  ;;  %v1137_v47 = vsel %vm992_vm3, %v876_v55, %v1065_v18  ;;  %v890_v48 = vpop.f32.mrb[29].mxu1  ;;  %v1100_v5 = vsel %vm955_vm4, %v691_v17, %v1028_v52  ;;  %v886_v22 = vadd.f32 %v1538_v12, %v1790_v16 }
 0x123   : > { %v1173_v4 = vmax.f32 %v1867_v23, %v1137_v47  ;;  %vm991_vm6 = vcmp.gt.f32.partialorder %v871_v30, 0.0  ;;  %v1064_v49 = vmul.f32 %v1795_v24, %v871_v30  ;;  %1207 = vst.msk [vmem:[%s1989_s10 + $0x20] sm:$0xff] %vm1202_vm5, %v1188_v19  ;;  %v1154_v1 = vmax.f32 %v1870_v26, %v1100_v5 }
 0x124   : > { %vm958_vm7 = vcmp.gt.f32.partialorder %v706_v21, 0.0  ;;  %v1031_v50 = vmul.f32 %v1795_v24, %v706_v21  ;;  %v701_v9 = vadd.f32 %v1790_v16, %v700_v14  ;;  %v881_v23 = vadd.f32 %v1790_v16, %v880_v15  ;;  %v1490_v10 = vpop.f32.mrb[30].mxu0 }
 0x125   : > { %v1191_v6 = vmax.f32 %v1155_v42, %v1173_v4  ;;  %v1136_v56 = vsel %vm991_vm6, %v871_v30, %v1064_v49  ;;  %v1544_v11 = vpop.f32.mrb[30].mxu1  ;;  %vm994_vm8 = vcmp.gt.f32.partialorder %v886_v22, 0.0  ;;  %v1067_v26 = vmul.f32 %v1795_v24, %v886_v22  ;;  %v720_v13 = vpop.f32.mrb[31].mxu0 }
 0x126   : > { %v1172_v57 = vmax.f32 %v1872_v27, %v1136_v56  ;;  %v1103_v51 = vsel %vm958_vm7, %v706_v21, %v1031_v50  ;;  %v900_v55 = vpop.f32.mrb[31].mxu1  ;;  %vm957_vm9 = vcmp.gt.f32.partialorder %v701_v9, 0.0  ;;  %v1030_v17 = vmul.f32 %v1795_v24, %v701_v9 }
 0x127   : > { %1210 = vst.msk [vmem:[%s1989_s10 + $0x38] sm:$0xff] %vm1202_vm5, %v1191_v6  ;;  %v1157_v12 = vmax.f32 %v1889_v58, %v1103_v51  ;;  %vm993_vm10 = vcmp.gt.f32.partialorder %v881_v23, 0.0  ;;  %v1139_v15 = vsel %vm994_vm8, %v886_v22, %v1067_v26  ;;  %v1066_v20 = vmul.f32 %v1795_v24, %v881_v23 }
 0x128   : > { %v1190_v14 = vmax.f32 %v1154_v1, %v1172_v57  ;;  %v716_v27 = vadd.f32 %v1487_v34, %v1790_v16  ;;  %v1175_v25 = vmax.f32 %v1892_v59, %v1139_v15  ;;  %v1102_v28 = vsel %vm957_vm9, %v701_v9, %v1030_v17  ;;  %v1493_v18 = vpop.f32.mrb[32].mxu0 }
 0x129   : > { %v896_v29 = vadd.f32 %v1541_v35, %v1790_v16  ;;  %v711_v31 = vadd.f32 %v1790_v16, %v710_v53  ;;  %v1547_v32 = vpop.f32.mrb[32].mxu1  ;;  %v1156_v58 = vmax.f32 %v1895_v60, %v1102_v28  ;;  %v1138_v52 = vsel %vm993_vm10, %v881_v23, %v1066_v20  ;;  %v730_v19 = vpop.f32.mrb[33].mxu0 }
 0x12a   : > { %1209 = vst.msk [vmem:[%s1989_s10 + $0x30] sm:$0xff] %vm1202_vm5, %v1190_v14  ;;  %vm960_vm11 = vcmp.gt.f32.partialorder %v716_v27, 0.0  ;;  %v1033_v30 = vmul.f32 %v1795_v24, %v716_v27  ;;  %v2058_v34 = vpop.f32.mrb[33].mxu1  ;;  %v1193_v59 = vmax.f32 %v1157_v12, %v1175_v25  ;;  %v1174_v42 = vmax.f32 %v1899_v62, %v1138_v52 }
 0x12b   : > { %vm996_vm12 = vcmp.gt.f32.partialorder %v896_v29, 0.0  ;;  %v1069_v35 = vmul.f32 %v1795_v24, %v896_v29  ;;  %vm959_vm13 = vcmp.gt.f32.partialorder %v711_v31, 0.0  ;;  %v1032_v21 = vmul.f32 %v1795_v24, %v711_v31 }
 0x12c   : > { %v1105_v47 = vsel %vm960_vm11, %v716_v27, %v1033_v30  ;;  %v891_v60 = vadd.f32 %v1790_v16, %v890_v48  ;;  %1212 = vst.msk [vmem:[%s1989_s10 + $0x48] sm:$0xff] %vm1202_vm5, %v1193_v59  ;;  %v1192_v53 = vmax.f32 %v1156_v58, %v1174_v42  ;;  %v726_v49 = vadd.f32 %v1490_v10, %v1790_v16  ;;  %v1496_v1 = vpop.f32.mrb[34].mxu0 }
 0x12d   : > { %v1159_v4 = vmax.f32 %v1902_v63, %v1105_v47  ;;  %v1141_v5 = vsel %vm996_vm12, %v896_v29, %v1069_v35  ;;  %v1550_v62 = vpop.f32.mrb[34].mxu1  ;;  %v1104_v22 = vsel %vm959_vm13, %v711_v31, %v1032_v21  ;;  %v740_v56 = vpop.f32.mrb[35].mxu0  ;;  %v906_v23 = vadd.f32 %v1544_v11, %v1790_v16 }
 0x12e   : > { %v1177_v50 = vmax.f32 %v1905_v0, %v1141_v5  ;;  %vm995_vm14 = vcmp.gt.f32.partialorder %v891_v60, 0.0  ;;  %v1068_v6 = vmul.f32 %v1795_v24, %v891_v60  ;;  %v920_v9 = vpop.f32.mrb[35].mxu1  ;;  %1211 = vst.msk [vmem:[%s1989_s10 + $0x40] sm:$0xff] %vm1202_vm5, %v1192_v53  ;;  %v1158_v48 = vmax.f32 %v1908_v2, %v1104_v22 }
 0x12f   : > { %vm962_vm15 = vcmp.gt.f32.partialorder %v726_v49, 0.0  ;;  %v1035_v63 = vmul.f32 %v1795_v24, %v726_v49  ;;  %v721_v0 = vadd.f32 %v1790_v16, %v720_v13  ;;  %v901_v51 = vadd.f32 %v1790_v16, %v900_v55 }
 0x130   : > { %v1195_v10 = vmax.f32 %v1159_v4, %v1177_v50  ;;  %v1140_v57 = vsel %vm995_vm14, %v891_v60, %v1068_v6  ;;  %vm998_vm0 = vcmp.gt.f32.partialorder %v906_v23, 0.0  ;;  %v1071_v17 = vmul.f32 %v1795_v24, %v906_v23 }
 0x131   : > { %v1176_v26 = vmax.f32 %v1910_v3, %v1140_v57  ;;  %v1107_v12 = vsel %vm962_vm15, %v726_v49, %v1035_v63  ;;  %vm961_vm1 = vcmp.gt.f32.partialorder %v721_v0, 0.0  ;;  %v1034_v11 = vmul.f32 %v1795_v24, %v721_v0 }
 0x132   : > { %1214 = vst.msk [vmem:[%s1989_s10 + $0x58] sm:$0xff] %vm1202_vm5, %v1195_v10  ;;  %v1161_v2 = vmax.f32 %v1929_v36, %v1107_v12  ;;  %vm997_vm2 = vcmp.gt.f32.partialorder %v901_v51, 0.0  ;;  %vm984_vm3 = vcmp.gt.f32.partialorder %v1926_v33, 0.0  ;;  %v1143_v14 = vsel %vm998_vm0, %v906_v23, %v1071_v17 }
 0x133   : > { %v1194_v13 = vmax.f32 %v1158_v48, %v1176_v26  ;;  %v1070_v55 = vmul.f32 %v1795_v24, %v901_v51  ;;  %v736_v3 = vadd.f32 %v1493_v18, %v1790_v16  ;;  %vm947_vm4 = vcmp.gt.f32.partialorder %v1935_v38, 0.0 }
 0x134   : > { %v1179_v15 = vmax.f32 %v1932_v37, %v1143_v14  ;;  %v1106_v20 = vsel %vm961_vm1, %v721_v0, %v1034_v11  ;;  %v916_v27 = vadd.f32 %v1547_v32, %v1790_v16  ;;  %v731_v36 = vadd.f32 %v1790_v16, %v730_v19 }
 0x135   : > { %vm983_vm6 = vcmp.gt.f32.partialorder %v1938_v39, 0.0  ;;  %1213 = vst.msk [vmem:[%s1989_s10 + $0x50] sm:$0xff] %vm1202_vm5, %v1194_v13  ;;  %v1160_v25 = vmax.f32 %v1941_v40, %v1106_v20  ;;  %v1142_v28 = vsel %vm997_vm2, %v901_v51, %v1070_v55  ;;  %vm964_vm7 = vcmp.gt.f32.partialorder %v736_v3, 0.0 }
 0x136   : > { %v1037_v29 = vmul.f32 %v1795_v24, %v736_v3  ;;  %v1197_v31 = vmax.f32 %v1161_v2, %v1179_v15  ;;  %v1178_v18 = vmax.f32 %v1944_v41, %v1142_v28  ;;  %vm1000_vm8 = vcmp.gt.f32.partialorder %v916_v27, 0.0 }
 0x137   : > { %v1073_v37 = vmul.f32 %v1795_v24, %v916_v27  ;;  %vm963_vm9 = vcmp.gt.f32.partialorder %v731_v36, 0.0  ;;  %v1036_v58 = vmul.f32 %v1795_v24, %v731_v36  ;;  %v911_v52 = vadd.f32 %v1790_v16, %v2058_v34 }
 0x138   : > { %v1109_v32 = vsel %vm964_vm7, %v736_v3, %v1037_v29  ;;  %1216 = vst.msk [vmem:[%s1989_s10 + $0x68] sm:$0xff] %vm1202_vm5, %v1197_v31  ;;  %v1196_v40 = vmax.f32 %v1160_v25, %v1178_v18  ;;  %v746_v59 = vadd.f32 %v1496_v1, %v1790_v16  ;;  %v926_v21 = vadd.f32 %v1550_v62, %v1790_v16 }
 0x139   : > { %v1163_v30 = vmax.f32 %v1948_v43, %v1109_v32  ;;  %v1145_v19 = vsel %vm1000_vm8, %v916_v27, %v1073_v37  ;;  %v1108_v42 = vsel %vm963_vm9, %v731_v36, %v1036_v58  ;;  %vm999_vm10 = vcmp.gt.f32.partialorder %v911_v52, 0.0 }
 0x13a   : > { %v1181_v41 = vmax.f32 %v1951_v44, %v1145_v19  ;;  %v1072_v35 = vmul.f32 %v1795_v24, %v911_v52  ;;  %1215 = vst.msk [vmem:[%s1989_s10 + $0x60] sm:$0xff] %vm1202_vm5, %v1196_v40  ;;  %v1162_v47 = vmax.f32 %v1954_v45, %v1108_v42  ;;  %vm966_vm11 = vcmp.gt.f32.partialorder %v746_v59, 0.0 }
 0x13b   : > { %v1039_v34 = vmul.f32 %v1795_v24, %v746_v59  ;;  %v741_v53 = vadd.f32 %v1790_v16, %v740_v56  ;;  %v921_v44 = vadd.f32 %v1790_v16, %v920_v9  ;;  %vm1002_vm12 = vcmp.gt.f32.partialorder %v926_v21, 0.0 }
 0x13c   : > { %v1199_v43 = vmax.f32 %v1163_v30, %v1181_v41  ;;  %v1144_v60 = vsel %vm999_vm10, %v911_v52, %v1072_v35  ;;  %v1075_v49 = vmul.f32 %v1795_v24, %v926_v21  ;;  %v1129_v16 = vsel %vm984_vm3, %v1926_v33, %v1961_v54 }
 0x13d   : > { %v1180_v4 = vmax.f32 %v1957_v46, %v1144_v60  ;;  %v1111_v5 = vsel %vm966_vm11, %v746_v59, %v1039_v34  ;;  %vm965_vm13 = vcmp.gt.f32.partialorder %v741_v53, 0.0  ;;  %v1038_v1 = vmul.f32 %v1795_v24, %v741_v53 }
 0x13e   : > { %1218 = vst.msk [vmem:[%s1989_s10 + $0x78] sm:$0xff] %vm1202_vm5, %v1199_v43  ;;  %v1165_v45 = vmax.f32 %v1969_v7, %v1111_v5  ;;  %vm1001_vm14 = vcmp.gt.f32.partialorder %v921_v44, 0.0  ;;  %v1147_v62 = vsel %vm1002_vm12, %v926_v21, %v1075_v49  ;;  %v1074_v50 = vmul.f32 %v1795_v24, %v921_v44 }
 0x13f   : > { %v1198_v46 = vmax.f32 %v1162_v47, %v1180_v4  ;;  %v1092_v7 = vsel %vm947_vm4, %v1935_v38, %v1965_v61  ;;  %v1183_v22 = vmax.f32 %v1129_v16, %v1147_v62  ;;  %v1110_v6 = vsel %vm965_vm13, %v741_v53, %v1038_v1 }
 0x140   : > { %v1128_v56 = vsel %vm983_vm6, %v1938_v39, %v1973_v8  ;;  %v1164_v9 = vmax.f32 %v1092_v7, %v1110_v6  ;;  %v1146_v33 = vsel %vm1001_vm14, %v921_v44, %v1074_v50 }
 0x141   : > { %1217 = vst.msk [vmem:[%s1989_s10 + $0x70] sm:$0xff] %vm1202_vm5, %v1198_v46  ;;  %v1201_v54 = vmax.f32 %v1165_v45, %v1183_v22  ;;  %v1182_v48 = vmax.f32 %v1128_v56, %v1146_v33 }
 0x143   : > { %1220 = vst.msk [vmem:[%s1989_s10 + $0x88] sm:$0xff] %vm1202_vm5, %v1201_v54  ;;  %v1200_v24 = vmax.f32 %v1164_v9, %v1182_v48 }
 0x145   : > { %1219 = vst.msk [vmem:[%s1989_s10 + $0x80] sm:$0xff] %vm1202_vm5, %v1200_v24 }
 0x146 PF: > { %s16_s17 = sadd.s32 1, %s1584_s17  }
 0x147   : > { %p13_p4 = scmp.ge.s32.totalorder %s16_s17, 4  }
 0x149   :  { %15 = sbr.rel (!%p13_p4) target bundleno = 3 (0x3), region = 66 }

// kernel: classification_net_forward.4
= control target key start
LH: loop header
LB: loop body
LE: loop exit
PB: predicated region body
PF: predicated region fallthrough
CT: control target
= control target key end

     0   :  { %s1286_s17 = smov 0   ;;  %s1698_s0 = inlined_call_operand.vmem [shape: f32[2,64,800], index: 0, kind: input, shape index: {}]   ;;  %s1699_s1 = inlined_call_operand.vmem [shape: f32[800,64], index: 1, kind: input, shape index: {}]   ;;  %s1700_s2 = inlined_call_operand.vmem [shape: f32[1,64], index: 2, kind: input, shape index: {}]   ;;  %s1701_s3 = inlined_call_operand.<no memory space> [shape: f32[1,1], index: 3, kind: input, shape index: {}]   ;;  %s1702_s4 = inlined_call_operand.vmem [shape: f32[2,16,64], index: 4, kind: output, shape index: {}]  }
   0x1   :  { %v9_v0 = vstv %s1701_s3 }
   0x2   :  { %10 = vst [vmem:[#allocation2] sm:$0x1] %v9_v0 }
   0x3 LB: > { %s899_s18 = sadd.s32 4294967295, %s1256_s17   ;;  %p903_p0 = scmp.ge.s32.totalorder %s1256_s17, 1  ;;  %s1256_s17 = sphi %s1286_s17, %s16_s17  }
   0x4   : > { %p164_p1 = scmp.lt.s32.totalorder %s1256_s17, 3 }
   0x6   : > { %p165_p2 = pnand %p903_p0, %p164_p1 }
   0x7   : > { %v272_v1 = vld [vmem:[%s1699_s1 + $0x80] sm:$0xff] (!%p165_p2)  ;;  %v273_v2 = vld [vmem:[%s1699_s1 + $0x88] sm:$0xff] (!%p165_p2)  ;;  %v274_v12 = vld [vmem:[%s1699_s1 + $0x90] sm:$0xff] (!%p165_p2)  ;;  %p1359_p3 = scmp.lt.s32.totalorder (!%p165_p2), %s899_s18, 1  ;;  %vm363_vm0 = vcmask (!%p165_p2), 261120   ;;  %vm841_vm9 = vcmask (!%p165_p2), 523264  }
   0x8   : > { %168 = sbr.rel (%p165_p2) target bundleno = 322 (0x142), region = 36  ;;  %v304_v3 = vld [vmem:[%s1699_s1 + $0x180] sm:$0xff] (!%p165_p2)  ;;  %v1119_v4 = vpack.c.bf16 (!%p165_p2), %v273_v2, %v272_v1  ;;  %v305_v5 = vld [vmem:[%s1699_s1 + $0x188] sm:$0xff] (!%p165_p2)  ;;  %v275_v14 = vld [vmem:[%s1699_s1 + $0x98] sm:$0xff] (!%p165_p2) }
   0x9   : > { %v256_v6 = vld [vmem:[%s1699_s1] sm:$0xff] (!%p165_p2)  ;;  %v257_v7 = vld [vmem:[%s1699_s1 + $0x8] sm:$0xff] (!%p165_p2)  ;;  %v1151_v8 = vpack.c.bf16 (!%p165_p2), %v305_v5, %v304_v3  ;;  %v306_v15 = vld [vmem:[%s1699_s1 + $0x190] sm:$0xff] (!%p165_p2)  ;;  %v1123_v17 = vpack.c.bf16 (!%p165_p2), %v275_v14, %v274_v12 }
   0xa   : > { %v1121_v9 = vpack.c.bf16 (!%p165_p2), %v257_v7, %v256_v6  ;;  %v288_v10 = vld [vmem:[%s1699_s1 + $0x100] sm:$0xff] (!%p165_p2)  ;;  %v289_v11 = vld [vmem:[%s1699_s1 + $0x108] sm:$0xff] (!%p165_p2)  ;;  %1120 = vmatprep.subr.bf16.mxu0 (!%p165_p2), %v1119_v4  ;;  %v307_v16 = vld [vmem:[%s1699_s1 + $0x198] sm:$0xff] (!%p165_p2) }
   0xb   : > { %v1153_v13 = vpack.c.bf16 (!%p165_p2), %v289_v11, %v288_v10  ;;  %1152 = vmatprep.subr.bf16.mxu1 (!%p165_p2), %v1151_v8  ;;  %v1155_v18 = vpack.c.bf16 (!%p165_p2), %v307_v16, %v306_v15  ;;  %v258_v19 = vld [vmem:[%s1699_s1 + $0x10] sm:$0xff] (!%p165_p2)  ;;  %v259_v20 = vld [vmem:[%s1699_s1 + $0x18] sm:$0xff] (!%p165_p2)  ;;  %v276_v24 = vld [vmem:[%s1699_s1 + $0xa0] sm:$0xff] (!%p165_p2) }
   0xc   : > { %1122 = vmatpush3.bf16.msra.mxu0 (!%p165_p2), %v1121_v9  ;;  %v290_v21 = vld [vmem:[%s1699_s1 + $0x110] sm:$0xff] (!%p165_p2)  ;;  %v1125_v22 = vpack.c.bf16 (!%p165_p2), %v259_v20, %v258_v19  ;;  %v291_v23 = vld [vmem:[%s1699_s1 + $0x118] sm:$0xff] (!%p165_p2)  ;;  %v277_v25 = vld [vmem:[%s1699_s1 + $0xa8] sm:$0xff] (!%p165_p2) }
   0xd   : > { %1154 = vmatpush3.bf16.msra.mxu1 (!%p165_p2), %v1153_v13  ;;  %1124 = vmatprep.subr.bf16.mxu0 (!%p165_p2), %v1123_v17  ;;  %v1157_v26 = vpack.c.bf16 (!%p165_p2), %v291_v23, %v290_v21  ;;  %v1127_v27 = vpack.c.bf16 (!%p165_p2), %v277_v25, %v276_v24  ;;  %v308_v28 = vld [vmem:[%s1699_s1 + $0x1a0] sm:$0xff] (!%p165_p2)  ;;  %v309_v29 = vld [vmem:[%s1699_s1 + $0x1a8] sm:$0xff] (!%p165_p2)  ;;  %v278_v36 = vld [vmem:[%s1699_s1 + $0xb0] sm:$0xff] (!%p165_p2) }
   0xe   : > { %1156 = vmatprep.subr.bf16.mxu1 (!%p165_p2), %v1155_v18  ;;  %v260_v30 = vld [vmem:[%s1699_s1 + $0x20] sm:$0xff] (!%p165_p2)  ;;  %v1159_v31 = vpack.c.bf16 (!%p165_p2), %v309_v29, %v308_v28  ;;  %v261_v32 = vld [vmem:[%s1699_s1 + $0x28] sm:$0xff] (!%p165_p2)  ;;  %v279_v37 = vld [vmem:[%s1699_s1 + $0xb8] sm:$0xff] (!%p165_p2) }
   0xf   : > { %v292_v33 = vld [vmem:[%s1699_s1 + $0x120] sm:$0xff]  ;;  %v293_v34 = vld [vmem:[%s1699_s1 + $0x128] sm:$0xff]  ;;  %v1129_v35 = vpack.c.bf16 %v261_v32, %v260_v30  ;;  %v310_v38 = vld [vmem:[%s1699_s1 + $0x1b0] sm:$0xff]  ;;  %v1131_v40 = vpack.c.bf16 %v279_v37, %v278_v36  ;;  %s1705_s18 = smov (!%p1359_p3, %s899_s18), 1 }
  0x10   : > { %1126 = vmatpush3.bf16.msra.mxu0 %v1125_v22  ;;  %v1161_v39 = vpack.c.bf16 %v293_v34, %v292_v33  ;;  %v311_v41 = vld [vmem:[%s1699_s1 + $0x1b8] sm:$0xff]  ;;  %v262_v42 = vld [vmem:[%s1699_s1 + $0x30] sm:$0xff]  ;;  %v280_v47 = vld [vmem:[%s1699_s1 + $0xc0] sm:$0xff]  ;;  %s1239_s28 = smul.u32 448, %s1705_s18  ;;  %s918_s30 = sshll.u32 %s1705_s18, 4 }
  0x11   : > { %1158 = vmatpush3.bf16.msra.mxu1 %v1157_v26  ;;  %1128 = vmatprep.subr.bf16.mxu0 %v1127_v27  ;;  %v263_v43 = vld [vmem:[%s1699_s1 + $0x38] sm:$0xff]  ;;  %v1163_v44 = vpack.c.bf16 %v311_v41, %v310_v38  ;;  %v294_v45 = vld [vmem:[%s1699_s1 + $0x130] sm:$0xff]  ;;  %v281_v48 = vld [vmem:[%s1699_s1 + $0xc8] sm:$0xff]  ;;  %s199_s6 = scalar_lea.vmem %s1702_s4, %s918_s30 }
  0x12   : > { %1160 = vmatprep.subr.bf16.mxu1 %v1159_v31  ;;  %v295_v46 = vld [vmem:[%s1699_s1 + $0x138] sm:$0xff]  ;;  %v312_v49 = vld [vmem:[%s1699_s1 + $0x1c0] sm:$0xff]  ;;  %v313_v50 = vld [vmem:[%s1699_s1 + $0x1c8] sm:$0xff]  ;;  %v1133_v51 = vpack.c.bf16 %v263_v43, %v262_v42  ;;  %v1135_v53 = vpack.c.bf16 %v281_v48, %v280_v47  ;;  %s1460_s22 = scalar_lea.vmem %s1698_s0, %s1239_s28 }
  0x13   : > { %v1165_v52 = vpack.c.bf16 %v295_v46, %v294_v45  ;;  %v264_v54 = vld [vmem:[%s1699_s1 + $0x40] sm:$0xff]  ;;  %v265_v55 = vld [vmem:[%s1699_s1 + $0x48] sm:$0xff]  ;;  %v1167_v57 = vpack.c.bf16 %v313_v50, %v312_v49  ;;  %v282_v59 = vld [vmem:[%s1699_s1 + $0xd0] sm:$0xff] }
  0x14   : > { %1130 = vmatpush3.bf16.msra.mxu0 %v1129_v35  ;;  %v296_v56 = vld [vmem:[%s1699_s1 + $0x140] sm:$0xff]  ;;  %v297_v58 = vld [vmem:[%s1699_s1 + $0x148] sm:$0xff]  ;;  %v283_v60 = vld [vmem:[%s1699_s1 + $0xd8] sm:$0xff]  ;;  %v1137_v63 = vpack.c.bf16 %v265_v55, %v264_v54 }
  0x15   : > { %1162 = vmatpush3.bf16.msra.mxu1 %v1161_v39  ;;  %1132 = vmatprep.subr.bf16.mxu0 %v1131_v40  ;;  %v314_v61 = vld [vmem:[%s1699_s1 + $0x1d0] sm:$0xff]  ;;  %v315_v62 = vld [vmem:[%s1699_s1 + $0x1d8] sm:$0xff]  ;;  %v1169_v0 = vpack.c.bf16 %v297_v58, %v296_v56  ;;  %v1139_v1 = vpack.c.bf16 %v283_v60, %v282_v59  ;;  %v284_v7 = vld [vmem:[%s1699_s1 + $0xe0] sm:$0xff] }
  0x16   : > { %1164 = vmatprep.subr.bf16.mxu1 %v1163_v44  ;;  %v266_v2 = vld [vmem:[%s1699_s1 + $0x50] sm:$0xff]  ;;  %v267_v3 = vld [vmem:[%s1699_s1 + $0x58] sm:$0xff]  ;;  %v1171_v5 = vpack.c.bf16 %v315_v62, %v314_v61  ;;  %v285_v8 = vld [vmem:[%s1699_s1 + $0xe8] sm:$0xff] }
  0x17   : > { %v298_v4 = vld [vmem:[%s1699_s1 + $0x150] sm:$0xff]  ;;  %v299_v6 = vld [vmem:[%s1699_s1 + $0x158] sm:$0xff]  ;;  %v316_v9 = vld [vmem:[%s1699_s1 + $0x1e0] sm:$0xff]  ;;  %v1141_v11 = vpack.c.bf16 %v267_v3, %v266_v2  ;;  %v1143_v15 = vpack.c.bf16 %v285_v8, %v284_v7 }
  0x18   : > { %1134 = vmatpush3.bf16.msra.mxu0 %v1133_v51  ;;  %v317_v10 = vld [vmem:[%s1699_s1 + $0x1e8] sm:$0xff]  ;;  %v268_v12 = vld [vmem:[%s1699_s1 + $0x60] sm:$0xff]  ;;  %v1173_v14 = vpack.c.bf16 %v299_v6, %v298_v4  ;;  %v203_v18 = vld [vmem:[%s1460_s22 + $0x18] sm:$0xff] }
  0x19   : > { %1166 = vmatpush3.bf16.msra.mxu1 %v1165_v52  ;;  %1136 = vmatprep.subr.bf16.mxu0 %v1135_v53  ;;  %v269_v13 = vld [vmem:[%s1699_s1 + $0x68] sm:$0xff]  ;;  %v300_v16 = vld [vmem:[%s1699_s1 + $0x160] sm:$0xff]  ;;  %v1175_v19 = vpack.c.bf16 %v317_v10, %v316_v9  ;;  %v286_v21 = vld [vmem:[%s1699_s1 + $0xf0] sm:$0xff] }
  0x1a   : > { %1168 = vmatprep.subr.bf16.mxu1 %v1167_v57  ;;  %v201_v17 = vld [vmem:[%s1460_s22 + $0x8] sm:$0xff]  ;;  %v287_v22 = vld [vmem:[%s1699_s1 + $0xf8] sm:$0xff]  ;;  %v318_v23 = vld [vmem:[%s1699_s1 + $0x1f0] sm:$0xff]  ;;  %557 = vmatprep.mubr.f32.mxu1 %v203_v18  ;;  %v1145_v25 = vpack.c.bf16 %v269_v13, %v268_v12 }
  0x1b   : > { %v301_v20 = vld [vmem:[%s1699_s1 + $0x168] sm:$0xff]  ;;  %452 = vmatprep.mubr.f32.mxu0 %v201_v17  ;;  %v319_v24 = vld [vmem:[%s1699_s1 + $0x1f8] sm:$0xff]  ;;  %v1147_v27 = vpack.c.bf16 %v287_v22, %v286_v21  ;;  %v270_v28 = vld [vmem:[%s1699_s1 + $0x70] sm:$0xff] }
  0x1c   : > { %1138 = vmatpush3.bf16.msra.mxu0 %v1137_v63  ;;  %v1177_v26 = vpack.c.bf16 %v301_v20, %v300_v16  ;;  %v271_v29 = vld [vmem:[%s1699_s1 + $0x78] sm:$0xff]  ;;  %v302_v30 = vld [vmem:[%s1699_s1 + $0x170] sm:$0xff]  ;;  %v1179_v31 = vpack.c.bf16 %v319_v24, %v318_v23  ;;  %v336_v33 = vld [vmem:[%s1699_s1 + $0x280] sm:$0xff] }
  0x1d   : > { %1170 = vmatpush3.bf16.msra.mxu1 %v1169_v0  ;;  %1140 = vmatprep.subr.bf16.mxu0 %v1139_v1  ;;  %v303_v32 = vld [vmem:[%s1699_s1 + $0x178] sm:$0xff]  ;;  %v337_v34 = vld [vmem:[%s1699_s1 + $0x288] sm:$0xff]  ;;  %v1149_v35 = vpack.c.bf16 %v271_v29, %v270_v28  ;;  %v320_v38 = vld [vmem:[%s1699_s1 + $0x200] sm:$0xff] }
  0x1e   : > { %1172 = vmatprep.subr.bf16.mxu1 %v1171_v5  ;;  %v1181_v36 = vpack.c.bf16 %v303_v32, %v302_v30  ;;  %v1183_v37 = vpack.c.bf16 %v337_v34, %v336_v33  ;;  %v321_v39 = vld [vmem:[%s1699_s1 + $0x208] sm:$0xff]  ;;  %v338_v40 = vld [vmem:[%s1699_s1 + $0x290] sm:$0xff]  ;;  %v339_v41 = vld [vmem:[%s1699_s1 + $0x298] sm:$0xff] }
  0x1f   : > { %v200_v42 = vld [vmem:[%s1460_s22] sm:$0xff]  ;;  %v1185_v43 = vpack.c.bf16 %v321_v39, %v320_v38  ;;  %v202_v44 = vld [vmem:[%s1460_s22 + $0x10] sm:$0xff]  ;;  %v323_v46 = vld [vmem:[%s1699_s1 + $0x218] sm:$0xff]  ;;  %v1187_v48 = vpack.c.bf16 %v339_v41, %v338_v40 }
  0x20   : > { %1142 = vmatpush3.bf16.msra.mxu0 %v1141_v11  ;;  %v322_v45 = vld [vmem:[%s1699_s1 + $0x210] sm:$0xff]  ;;  %v208_v47 = vld [vmem:[%s1460_s22 + $0x40] sm:$0xff]  ;;  %v341_v51 = vld [vmem:[%s1699_s1 + $0x2a8] sm:$0xff] }
  0x21   : > { %1174 = vmatpush3.bf16.msra.mxu1 %v1173_v14  ;;  %1144 = vmatprep.subr.bf16.mxu0 %v1143_v15  ;;  %v210_v49 = vld [vmem:[%s1460_s22 + $0x50] sm:$0xff]  ;;  %v340_v50 = vld [vmem:[%s1699_s1 + $0x2a0] sm:$0xff]  ;;  %v207_v52 = vld [vmem:[%s1460_s22 + $0x38] sm:$0xff]  ;;  %v1189_v53 = vpack.c.bf16 %v323_v46, %v322_v45 }
  0x22   : > { %1176 = vmatprep.subr.bf16.mxu1 %v1175_v19  ;;  %v209_v54 = vld [vmem:[%s1460_s22 + $0x48] sm:$0xff]  ;;  %v324_v55 = vld [vmem:[%s1699_s1 + $0x220] sm:$0xff]  ;;  %v215_v57 = vld [vmem:[%s1460_s22 + $0x78] sm:$0xff]  ;;  %v1191_v58 = vpack.c.bf16 %v341_v51, %v340_v50 }
  0x23   : > { %v325_v56 = vld [vmem:[%s1699_s1 + $0x228] sm:$0xff]  ;;  %v342_v60 = vld [vmem:[%s1699_s1 + $0x2b0] sm:$0xff]  ;;  %v343_v61 = vld [vmem:[%s1699_s1 + $0x2b8] sm:$0xff] }
  0x24   : > { %1146 = vmatpush3.bf16.msra.mxu0 %v1145_v25  ;;  %v217_v59 = vld [vmem:[%s1460_s22 + $0x88] sm:$0xff]  ;;  %v214_v62 = vld [vmem:[%s1460_s22 + $0x70] sm:$0xff]  ;;  %v1193_v63 = vpack.c.bf16 %v325_v56, %v324_v55  ;;  %v216_v0 = vld [vmem:[%s1460_s22 + $0x80] sm:$0xff]  ;;  %v1195_v4 = vpack.c.bf16 %v343_v61, %v342_v60 }
  0x25   : > { %1178 = vmatpush3.bf16.msra.mxu1 %v1177_v26  ;;  %1148 = vmatprep.subr.bf16.mxu0 %v1147_v27  ;;  %v326_v1 = vld [vmem:[%s1699_s1 + $0x230] sm:$0xff]  ;;  %v327_v2 = vld [vmem:[%s1699_s1 + $0x238] sm:$0xff]  ;;  %v224_v5 = vld [vmem:[%s1460_s22 + $0xc0] sm:$0xff] }
  0x26   : > { %1180 = vmatprep.subr.bf16.mxu1 %v1179_v31  ;;  %v222_v3 = vld [vmem:[%s1460_s22 + $0xb0] sm:$0xff]  ;;  %v344_v6 = vld [vmem:[%s1699_s1 + $0x2c0] sm:$0xff]  ;;  %v345_v7 = vld [vmem:[%s1699_s1 + $0x2c8] sm:$0xff]  ;;  %v1197_v9 = vpack.c.bf16 %v327_v2, %v326_v1 }
  0x27   : > { %v221_v8 = vld [vmem:[%s1460_s22 + $0xa8] sm:$0xff]  ;;  %v223_v10 = vld [vmem:[%s1460_s22 + $0xb8] sm:$0xff]  ;;  %v328_v11 = vld [vmem:[%s1699_s1 + $0x240] sm:$0xff]  ;;  %v1199_v14 = vpack.c.bf16 %v345_v7, %v344_v6 }
  0x28   : > { %1150 = vmatpush3.bf16.msra.mxu0 %v1149_v35  ;;  %v329_v12 = vld [vmem:[%s1699_s1 + $0x248] sm:$0xff]  ;;  %v231_v15 = vld [vmem:[%s1460_s22 + $0xf8] sm:$0xff]  ;;  %v346_v16 = vld [vmem:[%s1699_s1 + $0x2d0] sm:$0xff] }
  0x29   : > { %1182 = vmatpush3.bf16.msra.mxu1 %v1181_v36  ;;  %1184 = vmatprep.subr.bf16.mxu0 %v1183_v37  ;;  %v229_v13 = vld [vmem:[%s1460_s22 + $0xe8] sm:$0xff]  ;;  %v347_v17 = vld [vmem:[%s1699_s1 + $0x2d8] sm:$0xff]  ;;  %v228_v18 = vld [vmem:[%s1460_s22 + $0xe0] sm:$0xff]  ;;  %v1201_v19 = vpack.c.bf16 %v329_v12, %v328_v11 }
  0x2a   : > { %1223 = vmatprep.subr.bf16.mxu1 %v1183_v37  ;;  %v230_v20 = vld [vmem:[%s1460_s22 + $0xf0] sm:$0xff]  ;;  %v331_v22 = vld [vmem:[%s1699_s1 + $0x258] sm:$0xff]  ;;  %v236_v23 = vld [vmem:[%s1460_s22 + $0x120] sm:$0xff]  ;;  %v1203_v24 = vpack.c.bf16 %v347_v17, %v346_v16 }
  0x2b   : > { %453 = vmatmul.mubr.f32.vlgmr.msra.gmra.mrb[0].mxu0 %v200_v42  ;;  %v330_v21 = vld [vmem:[%s1699_s1 + $0x250] sm:$0xff]  ;;  %v348_v26 = vld [vmem:[%s1699_s1 + $0x2e0] sm:$0xff]  ;;  %v349_v27 = vld [vmem:[%s1699_s1 + $0x2e8] sm:$0xff] }
  0x2c   : > { %558 = vmatmul.mubr.f32.vlgmr.msra.gmra.mrb[0].mxu1 %v202_v44  ;;  %1186 = vmatpush3.bf16.msra.mxu0 %v1185_v43  ;;  %v238_v25 = vld [vmem:[%s1460_s22 + $0x130] sm:$0xff]  ;;  %v235_v28 = vld [vmem:[%s1460_s22 + $0x118] sm:$0xff]  ;;  %v1205_v29 = vpack.c.bf16 %v331_v22, %v330_v21  ;;  %v808_v30 = vld [vmem:[#allocation2] sm:$0x1]  ;;  %v1207_v35 = vpack.c.bf16 %v349_v27, %v348_v26 }
  0x2d   : > { %1231 = vmatpush3.bf16.msra.mxu1 %v1185_v43  ;;  %457 = vmatprep.mubr.f32.mxu0 %v208_v47  ;;  %v237_v31 = vld [vmem:[%s1460_s22 + $0x128] sm:$0xff]  ;;  %v332_v32 = vld [vmem:[%s1699_s1 + $0x260] sm:$0xff]  ;;  %1240 = vpush %v808_v30  ;;  %v243_v34 = vld [vmem:[%s1460_s22 + $0x158] sm:$0xff] }
  0x2e   : > { %562 = vmatprep.mubr.f32.mxu1 %v210_v49  ;;  %1188 = vmatprep.subr.bf16.mxu0 %v1187_v48  ;;  %v333_v33 = vld [vmem:[%s1699_s1 + $0x268] sm:$0xff]  ;;  %v350_v37 = vld [vmem:[%s1699_s1 + $0x2f0] sm:$0xff]  ;;  %v351_v38 = vld [vmem:[%s1699_s1 + $0x2f8] sm:$0xff] }
  0x2f   : > { %458 = vmatmul.mubr.f32.gmra.mrb[2].mxu0 %v207_v52  ;;  %1224 = vmatprep.subr.bf16.mxu1 %v1187_v48  ;;  %v245_v36 = vld [vmem:[%s1460_s22 + $0x168] sm:$0xff]  ;;  %v242_v39 = vld [vmem:[%s1460_s22 + $0x150] sm:$0xff]  ;;  %v1209_v40 = vpack.c.bf16 %v333_v33, %v332_v32  ;;  %v244_v41 = vld [vmem:[%s1460_s22 + $0x160] sm:$0xff]  ;;  %v1211_v45 = vpack.c.bf16 %v351_v38, %v350_v37 }
  0x30   : > { %563 = vmatmul.mubr.f32.gmra.mrb[2].mxu1 %v209_v54  ;;  %1190 = vmatpush3.bf16.msra.mxu0 %v1189_v53  ;;  %v334_v42 = vld [vmem:[%s1699_s1 + $0x270] sm:$0xff]  ;;  %v335_v43 = vld [vmem:[%s1699_s1 + $0x278] sm:$0xff]  ;;  %v252_v46 = vld [vmem:[%s1460_s22 + $0x1a0] sm:$0xff] }
  0x31   : > { %1232 = vmatpush3.bf16.msra.mxu1 %v1189_v53  ;;  %462 = vmatprep.mubr.f32.mxu0 %v215_v57  ;;  %v250_v44 = vld [vmem:[%s1460_s22 + $0x190] sm:$0xff]  ;;  %v352_v47 = vld [vmem:[%s1699_s1 + $0x300] sm:$0xff]  ;;  %v353_v48 = vld [vmem:[%s1699_s1 + $0x308] sm:$0xff]  ;;  %v1213_v50 = vpack.c.bf16 %v335_v43, %v334_v42 }
  0x32   : > { %567 = vmatprep.mubr.f32.mxu1 %v217_v59  ;;  %1192 = vmatprep.subr.bf16.mxu0 %v1191_v58  ;;  %v249_v49 = vld [vmem:[%s1460_s22 + $0x188] sm:$0xff]  ;;  %v251_v51 = vld [vmem:[%s1460_s22 + $0x198] sm:$0xff]  ;;  %v1215_v53 = vpack.c.bf16 %v353_v48, %v352_v47  ;;  %v354_v55 = vld [vmem:[%s1699_s1 + $0x310] sm:$0xff] }
  0x33   : > { %463 = vmatmul.mubr.f32.gmra.mrb[4].mxu0 %v214_v62  ;;  %1225 = vmatprep.subr.bf16.mxu1 %v1191_v58  ;;  %v205_v52 = vld [vmem:[%s1460_s22 + $0x28] sm:$0xff]  ;;  %v247_v54 = vld [vmem:[%s1460_s22 + $0x178] sm:$0xff]  ;;  %v204_v57 = vld [vmem:[%s1460_s22 + $0x20] sm:$0xff] }
  0x34   : > { %568 = vmatmul.mubr.f32.gmra.mrb[4].mxu1 %v216_v0  ;;  %1194 = vmatpush3.bf16.msra.mxu0 %v1193_v63  ;;  %v355_v56 = vld [vmem:[%s1699_s1 + $0x318] sm:$0xff]  ;;  %v246_v58 = vld [vmem:[%s1460_s22 + $0x170] sm:$0xff]  ;;  %v212_v59 = vld [vmem:[%s1460_s22 + $0x60] sm:$0xff] }
  0x35   : > { %1233 = vmatpush3.bf16.msra.mxu1 %v1193_v63  ;;  %467 = vmatprep.mubr.f32.mxu0 %v222_v3  ;;  %v254_v60 = vld [vmem:[%s1460_s22 + $0x1b0] sm:$0xff]  ;;  %v1219_v61 = vpack.c.bf16 %v355_v56, %v354_v55  ;;  %v211_v62 = vld [vmem:[%s1460_s22 + $0x58] sm:$0xff]  ;;  %v253_v63 = vld [vmem:[%s1460_s22 + $0x1a8] sm:$0xff] }
  0x36   : > { %572 = vmatprep.mubr.f32.mxu1 %v224_v5  ;;  %1196 = vmatprep.subr.bf16.mxu0 %v1195_v4  ;;  %v219_v0 = vld [vmem:[%s1460_s22 + $0x98] sm:$0xff]  ;;  %v206_v1 = vld [vmem:[%s1460_s22 + $0x30] sm:$0xff]  ;;  %v213_v3 = vld [vmem:[%s1460_s22 + $0x68] sm:$0xff] }
  0x37   : > { %468 = vmatmul.mubr.f32.gmra.mrb[6].mxu0 %v221_v8  ;;  %1226 = vmatprep.subr.bf16.mxu1 %v1195_v4  ;;  %v218_v2 = vld [vmem:[%s1460_s22 + $0x90] sm:$0xff]  ;;  %v220_v5 = vld [vmem:[%s1460_s22 + $0xa0] sm:$0xff]  ;;  %v225_v6 = vld [vmem:[%s1460_s22 + $0xc8] sm:$0xff] }
  0x38   : > { %573 = vmatmul.mubr.f32.gmra.mrb[6].mxu1 %v223_v10  ;;  %1198 = vmatpush3.bf16.msra.mxu0 %v1197_v9  ;;  %v226_v4 = vld [vmem:[%s1460_s22 + $0xd0] sm:$0xff]  ;;  %v227_v7 = vld [vmem:[%s1460_s22 + $0xd8] sm:$0xff]  ;;  %v233_v8 = vld [vmem:[%s1460_s22 + $0x108] sm:$0xff] }
  0x39   : > { %1234 = vmatpush3.bf16.msra.mxu1 %v1197_v9  ;;  %472 = vmatprep.mubr.f32.mxu0 %v229_v13  ;;  %v234_v9 = vld [vmem:[%s1460_s22 + $0x110] sm:$0xff]  ;;  %v232_v10 = vld [vmem:[%s1460_s22 + $0x100] sm:$0xff]  ;;  %v241_v11 = vld [vmem:[%s1460_s22 + $0x148] sm:$0xff] }
  0x3a   : > { %577 = vmatprep.mubr.f32.mxu1 %v231_v15  ;;  %1200 = vmatprep.subr.bf16.mxu0 %v1199_v14  ;;  %v240_v12 = vld [vmem:[%s1460_s22 + $0x140] sm:$0xff]  ;;  %v255_v15 = vld [vmem:[%s1460_s22 + $0x1b8] sm:$0xff] }
  0x3b   : > { %473 = vmatmul.mubr.f32.gmra.mrb[8].mxu0 %v228_v18  ;;  %1227 = vmatprep.subr.bf16.mxu1 %v1199_v14  ;;  %v248_v13 = vld [vmem:[%s1460_s22 + $0x180] sm:$0xff]  ;;  %v239_v14 = vld [vmem:[%s1460_s22 + $0x138] sm:$0xff] }
  0x3c   : > { %578 = vmatmul.mubr.f32.gmra.mrb[8].mxu1 %v230_v20  ;;  %1202 = vmatpush3.bf16.msra.mxu0 %v1201_v19  ;;  %v907_v17 = vld [vmem:[%s1700_s2] ss:$0 sm:$0xff] }
  0x3d   : > { %1235 = vmatpush3.bf16.msra.mxu1 %v1201_v19  ;;  %477 = vmatprep.mubr.f32.mxu0 %v236_v23 }
  0x3e   : > { %582 = vmatprep.mubr.f32.mxu1 %v238_v25  ;;  %1204 = vmatprep.subr.bf16.mxu0 %v1203_v24 }
  0x3f   : > { %478 = vmatmul.mubr.f32.gmra.mrb[10].mxu0 %v235_v28  ;;  %1228 = vmatprep.subr.bf16.mxu1 %v1203_v24 }
  0x40   : > { %583 = vmatmul.mubr.f32.gmra.mrb[10].mxu1 %v237_v31  ;;  %1206 = vmatpush3.bf16.msra.mxu0 %v1205_v29 }
  0x41   : > { %1236 = vmatpush3.bf16.msra.mxu1 %v1205_v29  ;;  %482 = vmatprep.mubr.f32.mxu0 %v243_v34 }
  0x42   : > { %587 = vmatprep.mubr.f32.mxu1 %v245_v36  ;;  %1208 = vmatprep.subr.bf16.mxu0 %v1207_v35 }
  0x43   : > { %483 = vmatmul.mubr.f32.gmra.mrb[12].mxu0 %v242_v39  ;;  %1229 = vmatprep.subr.bf16.mxu1 %v1207_v35 }
  0x44   : > { %588 = vmatmul.mubr.f32.gmra.mrb[12].mxu1 %v244_v41  ;;  %1210 = vmatpush3.bf16.msra.mxu0 %v1209_v40 }
  0x45   : > { %1237 = vmatpush3.bf16.msra.mxu1 %v1209_v40  ;;  %487 = vmatprep.mubr.f32.mxu0 %v250_v44 }
  0x46   : > { %592 = vmatprep.mubr.f32.mxu1 %v252_v46  ;;  %1212 = vmatprep.subr.bf16.mxu0 %v1211_v45 }
  0x47   : > { %488 = vmatmul.mubr.f32.gmra.mrb[14].mxu0 %v249_v49  ;;  %1230 = vmatprep.subr.bf16.mxu1 %v1211_v45 }
  0x48   : > { %593 = vmatmul.mubr.f32.gmra.mrb[14].mxu1 %v251_v51  ;;  %1214 = vmatpush3.bf16.msra.mxu0 %v1213_v50 }
  0x49   : > { %1238 = vmatpush3.bf16.msra.mxu1 %v1213_v50  ;;  %662 = vmatprep.mubr.f32.mxu0 %v205_v52 }
  0x4a   : > { %692 = vmatprep.mubr.f32.mxu1 %v247_v54  ;;  %1216 = vmatprep.subr.bf16.mxu1 %v1215_v53 }
  0x4b   : > { %663 = vmatmul.mubr.f32.vlgmr.msra.gmra.mrb[16].mxu0 %v204_v57 }
  0x4c   : > { %693 = vmatmul.mubr.f32.vlgmr.msra.gmra.mrb[16].mxu1 %v246_v58  ;;  %667 = vmatprep.mubr.f32.mxu0 %v212_v59 }
  0x4d   : > { %1218 = vmatpush3.bf16.msra.mxu1 %v1215_v53  ;;  %697 = vmatprep.mubr.f32.mxu1 %v254_v60 }
  0x4e   : > { %1220 = vmatprep.subr.bf16.mxu1 %v1219_v61 }
  0x4f   : > { %668 = vmatmul.mubr.f32.gmra.mrb[18].mxu0 %v211_v62 }
  0x50   : > { %698 = vmatmul.mubr.f32.gmra.mrb[18].mxu1 %v253_v63  ;;  %672 = vmatprep.mubr.f32.mxu0 %v219_v0 }
  0x51   : > { %1222 = vmatpush3.bf16.msra.mxu1 %v1219_v61  ;;  %1107 = vmatprep.mubr.msk.f32.mxu1 %vm363_vm0, %v206_v1 }
  0x53   : > { %673 = vmatmul.mubr.f32.gmra.mrb[20].mxu0 %v218_v2 }
  0x54   : > { %1108 = vmatmul.mubr.msk.f32.vlgmr.msra.gmra.mrb[20].mxu1 %vm363_vm0, %v213_v3  ;;  %677 = vmatprep.mubr.f32.mxu0 %v226_v4 }
  0x55   : > { %1110 = vmatprep.mubr.msk.f32.mxu1 %vm363_vm0, %v220_v5 }
  0x57   : > { %678 = vmatmul.mubr.f32.gmra.mrb[22].mxu0 %v225_v6 }
  0x58   : > { %1111 = vmatmul.mubr.msk.f32.gmra.mrb[22].mxu1 %vm363_vm0, %v227_v7  ;;  %682 = vmatprep.mubr.f32.mxu0 %v233_v8 }
  0x59   : > { %1113 = vmatprep.mubr.msk.f32.mxu1 %vm363_vm0, %v234_v9 }
  0x5b   : > { %683 = vmatmul.mubr.f32.gmra.mrb[24].mxu0 %v232_v10 }
  0x5c   : > { %1114 = vmatmul.mubr.msk.f32.gmra.mrb[24].mxu1 %vm363_vm0, %v241_v11  ;;  %687 = vmatprep.mubr.f32.mxu0 %v240_v12 }
  0x5d   : > { %1116 = vmatprep.mubr.msk.f32.mxu1 %vm363_vm0, %v248_v13 }
  0x5e   : > { %s1241_s22 = spop %1240 }
  0x5f   : > { %688 = vmatmul.mubr.f32.gmra.mrb[26].mxu0 %v239_v14 }
  0x60   : > { %1117 = vmatmul.mubr.msk.f32.gmra.mrb[26].mxu1 %vm363_vm0, %v255_v15 }
  0xfe   : > { %v951_v16 = vpop.f32.mrb[0].mxu0 }
  0xff   : > { %v952_v18 = vpop.f32.mrb[1].mxu0  ;;  %v1007_v19 = vpop.f32.mrb[0].mxu1 }
 0x100   : > { %v953_v20 = vadd.f32 %v952_v18, %v951_v16  ;;  %v1008_v21 = vpop.f32.mrb[1].mxu1 }
 0x101   : > { %v1009_v22 = vadd.f32 %v1008_v21, %v1007_v19 }
 0x102   : > { %v455_v23 = vadd.f32 %v953_v20, %v907_v17  ;;  %v954_v24 = vpop.f32.mrb[2].mxu0 }
 0x103   : > { %v955_v25 = vpop.f32.mrb[3].mxu0  ;;  %v1010_v26 = vpop.f32.mrb[2].mxu1 }
 0x104   : > { %v560_v27 = vadd.f32 %v1009_v22, %v455_v23  ;;  %v956_v28 = vadd.f32 %v955_v25, %v954_v24  ;;  %v1011_v29 = vpop.f32.mrb[3].mxu1 }
 0x105   : > { %v1012_v30 = vadd.f32 %v1011_v29, %v1010_v26 }
 0x106   : > { %v460_v31 = vadd.f32 %v956_v28, %v907_v17  ;;  %v957_v32 = vpop.f32.mrb[4].mxu0 }
 0x107   : > { %v958_v33 = vpop.f32.mrb[5].mxu0  ;;  %v1013_v34 = vpop.f32.mrb[4].mxu1 }
 0x108   : > { %v565_v35 = vadd.f32 %v1012_v30, %v460_v31  ;;  %v959_v36 = vadd.f32 %v958_v33, %v957_v32  ;;  %v1014_v37 = vpop.f32.mrb[5].mxu1 }
 0x109   : > { %v1015_v38 = vadd.f32 %v1014_v37, %v1013_v34 }
 0x10a   : > { %v465_v39 = vadd.f32 %v959_v36, %v907_v17  ;;  %v960_v40 = vpop.f32.mrb[6].mxu0 }
 0x10b   : > { %v961_v41 = vpop.f32.mrb[7].mxu0  ;;  %v1016_v42 = vpop.f32.mrb[6].mxu1 }
 0x10c   : > { %v1679_v43 = vadd.f32 %v1015_v38, %v465_v39  ;;  %v962_v44 = vadd.f32 %v961_v41, %v960_v40  ;;  %v1017_v45 = vpop.f32.mrb[7].mxu1 }
 0x10d   : > { %v1018_v46 = vadd.f32 %v1017_v45, %v1016_v42  ;;  %v818_v42 = vstv %s1241_s22 }
 0x10e   : > { %v470_v47 = vadd.f32 %v962_v44, %v907_v17  ;;  %v963_v48 = vpop.f32.mrb[8].mxu0 }
 0x10f   : > { %v964_v49 = vpop.f32.mrb[9].mxu0  ;;  %v1019_v50 = vpop.f32.mrb[8].mxu1 }
 0x110   : > { %v1681_v51 = vadd.f32 %v1018_v46, %v470_v47  ;;  %v965_v52 = vadd.f32 %v964_v49, %v963_v48  ;;  %v1020_v53 = vpop.f32.mrb[9].mxu1 }
 0x111   : > { %v1021_v54 = vadd.f32 %v1020_v53, %v1019_v50 }
 0x112   : > { %v475_v55 = vadd.f32 %v965_v52, %v907_v17  ;;  %v966_v56 = vpop.f32.mrb[10].mxu0 }
 0x113   : > { %v967_v57 = vpop.f32.mrb[11].mxu0  ;;  %v1022_v58 = vpop.f32.mrb[10].mxu1 }
 0x114   : > { %v1683_v59 = vadd.f32 %v1021_v54, %v475_v55  ;;  %v968_v60 = vadd.f32 %v967_v57, %v966_v56  ;;  %v1023_v61 = vpop.f32.mrb[11].mxu1 }
 0x115   : > { %v1024_v62 = vadd.f32 %v1023_v61, %v1022_v58 }
 0x116   : > { %v480_v63 = vadd.f32 %v968_v60, %v907_v17  ;;  %v969_v0 = vpop.f32.mrb[12].mxu0 }
 0x117   : > { %v970_v1 = vpop.f32.mrb[13].mxu0  ;;  %v1025_v2 = vpop.f32.mrb[12].mxu1 }
 0x118   : > { %v1685_v3 = vadd.f32 %v1024_v62, %v480_v63  ;;  %v971_v4 = vadd.f32 %v970_v1, %v969_v0  ;;  %v1026_v5 = vpop.f32.mrb[13].mxu1 }
 0x119   : > { %v1027_v6 = vadd.f32 %v1026_v5, %v1025_v2 }
 0x11a   : > { %v485_v7 = vadd.f32 %v971_v4, %v907_v17  ;;  %v972_v8 = vpop.f32.mrb[14].mxu0 }
 0x11b   : > { %v973_v9 = vpop.f32.mrb[15].mxu0  ;;  %v1028_v10 = vpop.f32.mrb[14].mxu1 }
 0x11c   : > { %v590_v11 = vadd.f32 %v1027_v6, %v485_v7  ;;  %v974_v12 = vadd.f32 %v973_v9, %v972_v8  ;;  %v1029_v13 = vpop.f32.mrb[15].mxu1 }
 0x11d   : > { %v1030_v14 = vadd.f32 %v1029_v13, %v1028_v10 }
 0x11e   : > { %v490_v15 = vadd.f32 %v974_v12, %v907_v17  ;;  %v1063_v16 = vpop.f32.mrb[16].mxu0 }
 0x11f   : > { %v1081_v18 = vpop.f32.mrb[16].mxu1  ;;  %v1064_v19 = vpop.f32.mrb[17].mxu0 }
 0x120   : > { %v595_v20 = vadd.f32 %v1030_v14, %v490_v15  ;;  %v1065_v21 = vadd.f32 %v1064_v19, %v1063_v16  ;;  %v1082_v22 = vpop.f32.mrb[17].mxu1 }
 0x121   : > { %v1083_v23 = vadd.f32 %v1082_v22, %v1081_v18 }
 0x122   : > { %v1066_v24 = vpop.f32.mrb[18].mxu0  ;;  %v665_v25 = vadd.f32 %v1065_v21, %v560_v27 }
 0x123   : > { %v1084_v26 = vpop.f32.mrb[18].mxu1  ;;  %v1067_v28 = vpop.f32.mrb[19].mxu0  ;;  %v695_v29 = vadd.f32 %v1083_v23, %v590_v11 }
 0x124   : > { %v1068_v30 = vadd.f32 %v1067_v28, %v1066_v24  ;;  %v1085_v31 = vpop.f32.mrb[19].mxu1 }
 0x125   : > { %v1086_v32 = vadd.f32 %v1085_v31, %v1084_v26 }
 0x126   : > { %v1069_v33 = vpop.f32.mrb[20].mxu0  ;;  %v670_v34 = vadd.f32 %v1068_v30, %v565_v35 }
 0x127   : > { %v1109_v36 = vpop.f32.mrb[20].mxu1  ;;  %v1070_v37 = vpop.f32.mrb[21].mxu0  ;;  %v700_v17 = vadd.f32 %v1086_v32, %v595_v20 }
 0x128   : > { %v775_v38 = vadd.f32 %v1109_v36, %v670_v34  ;;  %v1071_v39 = vadd.f32 %v1070_v37, %v1069_v33  ;;  %v769_v40 = vpop.f32.mrb[21].mxu1 }
 0x129   : > { %v770_v41 = vadd.f32 %v769_v40, %v665_v25 }
 0x12a   : > { %v1072_v44 = vpop.f32.mrb[22].mxu0  ;;  %v675_v27 = vadd.f32 %v1071_v39, %v1679_v43  ;;  %v820_v53 = vmul.f32 %v818_v42, %v775_v38  ;;  %vm811_vm3 = vcmp.gt.f32.partialorder %v775_v38, 0.0 }
 0x12b   : > { %v1112_v45 = vpop.f32.mrb[22].mxu1  ;;  %v1073_v46 = vpop.f32.mrb[23].mxu0  ;;  %v819_v50 = vmul.f32 %v818_v42, %v770_v41  ;;  %vm810_vm1 = vcmp.gt.f32.partialorder %v770_v41, 0.0 }
 0x12c   : > { %v1074_v47 = vadd.f32 %v1073_v46, %v1072_v44  ;;  %v779_v48 = vpop.f32.mrb[23].mxu1  ;;  %v828_v2 = vsel %vm811_vm3, %v775_v38, %v820_v53 }
 0x12d   : > { %v780_v49 = vadd.f32 %v779_v48, %v675_v27  ;;  %v827_v43 = vsel %vm810_vm1, %v770_v41, %v819_v50 }
 0x12e   : > { %v680_v35 = vadd.f32 %v1074_v47, %v1681_v51  ;;  %v1075_v52 = vpop.f32.mrb[24].mxu0 }
 0x12f   : > { %vm812_vm2 = vcmp.gt.f32.partialorder %v780_v49, 0.0  ;;  %v821_v54 = vmul.f32 %v818_v42, %v780_v49  ;;  %v1076_v55 = vpop.f32.mrb[25].mxu0  ;;  %v1115_v56 = vpop.f32.mrb[24].mxu1 }
 0x130   : > { %v785_v57 = vadd.f32 %v1112_v45, %v680_v35  ;;  %v1077_v58 = vadd.f32 %v1076_v55, %v1075_v52  ;;  %v789_v60 = vpop.f32.mrb[25].mxu1 }
 0x131   : > { %v829_v61 = vsel %vm812_vm2, %v780_v49, %v821_v54 }
 0x132   : > { %vm813_vm4 = vcmp.gt.f32.partialorder %v785_v57, 0.0  ;;  %v822_v62 = vmul.f32 %v818_v42, %v785_v57  ;;  %v835_v63 = vmax.f32 %v827_v43, %v829_v61  ;;  %v685_v0 = vadd.f32 %v1077_v58, %v1683_v59  ;;  %v1078_v1 = vpop.f32.mrb[26].mxu0 }
 0x133   : > { %v1118_v51 = vpop.f32.mrb[26].mxu1  ;;  %v1079_v4 = vpop.f32.mrb[27].mxu0 }
 0x134   : > { %v830_v5 = vsel %vm813_vm4, %v785_v57, %v822_v62  ;;  %v790_v6 = vadd.f32 %v789_v60, %v685_v0  ;;  %v805_v7 = vadd.f32 %v1118_v51, %v700_v17  ;;  %v1080_v8 = vadd.f32 %v1079_v4, %v1078_v1  ;;  %v799_v9 = vpop.f32.mrb[27].mxu1 }
 0x135   : > { %v836_v10 = vmax.f32 %v828_v2, %v830_v5  ;;  %v800_v11 = vadd.f32 %v799_v9, %v695_v29 }
 0x136   : > { %vm814_vm5 = vcmp.gt.f32.partialorder %v790_v6, 0.0  ;;  %v823_v12 = vmul.f32 %v818_v42, %v790_v6  ;;  %v690_v13 = vadd.f32 %v1080_v8, %v1685_v3  ;;  %v826_v59 = vmul.f32 %v818_v42, %v805_v7 }
 0x137   : > { %vm816_vm6 = vcmp.gt.f32.partialorder %v800_v11, 0.0  ;;  %v825_v14 = vmul.f32 %v818_v42, %v800_v11  ;;  %vm817_vm7 = vcmp.gt.f32.partialorder %v805_v7, 0.0 }
 0x138   : > { %v831_v15 = vsel %vm814_vm5, %v790_v6, %v823_v12  ;;  %v795_v16 = vadd.f32 %v1115_v56, %v690_v13  ;;  %v834_v22 = vsel %vm817_vm7, %v805_v7, %v826_v59 }
 0x139   : > { %v833_v18 = vsel %vm816_vm6, %v800_v11, %v825_v14 }
 0x13a   : > { %v837_v19 = vmax.f32 %v831_v15, %v833_v18  ;;  %vm815_vm8 = vcmp.gt.f32.partialorder %v795_v16, 0.0  ;;  %v824_v20 = vmul.f32 %v818_v42, %v795_v16 }
 0x13c   : > { %v839_v21 = vmax.f32 %v835_v63, %v837_v19  ;;  %v832_v23 = vsel %vm815_vm8, %v795_v16, %v824_v20 }
 0x13d   : > { %v838_v3 = vmax.f32 %v832_v23, %v834_v22 }
 0x13e   : > { %842 = vst.msk [vmem:[%s199_s6] sm:$0xff] %vm841_vm9, %v839_v21 }
 0x13f   : > { %v840_v24 = vmax.f32 %v836_v10, %v838_v3 }
 0x141   : > { %843 = vst.msk [vmem:[%s199_s6 + $0x8] sm:$0xff] %vm841_vm9, %v840_v24 }
 0x142 PF: > { %s16_s17 = sadd.s32 1, %s1256_s17  }
 0x143   : > { %p13_p4 = scmp.ge.s32.totalorder %s16_s17, 4  }
 0x145   :  { %15 = sbr.rel (!%p13_p4) target bundleno = 3 (0x3), region = 66 }

// kernel: classification_net_forward.5
= control target key start
LH: loop header
LB: loop body
LE: loop exit
PB: predicated region body
PF: predicated region fallthrough
CT: control target
= control target key end

     0   :  { %s2705_s0 = inlined_call_operand.vmem [shape: f32[2,1024], index: 0, kind: input, shape index: {}]   ;;  %s2706_s1 = inlined_call_operand.vmem [shape: f32[1024,256], index: 1, kind: input, shape index: {}]   ;;  %s2707_s2 = inlined_call_operand.vmem [shape: f32[1,256], index: 2, kind: input, shape index: {}]   ;;  %s2708_s3 = inlined_call_operand.<no memory space> [shape: f32[1,1], index: 3, kind: input, shape index: {}]   ;;  %s2709_s4 = inlined_call_operand.vmem [shape: f32[256,256], index: 4, kind: input, shape index: {}]   ;;  %s2710_s5 = inlined_call_operand.vmem [shape: f32[1,256], index: 5, kind: input, shape index: {}]   ;;  %s2711_s7 = inlined_call_operand.vmem [shape: f32[256,2], index: 7, kind: input, shape index: {}]   ;;  %s2712_s8 = inlined_call_operand.vmem [shape: f32[1,2], index: 8, kind: input, shape index: {}]   ;;  %s2713_s10 = inlined_call_operand.vmem [shape: f32[2,10], index: 10, kind: input, shape index: {}]   ;;  %s2714_s11 = inlined_call_operand.vmem [shape: f32[1,10], index: 11, kind: input, shape index: {}]   ;;  %s2715_s12 = inlined_call_operand.hbm [shape: f32[2,10], index: 12, kind: output, shape index: {}]   ;;  %s2716_s6 = inlined_call_operand.<no memory space> [shape: f32[1,1], index: 6, kind: input, shape index: {}]   ;;  %s2717_s9 = inlined_call_operand.<no memory space> [shape: f32[1,1], index: 9, kind: input, shape index: {}]  }
   0x1   :  { %v17_v0 = vstv %s2708_s3  ;;  %v19_v1 = vstv %s2716_s6  ;;  %v21_v2 = vstv %s2717_s9 }
   0x2   :  { %18 = vst [vmem:[#allocation2] sm:$0x1] %v17_v0  ;;  %20 = vst [vmem:[#allocation3] sm:$0x1] %v19_v1 }
   0x3   :  { %22 = vst [vmem:[#allocation4] sm:$0x1] %v21_v2 }
   0x4   :  { %v115_v3 = vld [vmem:[%s2706_s1 + $0x208] sm:$0xff]  ;;  %v117_v4 = vld [vmem:[%s2706_s1 + $0x218] sm:$0xff]  ;;  %v114_v5 = vld [vmem:[%s2706_s1 + $0x200] sm:$0xff]  ;;  %v308_v29 = vlaneseq  ;;  %v1486_v30 = vmov 1983009808  }
   0x5   :  { %v1150_v6 = vpack.c.bf16 %v117_v4, %v115_v3  ;;  %v116_v7 = vld [vmem:[%s2706_s1 + $0x210] sm:$0xff]  ;;  %v119_v8 = vld [vmem:[%s2706_s1 + $0x228] sm:$0xff]  ;;  %v121_v9 = vld [vmem:[%s2706_s1 + $0x238] sm:$0xff]  ;;  %v322_v31 = vunpack.c.l.s4 %v1486_v30 }
   0x6   :  { %v1152_v10 = vpack.c.bf16 %v116_v7, %v114_v5  ;;  %v1154_v11 = vpack.c.bf16 %v121_v9, %v119_v8  ;;  %v118_v12 = vld [vmem:[%s2706_s1 + $0x220] sm:$0xff]  ;;  %v120_v13 = vld [vmem:[%s2706_s1 + $0x230] sm:$0xff]  ;;  %v123_v14 = vld [vmem:[%s2706_s1 + $0x248] sm:$0xff]  ;;  %v1630_v38 = vshrl.u32 %v308_v29, 7 }
   0x7   :  { %1151 = vmatprep.subr.bf16.mxu0 %v1150_v6  ;;  %v125_v15 = vld [vmem:[%s2706_s1 + $0x258] sm:$0xff]  ;;  %v1156_v16 = vpack.c.bf16 %v120_v13, %v118_v12  ;;  %v122_v18 = vld [vmem:[%s2706_s1 + $0x240] sm:$0xff]  ;;  %v124_v19 = vld [vmem:[%s2706_s1 + $0x250] sm:$0xff]  ;;  %v323_v39 = vunpack.c.0.s8 %v322_v31 }
   0x8   :  { %1153 = vmatpush1.bf16.msra.mxu0 %v1152_v10  ;;  %v1158_v17 = vpack.c.bf16 %v125_v15, %v123_v14  ;;  %v127_v20 = vld [vmem:[%s2706_s1 + $0x268] sm:$0xff]  ;;  %v129_v21 = vld [vmem:[%s2706_s1 + $0x278] sm:$0xff]  ;;  %v1160_v22 = vpack.c.bf16 %v124_v19, %v122_v18  ;;  %v126_v24 = vld [vmem:[%s2706_s1 + $0x260] sm:$0xff] }
   0x9   :  { %1155 = vmatprep.subr.bf16.mxu0 %v1154_v11  ;;  %v1162_v23 = vpack.c.bf16 %v129_v21, %v127_v20  ;;  %v128_v25 = vld [vmem:[%s2706_s1 + $0x270] sm:$0xff]  ;;  %v131_v26 = vld [vmem:[%s2706_s1 + $0x288] sm:$0xff]  ;;  %v133_v27 = vld [vmem:[%s2706_s1 + $0x298] sm:$0xff]  ;;  %v1645_v46 = vsub.s32 %v323_v39, %v1630_v38 }
   0xa   :  { %v1164_v28 = vpack.c.bf16 %v128_v25, %v126_v24  ;;  %v1166_v32 = vpack.c.bf16 %v133_v27, %v131_v26  ;;  %v130_v33 = vld [vmem:[%s2706_s1 + $0x280] sm:$0xff]  ;;  %v132_v34 = vld [vmem:[%s2706_s1 + $0x290] sm:$0xff]  ;;  %v135_v35 = vld [vmem:[%s2706_s1 + $0x2a8] sm:$0xff] }
   0xb   :  { %v137_v36 = vld [vmem:[%s2706_s1 + $0x2b8] sm:$0xff]  ;;  %v1168_v37 = vpack.c.bf16 %v132_v34, %v130_v33  ;;  %v134_v41 = vld [vmem:[%s2706_s1 + $0x2a0] sm:$0xff]  ;;  %v136_v42 = vld [vmem:[%s2706_s1 + $0x2b0] sm:$0xff] }
   0xc   :  { %1157 = vmatpush1.bf16.msra.mxu0 %v1156_v16  ;;  %v1170_v40 = vpack.c.bf16 %v137_v36, %v135_v35  ;;  %v139_v43 = vld [vmem:[%s2706_s1 + $0x2c8] sm:$0xff]  ;;  %v141_v44 = vld [vmem:[%s2706_s1 + $0x2d8] sm:$0xff]  ;;  %v1172_v45 = vpack.c.bf16 %v136_v42, %v134_v41  ;;  %v138_v48 = vld [vmem:[%s2706_s1 + $0x2c0] sm:$0xff] }
   0xd   :  { %1159 = vmatprep.subr.bf16.mxu0 %v1158_v17  ;;  %v1174_v47 = vpack.c.bf16 %v141_v44, %v139_v43  ;;  %v140_v49 = vld [vmem:[%s2706_s1 + $0x2d0] sm:$0xff]  ;;  %v1656_v50 = vld [vmem:[%s2705_s0] sm:$0xff]  ;;  %v143_v51 = vld [vmem:[%s2706_s1 + $0x2e8] sm:$0xff] }
   0xe   :  { %v145_v52 = vld [vmem:[%s2706_s1 + $0x2f8] sm:$0xff]  ;;  %v320_v53 = vcombine.high %v1656_v50, %v1656_v50  ;;  %v1176_v54 = vpack.c.bf16 %v140_v49, %v138_v48  ;;  %v142_v57 = vld [vmem:[%s2706_s1 + $0x2e0] sm:$0xff]  ;;  %v144_v58 = vld [vmem:[%s2706_s1 + $0x2f0] sm:$0xff] }
   0xf   :  { %v1178_v56 = vpack.c.bf16 %v145_v52, %v143_v51  ;;  %v147_v59 = vld [vmem:[%s2706_s1 + $0x308] sm:$0xff]  ;;  %v149_v60 = vld [vmem:[%s2706_s1 + $0x318] sm:$0xff]  ;;  %v1180_v62 = vpack.c.bf16 %v144_v58, %v142_v57  ;;  %v146_v0 = vld [vmem:[%s2706_s1 + $0x300] sm:$0xff] }
  0x10   :  { %1161 = vmatpush1.bf16.msra.mxu0 %v1160_v22  ;;  %v1667_v55 = vrot.slane %v320_v53, %v1645_v46  ;;  %v1182_v63 = vpack.c.bf16 %v149_v60, %v147_v59  ;;  %v148_v1 = vld [vmem:[%s2706_s1 + $0x310] sm:$0xff]  ;;  %v151_v2 = vld [vmem:[%s2706_s1 + $0x328] sm:$0xff]  ;;  %v153_v3 = vld [vmem:[%s2706_s1 + $0x338] sm:$0xff] }
  0x11   :  { %1163 = vmatprep.subr.bf16.mxu0 %v1162_v23  ;;  %v1184_v4 = vpack.c.bf16 %v148_v1, %v146_v0  ;;  %v1186_v5 = vpack.c.bf16 %v153_v3, %v151_v2  ;;  %v150_v6 = vld [vmem:[%s2706_s1 + $0x320] sm:$0xff]  ;;  %v152_v7 = vld [vmem:[%s2706_s1 + $0x330] sm:$0xff]  ;;  %v155_v8 = vld [vmem:[%s2706_s1 + $0x348] sm:$0xff] }
  0x12   :  { %v336_v61 = vcombine.high %v1667_v55, %v1667_v55  ;;  %v157_v9 = vld [vmem:[%s2706_s1 + $0x358] sm:$0xff]  ;;  %v1188_v10 = vpack.c.bf16 %v152_v7, %v150_v6  ;;  %v154_v12 = vld [vmem:[%s2706_s1 + $0x340] sm:$0xff]  ;;  %v156_v13 = vld [vmem:[%s2706_s1 + $0x350] sm:$0xff] }
  0x13   :  { %v1190_v11 = vpack.c.bf16 %v157_v9, %v155_v8  ;;  %v159_v14 = vld [vmem:[%s2706_s1 + $0x368] sm:$0xff]  ;;  %v161_v15 = vld [vmem:[%s2706_s1 + $0x378] sm:$0xff]  ;;  %v1192_v16 = vpack.c.bf16 %v156_v13, %v154_v12  ;;  %v158_v18 = vld [vmem:[%s2706_s1 + $0x360] sm:$0xff] }
  0x14   :  { %1165 = vmatpush1.bf16.msra.mxu0 %v1164_v28  ;;  %497 = vmatprep.mubr.f32.mxu0 %v336_v61  ;;  %v1194_v17 = vpack.c.bf16 %v161_v15, %v159_v14  ;;  %v160_v19 = vld [vmem:[%s2706_s1 + $0x370] sm:$0xff]  ;;  %v163_v20 = vld [vmem:[%s2706_s1 + $0x388] sm:$0xff]  ;;  %v165_v21 = vld [vmem:[%s2706_s1 + $0x398] sm:$0xff] }
  0x15   :  { %1167 = vmatprep.subr.bf16.mxu0 %v1166_v32  ;;  %v51_v22 = vld [vmem:[%s2706_s1 + $0x8] sm:$0xff]  ;;  %v53_v23 = vld [vmem:[%s2706_s1 + $0x18] sm:$0xff]  ;;  %v50_v25 = vld [vmem:[%s2706_s1] sm:$0xff]  ;;  %v1196_v26 = vpack.c.bf16 %v160_v19, %v158_v18  ;;  %v1198_v29 = vpack.c.bf16 %v165_v21, %v163_v20  ;;  %v1852_v19 = vrot.slane %v1656_v50, %v1645_v46 }
  0x16   :  { %v1086_v24 = vpack.c.bf16 %v53_v23, %v51_v22  ;;  %v162_v27 = vld [vmem:[%s2706_s1 + $0x380] sm:$0xff]  ;;  %v52_v28 = vld [vmem:[%s2706_s1 + $0x10] sm:$0xff]  ;;  %v55_v32 = vld [vmem:[%s2706_s1 + $0x28] sm:$0xff] }
  0x17   :  { %v164_v30 = vld [vmem:[%s2706_s1 + $0x390] sm:$0xff]  ;;  %v1088_v31 = vpack.c.bf16 %v52_v28, %v50_v25  ;;  %v57_v33 = vld [vmem:[%s2706_s1 + $0x38] sm:$0xff]  ;;  %v167_v34 = vld [vmem:[%s2706_s1 + $0x3a8] sm:$0xff]  ;;  %v335_v28 = vcombine.high %v1852_v19, %v1852_v19 }
  0x18   :  { %1169 = vmatpush1.bf16.msra.mxu0 %v1168_v37  ;;  %1087 = vmatprep.subr.bf16.mxu1 %v1086_v24  ;;  %v169_v35 = vld [vmem:[%s2706_s1 + $0x3b8] sm:$0xff]  ;;  %v1090_v36 = vpack.c.bf16 %v57_v33, %v55_v32  ;;  %v54_v37 = vld [vmem:[%s2706_s1 + $0x20] sm:$0xff]  ;;  %v56_v39 = vld [vmem:[%s2706_s1 + $0x30] sm:$0xff] }
  0x19   :  { %1171 = vmatprep.subr.bf16.mxu0 %v1170_v40  ;;  %1089 = vmatpush1.bf16.msra.mxu1 %v1088_v31  ;;  %v1200_v40 = vpack.c.bf16 %v164_v30, %v162_v27  ;;  %v166_v41 = vld [vmem:[%s2706_s1 + $0x3a0] sm:$0xff]  ;;  %v1092_v42 = vpack.c.bf16 %v56_v39, %v54_v37  ;;  %v59_v43 = vld [vmem:[%s2706_s1 + $0x48] sm:$0xff]  ;;  %v61_v44 = vld [vmem:[%s2706_s1 + $0x58] sm:$0xff] }
  0x1a   :  { %1091 = vmatprep.subr.bf16.mxu1 %v1090_v36  ;;  %v1094_v48 = vpack.c.bf16 %v61_v44, %v59_v43  ;;  %v58_v49 = vld [vmem:[%s2706_s1 + $0x40] sm:$0xff]  ;;  %v60_v51 = vld [vmem:[%s2706_s1 + $0x50] sm:$0xff]  ;;  %v171_v52 = vld [vmem:[%s2706_s1 + $0x3c8] sm:$0xff]  ;;  %426 = vmatprep.mubr.f32.mxu1 %v335_v28 }
  0x1b   :  { %v173_v53 = vld [vmem:[%s2706_s1 + $0x3d8] sm:$0xff]  ;;  %v170_v59 = vld [vmem:[%s2706_s1 + $0x3c0] sm:$0xff]  ;;  %v172_v0 = vld [vmem:[%s2706_s1 + $0x3d0] sm:$0xff] }
  0x1c   :  { %1173 = vmatpush1.bf16.msra.mxu0 %v1172_v45  ;;  %v1202_v45 = vpack.c.bf16 %v169_v35, %v167_v34  ;;  %v65_v57 = vld [vmem:[%s2706_s1 + $0x78] sm:$0xff]  ;;  %v62_v61 = vld [vmem:[%s2706_s1 + $0x60] sm:$0xff]  ;;  %v67_v1 = vld [vmem:[%s2706_s1 + $0x88] sm:$0xff]  ;;  %v1208_v7 = vpack.c.bf16 %v172_v0, %v170_v59 }
  0x1d   :  { %1175 = vmatprep.subr.bf16.mxu0 %v1174_v47  ;;  %v168_v47 = vld [vmem:[%s2706_s1 + $0x3b0] sm:$0xff]  ;;  %1093 = vmatpush1.bf16.msra.mxu1 %v1092_v42  ;;  %v69_v2 = vld [vmem:[%s2706_s1 + $0x98] sm:$0xff]  ;;  %v175_v3 = vld [vmem:[%s2706_s1 + $0x3e8] sm:$0xff] }
  0x1e   :  { %v1204_v58 = vpack.c.bf16 %v168_v47, %v166_v41  ;;  %1095 = vmatprep.subr.bf16.mxu1 %v1094_v48  ;;  %v176_v8 = vld [vmem:[%s2706_s1 + $0x3f0] sm:$0xff]  ;;  %v1102_v9 = vpack.c.bf16 %v69_v2, %v67_v1  ;;  %v1836_v13 = vld [vmem:[%s2705_s0 + $0x8] sm:$0xff]  ;;  %v73_v15 = vld [vmem:[%s2706_s1 + $0xb8] sm:$0xff] }
  0x1f   :  { %v71_v14 = vld [vmem:[%s2706_s1 + $0xa8] sm:$0xff]  ;;  %v1856_v21 = vrot.slane %v1836_v13, %v1645_v46  ;;  %v70_v23 = vld [vmem:[%s2706_s1 + $0xa0] sm:$0xff]  ;;  %v72_v24 = vld [vmem:[%s2706_s1 + $0xb0] sm:$0xff] }
  0x20   :  { %1177 = vmatpush1.bf16.msra.mxu0 %v1176_v54  ;;  %v63_v54 = vld [vmem:[%s2706_s1 + $0x68] sm:$0xff]  ;;  %v1106_v22 = vpack.c.bf16 %v73_v15, %v71_v14  ;;  %v178_v50 = vld [vmem:[%s2706_s1 + $0x400] sm:$0xff]  ;;  %v77_v31 = vld [vmem:[%s2706_s1 + $0xd8] sm:$0xff]  ;;  %v1108_v32 = vpack.c.bf16 %v72_v24, %v70_v23 }
  0x21   :  { %1179 = vmatprep.subr.bf16.mxu0 %v1178_v56  ;;  %v1096_v56 = vpack.c.bf16 %v60_v51, %v58_v49  ;;  %v1098_v60 = vpack.c.bf16 %v65_v57, %v63_v54  ;;  %v183_v27 = vld [vmem:[%s2706_s1 + $0x428] sm:$0xff]  ;;  %v182_v34 = vld [vmem:[%s2706_s1 + $0x420] sm:$0xff]  ;;  %v352_v35 = vcombine.high %v1856_v21, %v1856_v21  ;;  %v76_v37 = vld [vmem:[%s2706_s1 + $0xd0] sm:$0xff] }
  0x22   :  { %v75_v30 = vld [vmem:[%s2706_s1 + $0xc8] sm:$0xff]  ;;  %v74_v36 = vld [vmem:[%s2706_s1 + $0xc0] sm:$0xff]  ;;  %v81_v43 = vld [vmem:[%s2706_s1 + $0xf8] sm:$0xff] }
  0x23   :  { %1097 = vmatpush1.bf16.msra.mxu1 %v1096_v56  ;;  %v1110_v41 = vpack.c.bf16 %v77_v31, %v75_v30  ;;  %v79_v42 = vld [vmem:[%s2706_s1 + $0xe8] sm:$0xff]  ;;  %v1112_v47 = vpack.c.bf16 %v76_v37, %v74_v36  ;;  %v186_v49 = vld [vmem:[%s2706_s1 + $0x440] sm:$0xff]  ;;  %v188_v54 = vld [vmem:[%s2706_s1 + $0x450] sm:$0xff] }
  0x24   :  { %1181 = vmatpush1.bf16.msra.mxu0 %v1180_v62  ;;  %v64_v62 = vld [vmem:[%s2706_s1 + $0x70] sm:$0xff]  ;;  %1099 = vmatprep.subr.bf16.mxu1 %v1098_v60  ;;  %v187_v44 = vld [vmem:[%s2706_s1 + $0x448] sm:$0xff]  ;;  %v1114_v51 = vpack.c.bf16 %v81_v43, %v79_v42  ;;  %v85_v57 = vld [vmem:[%s2706_s1 + $0x118] sm:$0xff] }
  0x25   :  { %1183 = vmatprep.subr.bf16.mxu0 %v1182_v63  ;;  %v1206_v63 = vpack.c.bf16 %v173_v53, %v171_v52  ;;  %v1100_v6 = vpack.c.bf16 %v64_v62, %v62_v61  ;;  %v78_v52 = vld [vmem:[%s2706_s1 + $0xe0] sm:$0xff]  ;;  %v80_v53 = vld [vmem:[%s2706_s1 + $0xf0] sm:$0xff]  ;;  %v83_v56 = vld [vmem:[%s2706_s1 + $0x108] sm:$0xff]  ;;  %v1224_v61 = vpack.c.bf16 %v188_v54, %v186_v49 }
  0x26   :  { %v193_v59 = vld [vmem:[%s2706_s1 + $0x478] sm:$0xff]  ;;  %v1116_v60 = vpack.c.bf16 %v80_v53, %v78_v52  ;;  %v190_v62 = vld [vmem:[%s2706_s1 + $0x460] sm:$0xff]  ;;  %v84_v1 = vld [vmem:[%s2706_s1 + $0x110] sm:$0xff] }
  0x27   :  { %1101 = vmatpush1.bf16.msra.mxu1 %v1100_v6  ;;  %v82_v0 = vld [vmem:[%s2706_s1 + $0x100] sm:$0xff]  ;;  %v195_v6 = vld [vmem:[%s2706_s1 + $0x488] sm:$0xff]  ;;  %v88_v14 = vld [vmem:[%s2706_s1 + $0x130] sm:$0xff] }
  0x28   :  { %1185 = vmatpush1.bf16.msra.mxu0 %v1184_v4  ;;  %v177_v4 = vld [vmem:[%s2706_s1 + $0x3f8] sm:$0xff]  ;;  %1103 = vmatprep.subr.bf16.mxu1 %v1102_v9  ;;  %v95_v30 = vld [vmem:[%s2706_s1 + $0x168] sm:$0xff]  ;;  %v202_v36 = vld [vmem:[%s2706_s1 + $0x4c0] sm:$0xff] }
  0x29   :  { %1187 = vmatprep.subr.bf16.mxu0 %v1186_v5  ;;  %v174_v5 = vld [vmem:[%s2706_s1 + $0x3e0] sm:$0xff]  ;;  %v1210_v12 = vpack.c.bf16 %v177_v4, %v175_v3  ;;  %v192_v3 = vld [vmem:[%s2706_s1 + $0x470] sm:$0xff]  ;;  %v87_v4 = vld [vmem:[%s2706_s1 + $0x128] sm:$0xff] }
  0x2a   :  { %v1212_v20 = vpack.c.bf16 %v176_v8, %v174_v5  ;;  %v89_v5 = vld [vmem:[%s2706_s1 + $0x138] sm:$0xff]  ;;  %v1120_v8 = vpack.c.bf16 %v84_v1, %v82_v0  ;;  %v1228_v9 = vpack.c.bf16 %v192_v3, %v190_v62  ;;  %v204_v42 = vld [vmem:[%s2706_s1 + $0x4d0] sm:$0xff]  ;;  %v99_v43 = vld [vmem:[%s2706_s1 + $0x188] sm:$0xff] }
  0x2b   :  { %v97_v31 = vld [vmem:[%s2706_s1 + $0x178] sm:$0xff]  ;;  %v98_v53 = vld [vmem:[%s2706_s1 + $0x180] sm:$0xff]  ;;  %v104_v3 = vld [vmem:[%s2706_s1 + $0x1b0] sm:$0xff] }
  0x2c   :  { %1189 = vmatpush1.bf16.msra.mxu0 %v1188_v10  ;;  %v66_v10 = vld [vmem:[%s2706_s1 + $0x80] sm:$0xff]  ;;  %v1130_v37 = vpack.c.bf16 %v97_v31, %v95_v30  ;;  %v220_v31 = vld [vmem:[%s2706_s1 + $0x550] sm:$0xff] }
  0x2d   :  { %1191 = vmatprep.subr.bf16.mxu0 %v1190_v11  ;;  %v68_v11 = vld [vmem:[%s2706_s1 + $0x90] sm:$0xff]  ;;  %v648_v54 = vld [vmem:[#allocation2] sm:$0x1] }
  0x2e   :  { %v1104_v18 = vpack.c.bf16 %v68_v11, %v66_v10  ;;  %v194_v10 = vld [vmem:[%s2706_s1 + $0x480] sm:$0xff]  ;;  %v1122_v11 = vpack.c.bf16 %v89_v5, %v87_v4  ;;  %1446 = vpush %v648_v54  ;;  %v212_v5 = vld [vmem:[%s2706_s1 + $0x510] sm:$0xff] }
  0x2f   :  { %v210_v0 = vld [vmem:[%s2706_s1 + $0x500] sm:$0xff] }
  0x30   :  { %1193 = vmatpush1.bf16.msra.mxu0 %v1192_v16  ;;  %v179_v16 = vld [vmem:[%s2706_s1 + $0x408] sm:$0xff]  ;;  %1105 = vmatpush1.bf16.msra.mxu1 %v1104_v18  ;;  %v93_v18 = vld [vmem:[%s2706_s1 + $0x158] sm:$0xff] }
  0x31   :  { %1195 = vmatprep.subr.bf16.mxu0 %v1194_v17  ;;  %v181_v17 = vld [vmem:[%s2706_s1 + $0x418] sm:$0xff]  ;;  %1107 = vmatprep.subr.bf16.mxu1 %v1106_v22 }
  0x32   :  { %v1214_v25 = vpack.c.bf16 %v181_v17, %v179_v16  ;;  %v196_v16 = vld [vmem:[%s2706_s1 + $0x490] sm:$0xff]  ;;  %v91_v17 = vld [vmem:[%s2706_s1 + $0x148] sm:$0xff]  ;;  %v201_v22 = vld [vmem:[%s2706_s1 + $0x4b8] sm:$0xff] }
  0x33   :  { %v1232_v24 = vpack.c.bf16 %v196_v16, %v194_v10  ;;  %v108_v16 = vld [vmem:[%s2706_s1 + $0x1d0] sm:$0xff] }
  0x34   :  { %1197 = vmatpush1.bf16.msra.mxu0 %v1196_v26  ;;  %v180_v26 = vld [vmem:[%s2706_s1 + $0x410] sm:$0xff]  ;;  %1109 = vmatpush1.bf16.msra.mxu1 %v1108_v32  ;;  %v203_v32 = vld [vmem:[%s2706_s1 + $0x4c8] sm:$0xff] }
  0x35   :  { %1199 = vmatprep.subr.bf16.mxu0 %v1198_v29  ;;  %v185_v29 = vld [vmem:[%s2706_s1 + $0x438] sm:$0xff]  ;;  %v1216_v33 = vpack.c.bf16 %v180_v26, %v178_v50  ;;  %1111 = vmatprep.subr.bf16.mxu1 %v1110_v41  ;;  %v1126_v50 = vpack.c.bf16 %v93_v18, %v91_v17  ;;  %v90_v26 = vld [vmem:[%s2706_s1 + $0x140] sm:$0xff]  ;;  %v216_v18 = vld [vmem:[%s2706_s1 + $0x530] sm:$0xff] }
  0x36   :  { %v1218_v39 = vpack.c.bf16 %v185_v29, %v183_v27  ;;  %v92_v27 = vld [vmem:[%s2706_s1 + $0x150] sm:$0xff] }
  0x37   :  { %v200_v29 = vld [vmem:[%s2706_s1 + $0x4b0] sm:$0xff] }
  0x38   :  { %1201 = vmatpush1.bf16.msra.mxu0 %v1200_v40  ;;  %v184_v40 = vld [vmem:[%s2706_s1 + $0x430] sm:$0xff]  ;;  %1113 = vmatpush1.bf16.msra.mxu1 %v1112_v47  ;;  %v209_v47 = vld [vmem:[%s2706_s1 + $0x4f8] sm:$0xff] }
  0x39   :  { %1203 = vmatprep.subr.bf16.mxu0 %v1202_v45  ;;  %v189_v45 = vld [vmem:[%s2706_s1 + $0x458] sm:$0xff]  ;;  %v1220_v48 = vpack.c.bf16 %v184_v40, %v182_v34  ;;  %1115 = vmatprep.subr.bf16.mxu1 %v1114_v51  ;;  %v1128_v34 = vpack.c.bf16 %v92_v27, %v90_v26  ;;  %v96_v40 = vld [vmem:[%s2706_s1 + $0x170] sm:$0xff]  ;;  %v1240_v51 = vpack.c.bf16 %v204_v42, %v202_v36  ;;  %v218_v26 = vld [vmem:[%s2706_s1 + $0x540] sm:$0xff] }
  0x3a   :  { %v222_v36 = vld [vmem:[%s2706_s1 + $0x560] sm:$0xff]  ;;  %v657_v42 = vld [vmem:[%s2709_s4 + $0x10] sm:$0xff] }
  0x3c   :  { %1205 = vmatpush1.bf16.msra.mxu0 %v1204_v58  ;;  %v191_v58 = vld [vmem:[%s2706_s1 + $0x468] sm:$0xff]  ;;  %1117 = vmatpush1.bf16.msra.mxu1 %v1116_v60 }
  0x3d   :  { %1207 = vmatprep.subr.bf16.mxu0 %v1206_v63  ;;  %v1118_v63 = vpack.c.bf16 %v85_v57, %v83_v56  ;;  %v1226_v2 = vpack.c.bf16 %v193_v59, %v191_v58  ;;  %v208_v57 = vld [vmem:[%s2706_s1 + $0x4f0] sm:$0xff]  ;;  %v103_v58 = vld [vmem:[%s2706_s1 + $0x1a8] sm:$0xff]  ;;  %v105_v59 = vld [vmem:[%s2706_s1 + $0x1b8] sm:$0xff] }
  0x3e   :  { %v211_v60 = vld [vmem:[%s2706_s1 + $0x508] sm:$0xff]  ;;  %v1138_v1 = vpack.c.bf16 %v105_v59, %v103_v58 }
  0x3f   :  { %1119 = vmatprep.subr.bf16.mxu1 %v1118_v63 }
  0x40   :  { %1209 = vmatpush1.bf16.msra.mxu0 %v1208_v7  ;;  %v197_v7 = vld [vmem:[%s2706_s1 + $0x498] sm:$0xff]  ;;  %1121 = vmatpush1.bf16.msra.mxu1 %v1120_v8  ;;  %v215_v8 = vld [vmem:[%s2706_s1 + $0x528] sm:$0xff] }
  0x41   :  { %1211 = vmatprep.subr.bf16.mxu0 %v1210_v12  ;;  %v86_v12 = vld [vmem:[%s2706_s1 + $0x120] sm:$0xff]  ;;  %v1230_v15 = vpack.c.bf16 %v197_v7, %v195_v6  ;;  %1123 = vmatprep.subr.bf16.mxu1 %v1122_v11  ;;  %v107_v6 = vld [vmem:[%s2706_s1 + $0x1c8] sm:$0xff]  ;;  %v109_v7 = vld [vmem:[%s2706_s1 + $0x1d8] sm:$0xff]  ;;  %v1248_v11 = vpack.c.bf16 %v212_v5, %v210_v0 }
  0x42   :  { %v1124_v23 = vpack.c.bf16 %v88_v14, %v86_v12  ;;  %v214_v12 = vld [vmem:[%s2706_s1 + $0x520] sm:$0xff]  ;;  %v1142_v14 = vpack.c.bf16 %v109_v7, %v107_v6 }
  0x44   :  { %1213 = vmatpush1.bf16.msra.mxu0 %v1212_v20  ;;  %v199_v20 = vld [vmem:[%s2706_s1 + $0x4a8] sm:$0xff]  ;;  %1125 = vmatpush1.bf16.msra.mxu1 %v1124_v23 }
  0x45   :  { %1215 = vmatprep.subr.bf16.mxu0 %v1214_v25  ;;  %v198_v25 = vld [vmem:[%s2706_s1 + $0x4a0] sm:$0xff]  ;;  %v1234_v28 = vpack.c.bf16 %v201_v22, %v199_v20  ;;  %1127 = vmatprep.subr.bf16.mxu1 %v1126_v50  ;;  %v111_v20 = vld [vmem:[%s2706_s1 + $0x1e8] sm:$0xff]  ;;  %v113_v22 = vld [vmem:[%s2706_s1 + $0x1f8] sm:$0xff]  ;;  %v1252_v50 = vpack.c.bf16 %v216_v18, %v214_v12 }
  0x46   :  { %v219_v23 = vld [vmem:[%s2706_s1 + $0x548] sm:$0xff]  ;;  %v1146_v27 = vpack.c.bf16 %v113_v22, %v111_v20 }
  0x47   :  { %498 = vmatmul.mubr.f32.vlgmr.msra.gmra.mrb[0].mxu0 %v1667_v55  ;;  %v1222_v55 = vpack.c.bf16 %v189_v45, %v187_v44  ;;  %v101_v44 = vld [vmem:[%s2706_s1 + $0x198] sm:$0xff]  ;;  %v207_v45 = vld [vmem:[%s2706_s1 + $0x4e8] sm:$0xff] }
  0x48   :  { %1217 = vmatpush1.bf16.msra.mxu0 %v1216_v33  ;;  %568 = vmatprep.mubr.f32.mxu0 %v352_v35  ;;  %v205_v33 = vld [vmem:[%s2706_s1 + $0x4d8] sm:$0xff]  ;;  %v1236_v35 = vpack.c.bf16 %v200_v29, %v198_v25  ;;  %v1134_v52 = vpack.c.bf16 %v101_v44, %v99_v43  ;;  %v1242_v56 = vpack.c.bf16 %v209_v47, %v207_v45  ;;  %v112_v29 = vld [vmem:[%s2706_s1 + $0x1f0] sm:$0xff] }
  0x49   :  { %1219 = vmatprep.subr.bf16.mxu0 %v1218_v39  ;;  %v94_v39 = vld [vmem:[%s2706_s1 + $0x160] sm:$0xff]  ;;  %v1238_v41 = vpack.c.bf16 %v205_v33, %v203_v32  ;;  %1129 = vmatpush1.bf16.msra.mxu1 %v1128_v34  ;;  %v656_v32 = vld [vmem:[%s2709_s4 + $0x8] sm:$0xff]  ;;  %v658_v33 = vld [vmem:[%s2709_s4 + $0x18] sm:$0xff] }
  0x4a   :  { %v1132_v49 = vpack.c.bf16 %v96_v40, %v94_v39  ;;  %1131 = vmatprep.subr.bf16.mxu1 %v1130_v37  ;;  %v223_v34 = vld [vmem:[%s2706_s1 + $0x568] sm:$0xff]  ;;  %v1256_v39 = vpack.c.bf16 %v220_v31, %v218_v26  ;;  %v1342_v40 = vpack.c.bf16 %v658_v33, %v656_v32 }
  0x4c   :  { %1221 = vmatpush1.bf16.msra.mxu0 %v1220_v48  ;;  %v206_v48 = vld [vmem:[%s2706_s1 + $0x4e0] sm:$0xff] }
  0x4d   :  { %1223 = vmatprep.subr.bf16.mxu0 %v1222_v55  ;;  %v100_v55 = vld [vmem:[%s2706_s1 + $0x190] sm:$0xff]  ;;  %1133 = vmatpush1.bf16.msra.mxu1 %v1132_v49  ;;  %v1244_v63 = vpack.c.bf16 %v208_v57, %v206_v48 }
  0x4e   :  { %v1136_v62 = vpack.c.bf16 %v100_v55, %v98_v53  ;;  %1135 = vmatprep.subr.bf16.mxu1 %v1134_v52 }
  0x50   :  { %1225 = vmatpush1.bf16.msra.mxu0 %v1224_v61  ;;  %v213_v61 = vld [vmem:[%s2706_s1 + $0x518] sm:$0xff] }
  0x51   :  { %1227 = vmatprep.subr.bf16.mxu0 %v1226_v2  ;;  %v102_v2 = vld [vmem:[%s2706_s1 + $0x1a0] sm:$0xff]  ;;  %v1246_v4 = vpack.c.bf16 %v213_v61, %v211_v60  ;;  %1137 = vmatpush1.bf16.msra.mxu1 %v1136_v62 }
  0x52   :  { %v1140_v10 = vpack.c.bf16 %v104_v3, %v102_v2  ;;  %1139 = vmatprep.subr.bf16.mxu1 %v1138_v1 }
  0x54   :  { %1229 = vmatpush1.bf16.msra.mxu0 %v1228_v9  ;;  %v217_v9 = vld [vmem:[%s2706_s1 + $0x538] sm:$0xff] }
  0x55   :  { %1231 = vmatprep.subr.bf16.mxu0 %v1230_v15  ;;  %v106_v15 = vld [vmem:[%s2706_s1 + $0x1c0] sm:$0xff]  ;;  %v1250_v17 = vpack.c.bf16 %v217_v9, %v215_v8  ;;  %1141 = vmatpush1.bf16.msra.mxu1 %v1140_v10 }
  0x56   :  { %v1144_v25 = vpack.c.bf16 %v108_v16, %v106_v15  ;;  %1143 = vmatprep.subr.bf16.mxu1 %v1142_v14 }
  0x58   :  { %1233 = vmatpush1.bf16.msra.mxu0 %v1232_v24  ;;  %v221_v24 = vld [vmem:[%s2706_s1 + $0x558] sm:$0xff] }
  0x59   :  { %1235 = vmatprep.subr.bf16.mxu0 %v1234_v28  ;;  %v110_v28 = vld [vmem:[%s2706_s1 + $0x1e0] sm:$0xff]  ;;  %v1254_v30 = vpack.c.bf16 %v221_v24, %v219_v23  ;;  %1145 = vmatpush1.bf16.msra.mxu1 %v1144_v25 }
  0x5a   :  { %v1148_v37 = vpack.c.bf16 %v112_v29, %v110_v28  ;;  %1147 = vmatprep.subr.bf16.mxu1 %v1146_v27 }
  0x5c   :  { %1237 = vmatpush1.bf16.msra.mxu0 %v1236_v35  ;;  %v225_v35 = vld [vmem:[%s2706_s1 + $0x578] sm:$0xff] }
  0x5d   :  { %1239 = vmatprep.subr.bf16.mxu0 %v1238_v41  ;;  %v655_v41 = vld [vmem:[%s2709_s4] sm:$0xff] }
  0x60   :  { %1241 = vmatpush1.bf16.msra.mxu0 %v1240_v51 }
  0x61   :  { %1243 = vmatprep.subr.bf16.mxu0 %v1242_v56 }
  0x64   :  { %1245 = vmatpush1.bf16.msra.mxu0 %v1244_v63 }
  0x65   :  { %1247 = vmatprep.subr.bf16.mxu0 %v1246_v4 }
  0x68   :  { %1249 = vmatpush1.bf16.msra.mxu0 %v1248_v11 }
  0x69   :  { %1251 = vmatprep.subr.bf16.mxu0 %v1250_v17 }
  0x6c   :  { %1253 = vmatpush1.bf16.msra.mxu0 %v1252_v50 }
  0x6d   :  { %23 = vsyncpa [#allocation6], 0  ;;  %1255 = vmatprep.subr.bf16.mxu0 %v1254_v30  ;;  %v1258_v43 = vpack.c.bf16 %v225_v35, %v223_v34  ;;  %v224_v44 = vld [vmem:[%s2706_s1 + $0x570] sm:$0xff]  ;;  %v660_v45 = vld [vmem:[%s2709_s4 + $0x28] sm:$0xff]  ;;  %1149 = vmatpush1.bf16.msra.mxu1 %v1148_v37  ;;  %v1344_v51 = vpack.c.bf16 %v657_v42, %v655_v41  ;;  %v337_v27 = vcombine.high %v1836_v13, %v1836_v13  ;;  %s1447_s23 = spop %1446  ;;  %vm938_vm4 = vcmask 1041408  }
  0x6e   :  { %v662_v47 = vld [vmem:[%s2709_s4 + $0x38] sm:$0xff]  ;;  %v227_v48 = vld [vmem:[%s2706_s1 + $0x588] sm:$0xff]  ;;  %v1260_v52 = vpack.c.bf16 %v224_v44, %v222_v36  ;;  %v226_v53 = vld [vmem:[%s2706_s1 + $0x580] sm:$0xff]  ;;  %1343 = vmatprep.subr.bf16.mxu1 %v1342_v40  ;;  %vm1488_vm5 = vmmov 0   ;;  %vm934_vm7 = vcmask 15360   ;;  %vm1012_vm8 = vcmask 74752  }
  0x6f   :  { %v229_v49 = vld [vmem:[%s2706_s1 + $0x598] sm:$0xff]  ;;  %v1346_v55 = vpack.c.bf16 %v662_v47, %v660_v45  ;;  %v659_v54 = vld [vmem:[%s2709_s4 + $0x20] sm:$0xff]  ;;  %v661_v56 = vld [vmem:[%s2709_s4 + $0x30] sm:$0xff] }
  0x70   :  { %1257 = vmatpush1.bf16.msra.mxu0 %v1256_v39  ;;  %v1262_v57 = vpack.c.bf16 %v229_v49, %v227_v48  ;;  %v228_v58 = vld [vmem:[%s2706_s1 + $0x590] sm:$0xff]  ;;  %v664_v59 = vld [vmem:[%s2709_s4 + $0x48] sm:$0xff]  ;;  %v666_v60 = vld [vmem:[%s2709_s4 + $0x58] sm:$0xff]  ;;  %427 = vmatmul.mubr.f32.vlgmr.msra.gmra.mrb[0].mxu1 %v1852_v19  ;;  %v1348_v63 = vpack.c.bf16 %v661_v56, %v659_v54  ;;  %v2251_v39 = vrot.slane %v337_v27, %v1645_v46 }
  0x71   :  { %1259 = vmatprep.subr.bf16.mxu0 %v1258_v43  ;;  %v231_v61 = vld [vmem:[%s2706_s1 + $0x5a8] sm:$0xff]  ;;  %v233_v62 = vld [vmem:[%s2706_s1 + $0x5b8] sm:$0xff]  ;;  %1345 = vmatpush1.bf16.msra.mxu1 %v1344_v51  ;;  %v1264_v0 = vpack.c.bf16 %v228_v58, %v226_v53  ;;  %v230_v1 = vld [vmem:[%s2706_s1 + $0x5a0] sm:$0xff]  ;;  %v1350_v2 = vpack.c.bf16 %v666_v60, %v664_v59 }
  0x72   :  { %1347 = vmatprep.subr.bf16.mxu1 %v1346_v55  ;;  %v663_v3 = vld [vmem:[%s2709_s4 + $0x40] sm:$0xff]  ;;  %v665_v4 = vld [vmem:[%s2709_s4 + $0x50] sm:$0xff]  ;;  %v1266_v19 = vpack.c.bf16 %v233_v62, %v231_v61  ;;  %v668_v6 = vld [vmem:[%s2709_s4 + $0x68] sm:$0xff]  ;;  %v353_v55 = vcombine.high %v2251_v39, %v2251_v39 }
  0x73   :  { %v232_v5 = vld [vmem:[%s2706_s1 + $0x5b0] sm:$0xff]  ;;  %v670_v7 = vld [vmem:[%s2709_s4 + $0x78] sm:$0xff]  ;;  %v235_v8 = vld [vmem:[%s2706_s1 + $0x5c8] sm:$0xff]  ;;  %v1352_v10 = vpack.c.bf16 %v665_v4, %v663_v3 }
  0x74   :  { %1261 = vmatpush1.bf16.msra.mxu0 %v1260_v52  ;;  %v237_v9 = vld [vmem:[%s2706_s1 + $0x5d8] sm:$0xff]  ;;  %v1268_v11 = vpack.c.bf16 %v232_v5, %v230_v1  ;;  %v234_v12 = vld [vmem:[%s2706_s1 + $0x5c0] sm:$0xff]  ;;  %v1354_v14 = vpack.c.bf16 %v670_v7, %v668_v6  ;;  %v669_v16 = vld [vmem:[%s2709_s4 + $0x70] sm:$0xff] }
  0x75   :  { %1263 = vmatprep.subr.bf16.mxu0 %v1262_v57  ;;  %1349 = vmatpush1.bf16.msra.mxu1 %v1348_v63  ;;  %v667_v15 = vld [vmem:[%s2709_s4 + $0x60] sm:$0xff]  ;;  %v1270_v17 = vpack.c.bf16 %v237_v9, %v235_v8  ;;  %v236_v18 = vld [vmem:[%s2706_s1 + $0x5d0] sm:$0xff]  ;;  %v672_v20 = vld [vmem:[%s2709_s4 + $0x88] sm:$0xff] }
  0x76   :  { %1351 = vmatprep.subr.bf16.mxu1 %v1350_v2  ;;  %v674_v22 = vld [vmem:[%s2709_s4 + $0x98] sm:$0xff]  ;;  %v239_v23 = vld [vmem:[%s2706_s1 + $0x5e8] sm:$0xff]  ;;  %v1356_v25 = vpack.c.bf16 %v669_v16, %v667_v15  ;;  %v1272_v50 = vpack.c.bf16 %v236_v18, %v234_v12  ;;  %v238_v26 = vld [vmem:[%s2706_s1 + $0x5e0] sm:$0xff] }
  0x77   :  { %v241_v24 = vld [vmem:[%s2706_s1 + $0x5f8] sm:$0xff]  ;;  %v1358_v28 = vpack.c.bf16 %v674_v22, %v672_v20  ;;  %v671_v29 = vld [vmem:[%s2709_s4 + $0x80] sm:$0xff]  ;;  %v673_v30 = vld [vmem:[%s2709_s4 + $0x90] sm:$0xff] }
  0x78   :  { %1265 = vmatpush1.bf16.msra.mxu0 %v1264_v0  ;;  %v1274_v31 = vpack.c.bf16 %v241_v24, %v239_v23  ;;  %v240_v32 = vld [vmem:[%s2706_s1 + $0x5f0] sm:$0xff]  ;;  %v676_v13 = vld [vmem:[%s2709_s4 + $0xa8] sm:$0xff]  ;;  %v678_v33 = vld [vmem:[%s2709_s4 + $0xb8] sm:$0xff]  ;;  %v1360_v36 = vpack.c.bf16 %v673_v30, %v671_v29 }
  0x79   :  { %1267 = vmatprep.subr.bf16.mxu0 %v1266_v19  ;;  %1353 = vmatpush1.bf16.msra.mxu1 %v1352_v10  ;;  %v243_v34 = vld [vmem:[%s2706_s1 + $0x608] sm:$0xff]  ;;  %v245_v35 = vld [vmem:[%s2706_s1 + $0x618] sm:$0xff]  ;;  %v1276_v37 = vpack.c.bf16 %v240_v32, %v238_v26  ;;  %v1362_v40 = vpack.c.bf16 %v678_v33, %v676_v13  ;;  %v675_v41 = vld [vmem:[%s2709_s4 + $0xa0] sm:$0xff] }
  0x7a   :  { %1355 = vmatprep.subr.bf16.mxu1 %v1354_v14  ;;  %v677_v42 = vld [vmem:[%s2709_s4 + $0xb0] sm:$0xff]  ;;  %v1278_v43 = vpack.c.bf16 %v245_v35, %v243_v34  ;;  %v242_v44 = vld [vmem:[%s2706_s1 + $0x600] sm:$0xff]  ;;  %v247_v45 = vld [vmem:[%s2706_s1 + $0x628] sm:$0xff] }
  0x7b   :  { %v244_v46 = vld [vmem:[%s2706_s1 + $0x610] sm:$0xff]  ;;  %v249_v47 = vld [vmem:[%s2706_s1 + $0x638] sm:$0xff]  ;;  %v680_v48 = vld [vmem:[%s2709_s4 + $0xc8] sm:$0xff]  ;;  %v1364_v51 = vpack.c.bf16 %v677_v42, %v675_v41 }
  0x7c   :  { %1269 = vmatpush1.bf16.msra.mxu0 %v1268_v11  ;;  %v682_v49 = vld [vmem:[%s2709_s4 + $0xd8] sm:$0xff]  ;;  %v1280_v52 = vpack.c.bf16 %v244_v46, %v242_v44  ;;  %v246_v53 = vld [vmem:[%s2706_s1 + $0x620] sm:$0xff]  ;;  %v681_v56 = vld [vmem:[%s2709_s4 + $0xd0] sm:$0xff]  ;;  %v1282_v57 = vpack.c.bf16 %v249_v47, %v247_v45 }
  0x7d   :  { %1271 = vmatprep.subr.bf16.mxu0 %v1270_v17  ;;  %1357 = vmatpush1.bf16.msra.mxu1 %v1356_v25  ;;  %v679_v54 = vld [vmem:[%s2709_s4 + $0xc0] sm:$0xff]  ;;  %v248_v58 = vld [vmem:[%s2706_s1 + $0x630] sm:$0xff]  ;;  %v1366_v59 = vpack.c.bf16 %v682_v49, %v680_v48  ;;  %v684_v60 = vld [vmem:[%s2709_s4 + $0xe8] sm:$0xff] }
  0x7e   :  { %1359 = vmatprep.subr.bf16.mxu1 %v1358_v28  ;;  %v686_v61 = vld [vmem:[%s2709_s4 + $0xf8] sm:$0xff]  ;;  %v251_v62 = vld [vmem:[%s2706_s1 + $0x648] sm:$0xff]  ;;  %v1368_v0 = vpack.c.bf16 %v681_v56, %v679_v54  ;;  %v1284_v1 = vpack.c.bf16 %v248_v58, %v246_v53  ;;  %v250_v2 = vld [vmem:[%s2706_s1 + $0x640] sm:$0xff] }
  0x7f   :  { %v253_v63 = vld [vmem:[%s2706_s1 + $0x658] sm:$0xff]  ;;  %v1370_v3 = vpack.c.bf16 %v686_v61, %v684_v60  ;;  %v683_v4 = vld [vmem:[%s2709_s4 + $0xe0] sm:$0xff]  ;;  %v685_v19 = vld [vmem:[%s2709_s4 + $0xf0] sm:$0xff] }
  0x80   :  { %1273 = vmatpush1.bf16.msra.mxu0 %v1272_v50  ;;  %v252_v5 = vld [vmem:[%s2706_s1 + $0x650] sm:$0xff]  ;;  %v688_v6 = vld [vmem:[%s2709_s4 + $0x108] sm:$0xff]  ;;  %v690_v7 = vld [vmem:[%s2709_s4 + $0x118] sm:$0xff]  ;;  %v1372_v10 = vpack.c.bf16 %v685_v19, %v683_v4 }
  0x81   :  { %1275 = vmatprep.subr.bf16.mxu0 %v1274_v31  ;;  %1361 = vmatpush1.bf16.msra.mxu1 %v1360_v36  ;;  %v255_v8 = vld [vmem:[%s2706_s1 + $0x668] sm:$0xff]  ;;  %v257_v9 = vld [vmem:[%s2706_s1 + $0x678] sm:$0xff]  ;;  %v1288_v11 = vpack.c.bf16 %v252_v5, %v250_v2  ;;  %v254_v12 = vld [vmem:[%s2706_s1 + $0x660] sm:$0xff]  ;;  %v1374_v14 = vpack.c.bf16 %v690_v7, %v688_v6 }
  0x82   :  { %1363 = vmatprep.subr.bf16.mxu1 %v1362_v40  ;;  %v687_v15 = vld [vmem:[%s2709_s4 + $0x100] sm:$0xff]  ;;  %v689_v16 = vld [vmem:[%s2709_s4 + $0x110] sm:$0xff]  ;;  %v1290_v17 = vpack.c.bf16 %v257_v9, %v255_v8  ;;  %v692_v20 = vld [vmem:[%s2709_s4 + $0x128] sm:$0xff] }
  0x83   :  { %v256_v18 = vld [vmem:[%s2706_s1 + $0x670] sm:$0xff]  ;;  %v694_v22 = vld [vmem:[%s2709_s4 + $0x138] sm:$0xff]  ;;  %v259_v23 = vld [vmem:[%s2706_s1 + $0x688] sm:$0xff]  ;;  %v1376_v25 = vpack.c.bf16 %v689_v16, %v687_v15 }
  0x84   :  { %1277 = vmatpush1.bf16.msra.mxu0 %v1276_v37  ;;  %v261_v24 = vld [vmem:[%s2706_s1 + $0x698] sm:$0xff]  ;;  %v1292_v50 = vpack.c.bf16 %v256_v18, %v254_v12  ;;  %v258_v26 = vld [vmem:[%s2706_s1 + $0x680] sm:$0xff]  ;;  %v1378_v27 = vpack.c.bf16 %v694_v22, %v692_v20  ;;  %v693_v29 = vld [vmem:[%s2709_s4 + $0x130] sm:$0xff] }
  0x85   :  { %1279 = vmatprep.subr.bf16.mxu0 %v1278_v43  ;;  %1365 = vmatpush1.bf16.msra.mxu1 %v1364_v51  ;;  %v691_v28 = vld [vmem:[%s2709_s4 + $0x120] sm:$0xff]  ;;  %v1294_v30 = vpack.c.bf16 %v261_v24, %v259_v23  ;;  %v260_v31 = vld [vmem:[%s2706_s1 + $0x690] sm:$0xff]  ;;  %v696_v32 = vld [vmem:[%s2709_s4 + $0x148] sm:$0xff] }
  0x86   :  { %1367 = vmatprep.subr.bf16.mxu1 %v1366_v59  ;;  %v698_v13 = vld [vmem:[%s2709_s4 + $0x158] sm:$0xff]  ;;  %v263_v33 = vld [vmem:[%s2706_s1 + $0x6a8] sm:$0xff]  ;;  %v1380_v35 = vpack.c.bf16 %v693_v29, %v691_v28  ;;  %v1296_v36 = vpack.c.bf16 %v260_v31, %v258_v26  ;;  %v262_v37 = vld [vmem:[%s2706_s1 + $0x6a0] sm:$0xff] }
  0x87   :  { %569 = vmatmul.mubr.f32.vlgmr.msra.gmra.mrb[0].mxu0 %v1856_v21  ;;  %v1286_v21 = vpack.c.bf16 %v253_v63, %v251_v62  ;;  %v265_v34 = vld [vmem:[%s2706_s1 + $0x6b8] sm:$0xff]  ;;  %v1382_v40 = vpack.c.bf16 %v698_v13, %v696_v32  ;;  %v695_v41 = vld [vmem:[%s2709_s4 + $0x140] sm:$0xff]  ;;  %v697_v42 = vld [vmem:[%s2709_s4 + $0x150] sm:$0xff] }
  0x88   :  { %1281 = vmatpush1.bf16.msra.mxu0 %v1280_v52  ;;  %639 = vmatprep.mubr.f32.mxu0 %v353_v55  ;;  %v1298_v43 = vpack.c.bf16 %v265_v34, %v263_v33  ;;  %v264_v44 = vld [vmem:[%s2706_s1 + $0x6b0] sm:$0xff]  ;;  %v700_v46 = vld [vmem:[%s2709_s4 + $0x168] sm:$0xff]  ;;  %v702_v45 = vld [vmem:[%s2709_s4 + $0x178] sm:$0xff]  ;;  %v1384_v49 = vpack.c.bf16 %v697_v42, %v695_v41 }
  0x89   :  { %1283 = vmatprep.subr.bf16.mxu0 %v1282_v57  ;;  %1369 = vmatpush1.bf16.msra.mxu1 %v1368_v0  ;;  %v267_v47 = vld [vmem:[%s2706_s1 + $0x6c8] sm:$0xff]  ;;  %v269_v48 = vld [vmem:[%s2706_s1 + $0x6d8] sm:$0xff]  ;;  %v1300_v51 = vpack.c.bf16 %v264_v44, %v262_v37  ;;  %v266_v52 = vld [vmem:[%s2706_s1 + $0x6c0] sm:$0xff]  ;;  %v1386_v53 = vpack.c.bf16 %v702_v45, %v700_v46 }
  0x8a   :  { %1371 = vmatprep.subr.bf16.mxu1 %v1370_v3  ;;  %v699_v55 = vld [vmem:[%s2709_s4 + $0x160] sm:$0xff]  ;;  %v701_v54 = vld [vmem:[%s2709_s4 + $0x170] sm:$0xff]  ;;  %v1302_v56 = vpack.c.bf16 %v269_v48, %v267_v47  ;;  %v704_v58 = vld [vmem:[%s2709_s4 + $0x188] sm:$0xff] }
  0x8b   :  { %v268_v57 = vld [vmem:[%s2706_s1 + $0x6d0] sm:$0xff]  ;;  %v706_v59 = vld [vmem:[%s2709_s4 + $0x198] sm:$0xff]  ;;  %v271_v60 = vld [vmem:[%s2706_s1 + $0x6e8] sm:$0xff]  ;;  %v1388_v62 = vpack.c.bf16 %v701_v54, %v699_v55 }
  0x8c   :  { %1285 = vmatpush1.bf16.msra.mxu0 %v1284_v1  ;;  %v273_v61 = vld [vmem:[%s2706_s1 + $0x6f8] sm:$0xff]  ;;  %v1304_v63 = vpack.c.bf16 %v268_v57, %v266_v52  ;;  %v270_v0 = vld [vmem:[%s2706_s1 + $0x6e0] sm:$0xff]  ;;  %v1390_v1 = vpack.c.bf16 %v706_v59, %v704_v58  ;;  %v705_v3 = vld [vmem:[%s2709_s4 + $0x190] sm:$0xff] }
  0x8d   :  { %1287 = vmatprep.subr.bf16.mxu0 %v1286_v21  ;;  %1373 = vmatpush1.bf16.msra.mxu1 %v1372_v10  ;;  %v703_v2 = vld [vmem:[%s2709_s4 + $0x180] sm:$0xff]  ;;  %v1306_v4 = vpack.c.bf16 %v273_v61, %v271_v60  ;;  %v272_v19 = vld [vmem:[%s2706_s1 + $0x6f0] sm:$0xff]  ;;  %v708_v21 = vld [vmem:[%s2709_s4 + $0x1a8] sm:$0xff] }
  0x8e   :  { %1375 = vmatprep.subr.bf16.mxu1 %v1374_v14  ;;  %v710_v5 = vld [vmem:[%s2709_s4 + $0x1b8] sm:$0xff]  ;;  %v275_v6 = vld [vmem:[%s2706_s1 + $0x708] sm:$0xff]  ;;  %v1392_v8 = vpack.c.bf16 %v705_v3, %v703_v2  ;;  %v1308_v9 = vpack.c.bf16 %v272_v19, %v270_v0  ;;  %v274_v12 = vld [vmem:[%s2706_s1 + $0x700] sm:$0xff] }
  0x8f   :  { %v277_v7 = vld [vmem:[%s2706_s1 + $0x718] sm:$0xff]  ;;  %v1394_v10 = vpack.c.bf16 %v710_v5, %v708_v21  ;;  %v276_v14 = vld [vmem:[%s2706_s1 + $0x710] sm:$0xff]  ;;  %v279_v15 = vld [vmem:[%s2706_s1 + $0x728] sm:$0xff] }
  0x90   :  { %1289 = vmatpush1.bf16.msra.mxu0 %v1288_v11  ;;  %v1310_v11 = vpack.c.bf16 %v277_v7, %v275_v6  ;;  %v281_v16 = vld [vmem:[%s2706_s1 + $0x738] sm:$0xff]  ;;  %v278_v20 = vld [vmem:[%s2706_s1 + $0x720] sm:$0xff]  ;;  %v280_v22 = vld [vmem:[%s2706_s1 + $0x730] sm:$0xff] }
  0x91   :  { %1291 = vmatprep.subr.bf16.mxu0 %v1290_v17  ;;  %1377 = vmatpush1.bf16.msra.mxu1 %v1376_v25  ;;  %v1312_v17 = vpack.c.bf16 %v276_v14, %v274_v12  ;;  %v1314_v18 = vpack.c.bf16 %v281_v16, %v279_v15  ;;  %v283_v23 = vld [vmem:[%s2706_s1 + $0x748] sm:$0xff]  ;;  %v285_v24 = vld [vmem:[%s2706_s1 + $0x758] sm:$0xff]  ;;  %v1316_v25 = vpack.c.bf16 %v280_v22, %v278_v20  ;;  %v282_v26 = vld [vmem:[%s2706_s1 + $0x740] sm:$0xff]  ;;  %v310_v16 = vsub.s32 0, %v1630_v38 }
  0x92   :  { %1379 = vmatprep.subr.bf16.mxu1 %v1378_v27  ;;  %v284_v27 = vld [vmem:[%s2706_s1 + $0x750] sm:$0xff]  ;;  %v287_v28 = vld [vmem:[%s2706_s1 + $0x768] sm:$0xff]  ;;  %v289_v29 = vld [vmem:[%s2706_s1 + $0x778] sm:$0xff] }
  0x93   :  { %v1322_v31 = vpack.c.bf16 %v289_v29, %v287_v28  ;;  %v286_v32 = vld [vmem:[%s2706_s1 + $0x760] sm:$0xff]  ;;  %v288_v13 = vld [vmem:[%s2706_s1 + $0x770] sm:$0xff]  ;;  %v291_v33 = vld [vmem:[%s2706_s1 + $0x788] sm:$0xff] }
  0x94   :  { %1293 = vmatpush1.bf16.msra.mxu0 %v1292_v50  ;;  %v1318_v50 = vpack.c.bf16 %v285_v24, %v283_v23  ;;  %v293_v34 = vld [vmem:[%s2706_s1 + $0x798] sm:$0xff]  ;;  %v290_v37 = vld [vmem:[%s2706_s1 + $0x780] sm:$0xff]  ;;  %v295_v41 = vld [vmem:[%s2706_s1 + $0x7a8] sm:$0xff] }
  0x95   :  { %1295 = vmatprep.subr.bf16.mxu0 %v1294_v30  ;;  %1381 = vmatpush1.bf16.msra.mxu1 %v1380_v35  ;;  %v1320_v30 = vpack.c.bf16 %v284_v27, %v282_v26  ;;  %v1324_v35 = vpack.c.bf16 %v288_v13, %v286_v32  ;;  %v297_v42 = vld [vmem:[%s2706_s1 + $0x7b8] sm:$0xff]  ;;  %v294_v46 = vld [vmem:[%s2706_s1 + $0x7a0] sm:$0xff]  ;;  %v296_v45 = vld [vmem:[%s2706_s1 + $0x7b0] sm:$0xff] }
  0x96   :  { %1383 = vmatprep.subr.bf16.mxu1 %v1382_v40  ;;  %v292_v40 = vld [vmem:[%s2706_s1 + $0x790] sm:$0xff]  ;;  %v1330_v44 = vpack.c.bf16 %v297_v42, %v295_v41  ;;  %v299_v47 = vld [vmem:[%s2706_s1 + $0x7c8] sm:$0xff]  ;;  %v301_v48 = vld [vmem:[%s2706_s1 + $0x7d8] sm:$0xff] }
  0x97   :  { %v298_v52 = vld [vmem:[%s2706_s1 + $0x7c0] sm:$0xff]  ;;  %v303_v55 = vld [vmem:[%s2706_s1 + $0x7e8] sm:$0xff]  ;;  %v305_v54 = vld [vmem:[%s2706_s1 + $0x7f8] sm:$0xff] }
  0x98   :  { %1297 = vmatpush1.bf16.msra.mxu0 %v1296_v36  ;;  %v1326_v36 = vpack.c.bf16 %v293_v34, %v291_v33  ;;  %v1338_v57 = vpack.c.bf16 %v305_v54, %v303_v55  ;;  %v302_v58 = vld [vmem:[%s2706_s1 + $0x7e0] sm:$0xff]  ;;  %v304_v59 = vld [vmem:[%s2706_s1 + $0x7f0] sm:$0xff]  ;;  %v712_v0 = vld [vmem:[%s2709_s4 + $0x1c8] sm:$0xff] }
  0x99   :  { %1299 = vmatprep.subr.bf16.mxu0 %v1298_v43  ;;  %1385 = vmatpush1.bf16.msra.mxu1 %v1384_v49  ;;  %v1328_v43 = vpack.c.bf16 %v292_v40, %v290_v37  ;;  %v1332_v49 = vpack.c.bf16 %v296_v45, %v294_v46  ;;  %v1340_v60 = vpack.c.bf16 %v304_v59, %v302_v58  ;;  %v707_v61 = vld [vmem:[%s2709_s4 + $0x1a0] sm:$0xff]  ;;  %v716_v19 = vld [vmem:[%s2709_s4 + $0x1e8] sm:$0xff]  ;;  %v718_v21 = vld [vmem:[%s2709_s4 + $0x1f8] sm:$0xff] }
  0x9a   :  { %1387 = vmatprep.subr.bf16.mxu1 %v1386_v53  ;;  %v300_v53 = vld [vmem:[%s2706_s1 + $0x7d0] sm:$0xff]  ;;  %v711_v3 = vld [vmem:[%s2709_s4 + $0x1c0] sm:$0xff]  ;;  %v1402_v5 = vpack.c.bf16 %v718_v21, %v716_v19  ;;  %v830_v13 = vld [vmem:[%s2711_s7 + $0x98] sm:$0xff] }
  0x9b   :  { %v715_v6 = vld [vmem:[%s2709_s4 + $0x1e0] sm:$0xff]  ;;  %v717_v7 = vld [vmem:[%s2709_s4 + $0x1f0] sm:$0xff]  ;;  %v814_v40 = vld [vmem:[%s2711_s7 + $0x18] sm:$0xff] }
  0x9c   :  { %1301 = vmatpush1.bf16.msra.mxu0 %v1300_v51  ;;  %v1334_v51 = vpack.c.bf16 %v301_v48, %v299_v47  ;;  %v811_v29 = vld [vmem:[%s2711_s7] sm:$0xff]  ;;  %v829_v32 = vld [vmem:[%s2711_s7 + $0x90] sm:$0xff]  ;;  %v816_v47 = vld [vmem:[%s2711_s7 + $0x28] sm:$0xff] }
  0x9d   :  { %1303 = vmatprep.subr.bf16.mxu0 %v1302_v56  ;;  %1389 = vmatpush1.bf16.msra.mxu1 %v1388_v62  ;;  %v1336_v56 = vpack.c.bf16 %v300_v53, %v298_v52  ;;  %v709_v62 = vld [vmem:[%s2709_s4 + $0x1b0] sm:$0xff]  ;;  %v831_v42 = vld [vmem:[%s2711_s7 + $0xa0] sm:$0xff]  ;;  %v818_v55 = vld [vmem:[%s2711_s7 + $0x38] sm:$0xff] }
  0x9e   :  { %1391 = vmatprep.subr.bf16.mxu1 %v1390_v1  ;;  %v714_v1 = vld [vmem:[%s2709_s4 + $0x1d8] sm:$0xff]  ;;  %v813_v37 = vld [vmem:[%s2711_s7 + $0x10] sm:$0xff]  ;;  %v815_v45 = vld [vmem:[%s2711_s7 + $0x20] sm:$0xff] }
  0x9f   :  { %v1398_v2 = vpack.c.bf16 %v714_v1, %v712_v0  ;;  %v833_v48 = vld [vmem:[%s2711_s7 + $0xb0] sm:$0xff]  ;;  %v835_v54 = vld [vmem:[%s2711_s7 + $0xc0] sm:$0xff] }
  0xa0   :  { %1305 = vmatpush1.bf16.msra.mxu0 %v1304_v63  ;;  %v1396_v63 = vpack.c.bf16 %v709_v62, %v707_v61  ;;  %v817_v53 = vld [vmem:[%s2711_s7 + $0x30] sm:$0xff]  ;;  %v819_v59 = vld [vmem:[%s2711_s7 + $0x40] sm:$0xff]  ;;  %v838_v62 = vld [vmem:[%s2711_s7 + $0xd8] sm:$0xff] }
  0xa1   :  { %1307 = vmatprep.subr.bf16.mxu0 %v1306_v4  ;;  %1393 = vmatpush1.bf16.msra.mxu1 %v1392_v8  ;;  %v713_v4 = vld [vmem:[%s2709_s4 + $0x1d0] sm:$0xff]  ;;  %v1404_v8 = vpack.c.bf16 %v717_v7, %v715_v6  ;;  %v823_v21 = vld [vmem:[%s2711_s7 + $0x60] sm:$0xff] }
  0xa2   :  { %1395 = vmatprep.subr.bf16.mxu1 %v1394_v10  ;;  %v827_v10 = vld [vmem:[%s2711_s7 + $0x80] sm:$0xff]  ;;  %v837_v61 = vld [vmem:[%s2711_s7 + $0xd0] sm:$0xff] }
  0xa3   :  { %v1426_v0 = vpack.c.bf16 %v838_v62, %v837_v61  ;;  %v821_v1 = vld [vmem:[%s2711_s7 + $0x50] sm:$0xff] }
  0xa4   :  { %1309 = vmatpush1.bf16.msra.mxu0 %v1308_v9  ;;  %v804_v9 = vld [vmem:[#allocation3] sm:$0x1]  ;;  %v841_v7 = vld [vmem:[%s2711_s7 + $0xf0] sm:$0xff] }
  0xa5   :  { %1311 = vmatprep.subr.bf16.mxu0 %v1310_v11  ;;  %1397 = vmatpush1.bf16.msra.mxu1 %v1396_v63  ;;  %v828_v11 = vld [vmem:[%s2711_s7 + $0x88] sm:$0xff]  ;;  %1448 = vpush %v804_v9 }
  0xa6   :  { %1399 = vmatprep.subr.bf16.mxu1 %v1398_v2  ;;  %v1406_v12 = vpack.c.bf16 %v828_v11, %v827_v10  ;;  %v822_v2 = vld [vmem:[%s2711_s7 + $0x58] sm:$0xff]  ;;  %v825_v10 = vld [vmem:[%s2711_s7 + $0x70] sm:$0xff] }
  0xa7   :  { %v826_v11 = vld [vmem:[%s2711_s7 + $0x78] sm:$0xff] }
  0xa8   :  { %1313 = vmatpush1.bf16.msra.mxu0 %v1312_v17  ;;  %v306_v17 = vld [vmem:[%s2707_s2] sm:$0x3] }
  0xa9   :  { %1315 = vmatprep.subr.bf16.mxu0 %v1314_v18  ;;  %v314_v18 = vsub.s32 1, %v1630_v38  ;;  %v311_v20 = vrot.slane %v306_v17, %v310_v16  ;;  %v926_v38 = vld [vmem:[%s2713_s10] sm:$0x3] }
  0xab   :  { %v315_v22 = vrot.slane %v306_v17, %v314_v18 }
  0xac   :  { %1317 = vmatpush1.bf16.msra.mxu0 %v1316_v25 }
  0xad   :  { %1319 = vmatprep.subr.bf16.mxu0 %v1318_v50  ;;  %v650_v50 = vstv %s1447_s23 }
  0xb0   :  { %1321 = vmatpush1.bf16.msra.mxu0 %v1320_v30  ;;  %v812_v30 = vld [vmem:[%s2711_s7 + $0x8] sm:$0xff] }
  0xb1   :  { %1323 = vmatprep.subr.bf16.mxu0 %v1322_v31  ;;  %v1408_v34 = vpack.c.bf16 %v812_v30, %v811_v29  ;;  %v1487_v30 = vmov 0.0  }
  0xb4   :  { %1325 = vmatpush1.bf16.msra.mxu0 %v1324_v35 }
  0xb5   :  { %1327 = vmatprep.subr.bf16.mxu0 %v1326_v36  ;;  %v1410_v36 = vpack.c.bf16 %v830_v13, %v829_v32 }
  0xb8   :  { %1329 = vmatpush1.bf16.msra.mxu0 %v1328_v43  ;;  %v832_v43 = vld [vmem:[%s2711_s7 + $0xa8] sm:$0xff] }
  0xb9   :  { %1331 = vmatprep.subr.bf16.mxu0 %v1330_v44  ;;  %v1412_v44 = vpack.c.bf16 %v814_v40, %v813_v37  ;;  %v1414_v46 = vpack.c.bf16 %v832_v43, %v831_v42 }
  0xbc   :  { %1333 = vmatpush1.bf16.msra.mxu0 %v1332_v49  ;;  %v834_v49 = vld [vmem:[%s2711_s7 + $0xb8] sm:$0xff] }
  0xbd   :  { %1335 = vmatprep.subr.bf16.mxu0 %v1334_v51  ;;  %v1416_v51 = vpack.c.bf16 %v816_v47, %v815_v45  ;;  %v1418_v52 = vpack.c.bf16 %v834_v49, %v833_v48 }
  0xc0   :  { %1337 = vmatpush1.bf16.msra.mxu0 %v1336_v56  ;;  %v836_v56 = vld [vmem:[%s2711_s7 + $0xc8] sm:$0xff] }
  0xc1   :  { %1339 = vmatprep.subr.bf16.mxu0 %v1338_v57  ;;  %v1420_v57 = vpack.c.bf16 %v818_v55, %v817_v53  ;;  %v1422_v58 = vpack.c.bf16 %v836_v56, %v835_v54 }
  0xc4   :  { %1341 = vmatpush1.bf16.msra.mxu0 %v1340_v60  ;;  %v820_v60 = vld [vmem:[%s2711_s7 + $0x48] sm:$0xff] }
  0xc5   :  { %v1424_v63 = vpack.c.bf16 %v820_v60, %v819_v59 }
  0xc7   :  { %640 = vmatmul.mubr.f32.vlgmr.msra.gmra.mrb[0].mxu0 %v2251_v39  ;;  %v1400_v39 = vpack.c.bf16 %v713_v4, %v711_v3  ;;  %v1428_v3 = vpack.c.bf16 %v822_v2, %v821_v1  ;;  %v839_v4 = vld [vmem:[%s2711_s7 + $0xe0] sm:$0xff] }
  0xc9   :  { %1401 = vmatpush1.bf16.msra.mxu1 %v1400_v39  ;;  %v840_v39 = vld [vmem:[%s2711_s7 + $0xe8] sm:$0xff] }
  0xca   :  { %1403 = vmatprep.subr.bf16.mxu1 %v1402_v5  ;;  %v1430_v19 = vpack.c.bf16 %v840_v39, %v839_v4  ;;  %v824_v5 = vld [vmem:[%s2711_s7 + $0x68] sm:$0xff] }
  0xcb   :  { %v1432_v6 = vpack.c.bf16 %v824_v5, %v823_v21 }
  0xcd   :  { %1405 = vmatpush1.bf16.msra.mxu1 %v1404_v8  ;;  %v842_v8 = vld [vmem:[%s2711_s7 + $0xf8] sm:$0xff] }
  0xce   :  { %1407 = vmatprep.subr.bf16.mxu1 %v1406_v12  ;;  %v1434_v9 = vpack.c.bf16 %v842_v8, %v841_v7  ;;  %v1436_v12 = vpack.c.bf16 %v826_v11, %v825_v10 }
  0xd6   :  { %s1449_s14 = spop %1448 }
 0x143   :  { %v428_v14 = vpop.f32.mrb[0].mxu1 }
 0x144   :  { %v430_v15 = vpop.f32.mrb[1].mxu1  ;;  %v429_v23 = vadd.f32 %v428_v14, %v311_v20  ;;  %v921_v14 = vld [vmem:[#allocation4] sm:$0x1] }
 0x145   :  { %v431_v24 = vadd.f32 %v430_v15, %v315_v22  ;;  %1450 = vpush %v921_v14  ;;  %v719_v15 = vld [vmem:[%s2710_s5] sm:$0x3] }
 0x146   :  { %v724_v17 = vrot.slane %v719_v15, %v310_v16  ;;  %v728_v20 = vrot.slane %v719_v15, %v314_v18  ;;  %v1040_v18 = vld [vmem:[%s2712_s8] ss:$0 sm:$0xff]  ;;  %s1489_s8 = smov [#allocation5]  }
 0x176   :  { %s1451_s9 = spop %1450 }
 0x177   :  { %v923_v13 = vstv %s1451_s9 }
 0x19a   :  { %v641_v25 = vpop.f32.mrb[0].mxu0 }
 0x19b   :  { %v1439_v26 = vadd.f32 %v641_v25, %v429_v23  ;;  %v643_v27 = vpop.f32.mrb[1].mxu0  ;;  %v806_v23 = vstv %s1449_s14 }
 0x19c   :  { %v1441_v28 = vadd.f32 %v643_v27, %v431_v24 }
 0x19d   :  { %v651_v31 = vmul.f32 %v1439_v26, %v650_v50  ;;  %vm646_vm0 = vcmp.gt.f32.partialorder %v1439_v26, 0.0 }
 0x19e   :  { %v652_v33 = vmul.f32 %v1441_v28, %v650_v50  ;;  %vm647_vm1 = vcmp.gt.f32.partialorder %v1441_v28, 0.0 }
 0x19f   :  { %v653_v41 = vsel %vm646_vm0, %v1439_v26, %v651_v31 }
 0x1a0   :  { %v654_v35 = vsel %vm647_vm1, %v1441_v28, %v652_v33 }
 0x1a1   :  { %795 = vmatprep.mubr.f32.mxu1 %v654_v35 }
 0x1a2   :  { %796 = vmatmul.mubr.f32.vlgmr.msra.gmra.mrb[2].mxu1 %v653_v41 }
 0x1a3   :  { %1409 = vmatpush3.bf16.msra.mxu1 %v1408_v34 }
 0x1a4   :  { %1411 = vmatprep.subr.bf16.mxu1 %v1410_v36  ;;  %v1041_v36 = vld [vmem:[%s2714_s11] ss:$0 sm:$0xff]  ;;  %s1032_s11 = sshll.u32 %s1489_s8, 4  ;;  %s1033_s11 = int_to_ptr.vmem [resolvable:$true] %s1032_s11 }
 0x1a5   :  { %s1462_s0 = scalar_lea.vmem %s1033_s11, 32  ;;  %p1467_p1 = scmp.lt.s32.totalorder %s1033_s11, %s1033_s11 }
 0x1a6   :  { %p1463_p0 = scmp.ne.s32.totalorder %s1033_s11, %s1462_s0  ;;  %p1468_p2 = scmp.lt.s32.totalorder %s1462_s0, %s1462_s0 }
 0x1a7   :  { %1413 = vmatpush3.bf16.msra.mxu1 %v1412_v44 }
 0x1a8   :  { %1415 = vmatprep.subr.bf16.mxu1 %v1414_v46  ;;  %p1469_p3 = por %p1468_p2, %p1467_p1 }
 0x1aa   :  { %p1470_p4 = pnand %p1469_p3, %p1463_p0 }
 0x1ab   :  { %1417 = vmatpush3.bf16.msra.mxu1 %v1416_v51 }
 0x1ac   :  { %1419 = vmatprep.subr.bf16.mxu1 %v1418_v52 }
 0x1af   :  { %1421 = vmatpush3.bf16.msra.mxu1 %v1420_v57 }
 0x1b0   :  { %1423 = vmatprep.subr.bf16.mxu1 %v1422_v58 }
 0x1b3   :  { %1425 = vmatpush3.bf16.msra.mxu1 %v1424_v63 }
 0x1b4   :  { %1427 = vmatprep.subr.bf16.mxu1 %v1426_v0 }
 0x1b7   :  { %1429 = vmatpush3.bf16.msra.mxu1 %v1428_v3 }
 0x1b8   :  { %1431 = vmatprep.subr.bf16.mxu1 %v1430_v19 }
 0x1bb   :  { %1433 = vmatpush3.bf16.msra.mxu1 %v1432_v6 }
 0x1bc   :  { %1435 = vmatprep.subr.bf16.mxu1 %v1434_v9 }
 0x1bf   :  { %1437 = vmatpush3.bf16.msra.mxu1 %v1436_v12 }
 0x1c0   :  { %1081 = vmatprep.subr.mxu1 %v1487_v30 }
 0x275   :  { %v797_v22 = vpop.f32.mrb[2].mxu1 }
 0x276   :  { %v798_v24 = vadd.f32 %v797_v22, %v724_v17  ;;  %v799_v25 = vpop.f32.mrb[3].mxu1 }
 0x277   :  { %v800_v50 = vadd.f32 %v799_v25, %v728_v20 }
 0x278   :  { %v807_v26 = vmul.f32 %v806_v23, %v798_v24  ;;  %vm802_vm2 = vcmp.gt.f32.partialorder %v798_v24, 0.0 }
 0x279   :  { %v808_v27 = vmul.f32 %v806_v23, %v800_v50  ;;  %vm803_vm3 = vcmp.gt.f32.partialorder %v800_v50, 0.0 }
 0x27a   :  { %v809_v29 = vsel %vm802_vm2, %v798_v24, %v807_v26 }
 0x27b   :  { %v810_v28 = vsel %vm803_vm3, %v800_v50, %v808_v27 }
 0x27c   :  { %914 = vmatprep.mubr.f32.mxu1 %v810_v28 }
 0x27d   :  { %915 = vmatmul.mubr.f32.vlgmr.msra.gmra.mrb[4].mxu1 %v809_v29 }
 0x27e   :  { %1082 = vmatpush3.msk.msra.mxu1 %vm938_vm4, %v926_v38  ;;  %1083 = vmatprep.mubr.msk.f32.mxu1 %vm1488_vm5, %v1487_v30 }
 0x350   :  { %v1076_v16 = vpop.f32.mrb[4].mxu1 }
 0x351   :  { %v1077_v31 = vpop.f32.mrb[5].mxu1 }
 0x352   :  { %v1078_v32 = vadd.f32 %v1077_v31, %v1076_v16 }
 0x354   :  { %v917_v33 = vadd.f32 %v1078_v32, %v1040_v18 }
 0x356   :  { %vm920_vm6 = vcmp.gt.f32.partialorder %v917_v33, 0.0  ;;  %v924_v34 = vmul.f32 %v923_v13, %v917_v33 }
 0x358   :  { %v925_v35 = vsel %vm920_vm6, %v917_v33, %v924_v34 }
 0x359   :  { %1084 = vmatmul.mubr.msk.f32.vlgmr.msra.gmra.mrb[6].mxu1 %vm934_vm7, %v925_v35 }
 0x42c   :  { %v1008_v37 = vpop.f32.mrb[6].mxu1 }
 0x42d   :  { %v1009_v40 = vadd.f32 %v1041_v36, %v1008_v37  ;;  %v1085_v41 = vpop.f32.mrb[7].mxu1 }
 0x42f   :  { %v1013_v42 = vsel %vm1012_vm8, %v1009_v40, -inf }
 0x430   :  { %1014 = vmax.xlane.f32.xlu0 %v1013_v42 }
 0x4bd   :  { %v1015_v43 = vpop.xlane.xlu0 %1014 }
 0x4be   :  { %v1016_v44 = vsub.f32 %v1009_v40, %v1015_v43 }
 0x4c0   :  { %v1017_v46 = vmul.f32 1.442695, %v1016_v44 }
 0x4c2   :  { %1458 = vpow2.f32 %v1017_v46 }
 0x4cc   :  { %v1459_v45 = vpop.eup %1458 }
 0x4cd   :  { %v1019_v47 = vsel %vm1012_vm8, %v1459_v45, 0.0 }
 0x4ce   :  { %1020 = vadd.xlane.f32.xlu0 %v1019_v47 }
 0x55b   :  { %v1021_v48 = vpop.xlane.xlu0 %1020 }
 0x55c   :  { %1460 = vlog2.f32 %v1021_v48 }
 0x566   :  { %v1461_v49 = vpop.eup %1460 }
 0x567   :  { %v1023_v51 = vmul.f32 0.6931472, %v1461_v49 }
 0x569   :  { %v1024_v52 = vsub.f32 %v1016_v44, %v1023_v51 }
 0x56b   :  { %1025 = vst.msk [vmem:[#allocation5] sm:$0x3] %vm1012_vm8, %v1024_v52 }
 0x56c   :  { %1473 = shalt.err (!%p1470_p4)
}
 0x56d   :  { %s1474_s20 = scalar_lea.hbm %s2715_s12, 32 }
 0x56e   :  { %p1475_p5 = scmp.ne.s32.totalorder %s2715_s12, %s1474_s20  ;;  %p1478_p6 = scmp.lt.u32.totalorder %s1474_s20, %s2715_s12 }
 0x570   :  { %p1480_p7 = pnand %p1478_p6, %p1475_p5 }
 0x572   :  { %1483 = shalt.err (!%p1480_p7)
}
 0x573   :  { %1035 = dma.vmem_to_hbm [thread:$0]  %s1033_s11, 32, %s2715_s12, [#allocation6]  }
 0x574   :  { %1484 = dma.done.wait [#allocation6], 32  }
 0x575   :  { %1485 = vsyncadd [#allocation6], 4294967264 }
 0x576   :  { %1039 = vsyncpa [#allocation6], 1 }

</bundles_post_ra>
